<compile_context>
chip_gen: v7x
topology: tpu7x:2x2x1
jax: 0.10.0
libtpu: 0.0.40
codegen_flags: <defaults>
</compile_context>

<pallas_src>
import jax
import jax.numpy as jnp
from jax.experimental import pallas as pl
from jax.experimental.pallas import tpu as pltpu

FEAT_DIM = 1280
CLASSES_NUM = 24
PADDED_CLASSES = 128  # fc2 output padded to a full 128-lane register


def _swish(h):
    # swish in f32 (v5e has no bf16 VPU/EUP); exp and the approx reciprocal
    # both land on the EUP slot, keeping the VALU free for the adds/muls.
    return h * pl.reciprocal(1.0 + jnp.exp(-h), approx=True)


# ----------------------------------------------------------------------------
# Kernel 1: fused feature extractor + frequency mean/max pooling
#   grid = (B, Wo); the freq axis is a reduction ("arbitrary"), accumulated in
#   VMEM scratch -> only (B, Ho, 1280) bf16 is ever written to HBM.
# ----------------------------------------------------------------------------
def _features_pool_kernel(p_ref, sw_ref, sb_ref, hw_ref, hb_ref, o_ref,
                          sum_acc, max_acc):
    p = p_ref[0, 0]                                       # (Ho, K) bf16 patches
    h = jnp.dot(p, sw_ref[...], preferred_element_type=jnp.float32)
    h = _swish(h + sb_ref[...])                           # stem conv + swish
    f = jnp.dot(h.astype(hw_ref.dtype), hw_ref[...],
                preferred_element_type=jnp.float32)
    f = _swish(f + hb_ref[...])                           # 1x1 head + swish, (Ho, F)

    w = pl.program_id(1)

    @pl.when(w == 0)
    def _():
        sum_acc[...] = f
        max_acc[...] = f

    @pl.when(w > 0)
    def _():
        sum_acc[...] = sum_acc[...] + f
        max_acc[...] = jnp.maximum(max_acc[...], f)

    @pl.when(w == pl.num_programs(1) - 1)
    def _():
        # torch: mean(dim=3) + max(dim=3)[0]
        t = sum_acc[...] * (1.0 / pl.num_programs(1)) + max_acc[...]
        o_ref[...] = t[None].astype(o_ref.dtype)


def features_pool_pallas(patches, stem_w, stem_b, head_w, head_b):
    """patches: (B, Wo, Ho, K) bf16 -> (B, Ho, F) bf16 (mean+max over freq)."""
    B, Wo, Ho, K = patches.shape
    S = stem_w.shape[1]
    F = head_w.shape[1]
    # TODO(synk): for very long clips (2 * Ho * F * 4 bytes of f32 scratch),
    #             tile the time axis as an additional grid dimension.
    return pl.pallas_call(
        _features_pool_kernel,
        out_shape=jax.ShapeDtypeStruct((B, Ho, F), jnp.bfloat16),
        grid=(B, Wo),
        in_specs=[
            pl.BlockSpec((1, 1, Ho, K), lambda b, w: (b, w, 0, 0)),
            pl.BlockSpec((K, S), lambda b, w: (0, 0)),
            pl.BlockSpec((1, S), lambda b, w: (0, 0)),
            pl.BlockSpec((S, F), lambda b, w: (0, 0)),
            pl.BlockSpec((1, F), lambda b, w: (0, 0)),
        ],
        out_specs=pl.BlockSpec((1, Ho, F), lambda b, w: (b, 0, 0)),
        scratch_shapes=[
            pltpu.VMEM((Ho, F), jnp.float32),     # running sum over freq
            pltpu.VMEM((Ho, F), jnp.float32),     # running max over freq
        ],
        compiler_params=pltpu.CompilerParams(
            dimension_semantics=("parallel", "arbitrary")),
    )(patches, stem_w, stem_b, head_w, head_b)


# ----------------------------------------------------------------------------
# Kernel 2: embedding (time mean) + 3-tap max/avg temporal pooling
# ----------------------------------------------------------------------------
def _pool_kernel(t_ref, pooled_ref, emb_ref):
    t = t_ref[...].astype(jnp.float32)                    # (1, Ho, tc)
    H = t.shape[1]
    # embedding = mean over time (torch: mean(dim=2))
    emb_ref[...] = jnp.mean(t, axis=1, keepdims=True).astype(emb_ref.dtype)

    # 1-D max/avg pooling over time, kernel=3, stride=1, padding=1.
    # Rolls use the XLU; edges handled with iota masks (no concat temporaries).
    idx = jax.lax.broadcasted_iota(jnp.int32, t.shape, 1)
    prev = pltpu.roll(t, 1, axis=1)                       # t[i-1] (wraps at 0)
    nxt = pltpu.roll(t, H - 1, axis=1)                    # t[i+1] (wraps at H-1)
    first = idx == 0
    last = idx == H - 1
    neg = jnp.float32(-jnp.inf)
    x1 = jnp.maximum(t, jnp.maximum(jnp.where(first, neg, prev),
                                    jnp.where(last, neg, nxt)))
    x2 = (t + jnp.where(first, 0.0, prev)
          + jnp.where(last, 0.0, nxt)) / 3.0              # count_include_pad=True
    pooled_ref[...] = (x1 + x2).astype(pooled_ref.dtype)  # bf16 store


def pool_pallas(t, *, tc=256):
    """t: (B, Ho, C) bf16 -> pooled (B, Ho, C) bf16, embedding (B, C) f32."""
    B, H, C = t.shape
    if C % tc != 0:
        tc = 128 if C % 128 == 0 else C
    pooled, emb = pl.pallas_call(
        _pool_kernel,
        out_shape=(
            jax.ShapeDtypeStruct((B, H, C), jnp.bfloat16),
            jax.ShapeDtypeStruct((B, 1, C), jnp.float32),
        ),
        grid=(B, C // tc),
        in_specs=[pl.BlockSpec((1, H, tc), lambda b, c: (b, 0, c))],
        out_specs=[
            pl.BlockSpec((1, H, tc), lambda b, c: (b, 0, c)),
            pl.BlockSpec((1, 1, tc), lambda b, c: (b, 0, c)),
        ],
        compiler_params=pltpu.CompilerParams(
            dimension_semantics=("parallel", "parallel")),
    )(t)
    return pooled, emb[:, 0, :]


# ----------------------------------------------------------------------------
# Kernel 3: fc1 + ReLU + fc2 over flattened (B*Ho) rows, 128-lane-padded output
# ----------------------------------------------------------------------------
def _fc_head_kernel(p_ref, w1_ref, b1_ref, w2_ref, b2_ref, seg_ref):
    x = p_ref[...]                                        # (tm, F) bf16
    h = jnp.dot(x, w1_ref[...], preferred_element_type=jnp.float32)
    h = jnp.maximum(h + b1_ref[...], 0.0)                 # relu (f32)
    s = jnp.dot(h.astype(w2_ref.dtype), w2_ref[...],
                preferred_element_type=jnp.float32)
    seg_ref[...] = (s + b2_ref[...]).astype(seg_ref.dtype)


def fc_head_pallas(pooled2d, w1, b1, w2p, b2p, *, tm=256):
    """pooled2d: (M, F) bf16 -> segment scores (M, 128) f32 (lanes 24: pad)."""
    M, F = pooled2d.shape
    NP = w2p.shape[1]
    Mp = -(-M // 8) * 8                     # sublane multiple (usually == M)
    if Mp != M:
        pooled2d = jnp.pad(pooled2d, ((0, Mp - M), (0, 0)))
    tm = min(tm, Mp)
    seg = pl.pallas_call(
        _fc_head_kernel,
        out_shape=jax.ShapeDtypeStruct((Mp, NP), jnp.float32),
        grid=(pl.cdiv(Mp, tm),),
        in_specs=[
            pl.BlockSpec((tm, F), lambda i: (i, 0)),
            pl.BlockSpec((F, F), lambda i: (0, 0)),
            pl.BlockSpec((1, F), lambda i: (0, 0)),
            pl.BlockSpec((F, NP), lambda i: (0, 0)),
            pl.BlockSpec((1, NP), lambda i: (0, 0)),
        ],
        out_specs=pl.BlockSpec((tm, NP), lambda i: (i, 0)),
        compiler_params=pltpu.CompilerParams(dimension_semantics=("parallel",)),
    )(pooled2d, w1, b1, w2p, b2p)
    return seg[:M] if Mp != M else seg


# ----------------------------------------------------------------------------
# Glue (plain JAX): im2col for the 3x3 stride-2 stem conv
# ----------------------------------------------------------------------------
def im2col_3x3_s2(x):
    """x: (B, H, W, C) -> (B, Ho, Wo, 9*C), stride 2, TF-'SAME' padding.

    Matches efficientnet_pytorch's Conv2dStaticSamePadding (pad//2 before,
    remainder after) for kernel=3, stride=2.
    """
    B, H, W, C = x.shape
    Ho, Wo = -(-H // 2), -(-W // 2)
    pad_h = max((Ho - 1) * 2 + 3 - H, 0)
    pad_w = max((Wo - 1) * 2 + 3 - W, 0)
    xp = jnp.pad(
        x,
        ((0, 0), (pad_h // 2, pad_h - pad_h // 2),
         (pad_w // 2, pad_w - pad_w // 2), (0, 0)),
    )
    cols = []
    for kh in range(3):
        for kw in range(3):
            cols.append(xp[:, kh:kh + 2 * Ho - 1:2, kw:kw + 2 * Wo - 1:2, :])
    return jnp.concatenate(cols, axis=-1)


# ----------------------------------------------------------------------------
# Parameters (deterministic synthetic init)
# ----------------------------------------------------------------------------
def init_params(key, feat_dim=FEAT_DIM, classes_num=CLASSES_NUM):
    ks = jax.random.split(key, 8)
    stem_in = 9 * 3     # 3x3 taps x 3 channels produced by conv0
    stem_out = 32
    return {
        "conv0_w": jax.random.normal(ks[0], (3,), jnp.float32) * 0.5,
        "conv0_b": jax.random.normal(ks[1], (3,), jnp.float32) * 0.1,
        # stem / head convs have no bias in EfficientNet; BN is identity at init
        "stem_w": jax.random.normal(ks[2], (stem_in, stem_out), jnp.float32)
        / jnp.sqrt(stem_in),
        "stem_b": jnp.zeros((stem_out,), jnp.float32),
        "head_w": jax.random.normal(ks[3], (stem_out, feat_dim), jnp.float32)
        / jnp.sqrt(stem_out),
        "head_b": jnp.zeros((feat_dim,), jnp.float32),
        "fc1_w": jax.random.normal(ks[4], (feat_dim, feat_dim), jnp.float32)
        / jnp.sqrt(feat_dim),
        "fc1_b": jnp.zeros((feat_dim,), jnp.float32),
        "fc2_w": jax.random.normal(ks[5], (feat_dim, classes_num), jnp.float32)
        / jnp.sqrt(feat_dim),
        "fc2_b": jnp.zeros((classes_num,), jnp.float32),
    }


# ----------------------------------------------------------------------------
# Forward pass (mirrors EfficientNet_simple.forward, inference mode)
# ----------------------------------------------------------------------------
def efficientnet_simple_forward(x, params):
    """x: (B, mels, T')  ->  dict(y_frame, y_clip, embedding)."""
    B, mels, T = x.shape

    # conv0 (Conv2d(1,3,1,1), pointwise affine) is linear -> folded into the
    # stem weights.  The constant ones-plane is zero-padded together with x so
    # that out-of-bounds taps contribute neither the conv0 weight nor its bias
    # (exactly like zero-padding the conv0 *output* in the reference).
    img = jnp.stack([x, jnp.ones_like(x)], axis=-1)           # (B, mels, T, 2)
    patches = im2col_3x3_s2(img)                              # (B, Wo, Ho, 18)
    _, Wo, Ho, K = patches.shape
    patches = patches.astype(jnp.bfloat16)

    # Fold conv0 into the stem weights.  The image is freq-major, so permute
    # the 3x3 taps from (k_time, k_freq) to (k_freq, k_time) order.
    stem_w4 = params["stem_w"].reshape(3, 3, 3, -1)           # [kh_t, kw_f, c, out]
    stem_w3 = jnp.transpose(stem_w4, (1, 0, 2, 3)).reshape(9, 3, -1)
    w_x = jnp.einsum("c,tcn->tn", params["conv0_w"], stem_w3)  # x-plane taps
    w_1 = jnp.einsum("c,tcn->tn", params["conv0_b"], stem_w3)  # ones-plane taps
    stem_w_folded = jnp.stack([w_x, w_1], axis=1).reshape(K, -1)  # (18, 32)

    # --- simplified EfficientNet feature extractor fused with the freq pool --
    t = features_pool_pallas(
        patches,
        stem_w_folded.astype(jnp.bfloat16),
        params["stem_b"].reshape(1, -1),
        params["head_w"].astype(jnp.bfloat16),
        params["head_b"].reshape(1, -1),
    )                                                         # (B, Ho, 1280) bf16
    # -------------------------------------------------------------------------

    # embedding = mean over time; 3-tap max+avg temporal pooling (k=3,s=1,p=1)
    pooled, embedding = pool_pallas(t)                        # bf16 / f32

    # dropout1/dropout2 are identity (training=False)
    # fc2 padded from 24 -> 128 output lanes (padded cols are zero weight/bias)
    w2p = (jnp.zeros((FEAT_DIM, PADDED_CLASSES), jnp.float32)
           .at[:, :CLASSES_NUM].set(params["fc2_w"])).astype(jnp.bfloat16)
    b2p = (jnp.zeros((1, PADDED_CLASSES), jnp.float32)
           .at[0, :CLASSES_NUM].set(params["fc2_b"]))

    seg = fc_head_pallas(
        pooled.reshape(B * Ho, FEAT_DIM),
        params["fc1_w"].astype(jnp.bfloat16),
        params["fc1_b"].reshape(1, -1),
        w2p, b2p)                                             # (B*Ho, 128) f32

    segmentwise_output = seg.reshape(B, Ho, PADDED_CLASSES)[:, :, :CLASSES_NUM]
    clipwise_output = jnp.max(segmentwise_output, axis=1)     # tiny epilogue

    return {
        "y_frame": segmentwise_output,
        "y_clip": clipwise_output,
        "embedding": embedding,
    }


# ----------------------------------------------------------------------------
if __name__ == "__main__":
    key = jax.random.PRNGKey(0)
    kx, kp = jax.random.split(key)

    B, mels, T = 2, 32, 32
    x = jax.random.normal(kx, (B, mels, T), dtype=jnp.float32)
    params = init_params(kp)

    fwd = jax.jit(efficientnet_simple_forward)
    out = fwd(x, params)
    out = jax.tree_util.tree_map(jax.block_until_ready, out)

    assert out["y_frame"].shape == (B, 16, CLASSES_NUM)
    assert out["y_clip"].shape == (B, CLASSES_NUM)
    assert out["embedding"].shape == (B, FEAT_DIM)
    assert all(bool(jnp.all(jnp.isfinite(v))) for v in out.values())

    print("KERNEL_OK")
</pallas_src>

<mosaic_0001>
module attributes {stable_mosaic.version = 11 : i64} {
  func.func @_pool_kernel(%arg0: i32, %arg1: i32, %arg2: memref<1x16x256xbf16, #tpu.memory_space<vmem>>, %arg3: memref<1x16x256xbf16, #tpu.memory_space<vmem>>, %arg4: memref<1x1x256xf32, #tpu.memory_space<vmem>>) attributes {dimension_semantics = [#tpu.dimension_semantics<parallel>, #tpu.dimension_semantics<parallel>], iteration_bounds = array<i64: 2, 5>, scalar_prefetch = 0 : i64, scratch_operands = 0 : i64, tpu.core_type = #tpu.core_type<tc>, window_params = [{transform_indices = @transform_0, window_bounds = array<i64: 1, 16, 256>}, {transform_indices = @transform_1, window_bounds = array<i64: 1, 16, 256>}, {transform_indices = @transform_2, window_bounds = array<i64: 1, 1, 256>}]} {
    %c0 = arith.constant 0 : index
    %c0_0 = arith.constant 0 : index
    %c0_1 = arith.constant 0 : index
    %0 = vector.load %arg2[%c0, %c0_0, %c0_1] : memref<1x16x256xbf16, #tpu.memory_space<vmem>>, vector<1x16x256xbf16>
    %1 = arith.extf %0 : vector<1x16x256xbf16> to vector<1x16x256xf32>
    %cst = arith.constant dense<0.000000e+00> : vector<1x256xf32>
    %2 = vector.multi_reduction <add>, %1, %cst [1] : vector<1x16x256xf32> to vector<1x256xf32>
    %3 = vector.shape_cast %2 : vector<1x256xf32> to vector<1x1x256xf32>
    %cst_2 = arith.constant 1.600000e+01 : f32
    %4 = vector.broadcast %cst_2 : f32 to vector<1x1x256xf32>
    %5 = arith.divf %3, %4 : vector<1x1x256xf32>
    %c0_3 = arith.constant 0 : index
    %c0_4 = arith.constant 0 : index
    %c0_5 = arith.constant 0 : index
    %6 = vector.load %arg4[%c0_3, %c0_4, %c0_5] : memref<1x1x256xf32, #tpu.memory_space<vmem>>, vector<1x1x256xf32>
    tpu.vector_store %arg4[%c0_3, %c0_4, %c0_5], %5 {strides = array<i32>} : memref<1x1x256xf32, #tpu.memory_space<vmem>>, vector<1x1x256xf32>,
    %7 = tpu.iota {dimensions = array<i32: 1>} : vector<1x16x256xi32>
    %c1_i32 = arith.constant 1 : i32
    %8 = tpu.dynamic_rotate %1 by %c1_i32 dim 1 : vector<1x16x256xf32>, i32 -> vector<1x16x256xf32>
    %c15_i32 = arith.constant 15 : i32
    %9 = tpu.dynamic_rotate %1 by %c15_i32 dim 1 : vector<1x16x256xf32>, i32 -> vector<1x16x256xf32>
    %c0_i32 = arith.constant 0 : i32
    %10 = vector.broadcast %c0_i32 : i32 to vector<1x16x256xi32>
    %11 = arith.cmpi eq, %7, %10 : vector<1x16x256xi32>
    %c15_i32_6 = arith.constant 15 : i32
    %12 = vector.broadcast %c15_i32_6 : i32 to vector<1x16x256xi32>
    %13 = arith.cmpi eq, %7, %12 : vector<1x16x256xi32>
    %cst_7 = arith.constant 0xFF800000 : f32
    %14 = vector.broadcast %cst_7 : f32 to vector<1x16x256xf32>
    %15 = arith.select %11, %14, %8 : vector<1x16x256xi1>, vector<1x16x256xf32>
    %cst_8 = arith.constant 0xFF800000 : f32
    %16 = vector.broadcast %cst_8 : f32 to vector<1x16x256xf32>
    %17 = arith.select %13, %16, %9 : vector<1x16x256xi1>, vector<1x16x256xf32>
    %18 = arith.maximumf %15, %17 : vector<1x16x256xf32>
    %19 = arith.maximumf %1, %18 : vector<1x16x256xf32>
    %cst_9 = arith.constant 0.000000e+00 : f32
    %20 = vector.broadcast %cst_9 : f32 to vector<1x16x256xf32>
    %21 = arith.select %11, %20, %8 : vector<1x16x256xi1>, vector<1x16x256xf32>
    %22 = arith.addf %1, %21 : vector<1x16x256xf32>
    %cst_10 = arith.constant 0.000000e+00 : f32
    %23 = vector.broadcast %cst_10 : f32 to vector<1x16x256xf32>
    %24 = arith.select %13, %23, %9 : vector<1x16x256xi1>, vector<1x16x256xf32>
    %25 = arith.addf %22, %24 : vector<1x16x256xf32>
    %cst_11 = arith.constant 3.000000e+00 : f32
    %26 = vector.broadcast %cst_11 : f32 to vector<1x16x256xf32>
    %27 = arith.divf %25, %26 : vector<1x16x256xf32>
    %28 = arith.addf %19, %27 : vector<1x16x256xf32>
    %29 = arith.truncf %28 : vector<1x16x256xf32> to vector<1x16x256xbf16>
    %c0_12 = arith.constant 0 : index
    %c0_13 = arith.constant 0 : index
    %c0_14 = arith.constant 0 : index
    %30 = vector.load %arg3[%c0_12, %c0_13, %c0_14] : memref<1x16x256xbf16, #tpu.memory_space<vmem>>, vector<1x16x256xbf16>
    tpu.vector_store %arg3[%c0_12, %c0_13, %c0_14], %29 {strides = array<i32>} : memref<1x16x256xbf16, #tpu.memory_space<vmem>>, vector<1x16x256xbf16>,
    return
  }
  func.func @transform_0(%arg0: i32, %arg1: i32) -> (i32, i32, i32) {
    %c0_i32 = arith.constant 0 : i32
    %c0_i32_0 = arith.constant 0 : i32
    return %arg0, %c0_i32, %arg1 : i32, i32, i32
  }
  func.func @transform_1(%arg0: i32, %arg1: i32) -> (i32, i32, i32) {
    %c0_i32 = arith.constant 0 : i32
    %c0_i32_0 = arith.constant 0 : i32
    return %arg0, %c0_i32, %arg1 : i32, i32, i32
  }
  func.func @transform_2(%arg0: i32, %arg1: i32) -> (i32, i32, i32) {
    %c0_i32 = arith.constant 0 : i32
    %c0_i32_0 = arith.constant 0 : i32
    return %arg0, %c0_i32, %arg1 : i32, i32, i32
  }
}

module attributes {stable_mosaic.version = 11 : i64} {
  func.func @_features_pool_kernel(%arg0: i32, %arg1: i32, %arg2: memref<1x1x16x18xbf16, #tpu.memory_space<vmem>>, %arg3: memref<18x32xbf16, #tpu.memory_space<vmem>>, %arg4: memref<1x32xf32, #tpu.memory_space<vmem>>, %arg5: memref<32x1280xbf16, #tpu.memory_space<vmem>>, %arg6: memref<1x1280xf32, #tpu.memory_space<vmem>>, %arg7: memref<1x16x1280xbf16, #tpu.memory_space<vmem>>, %arg8: memref<16x1280xf32, #tpu.memory_space<vmem>>, %arg9: memref<16x1280xf32, #tpu.memory_space<vmem>>) attributes {dimension_semantics = [#tpu.dimension_semantics<parallel>, #tpu.dimension_semantics<arbitrary>], iteration_bounds = array<i64: 2, 16>, scalar_prefetch = 0 : i64, scratch_operands = 2 : i64, tpu.core_type = #tpu.core_type<tc>, window_params = [{transform_indices = @transform_0, window_bounds = array<i64: 1, 1, 16, 18>}, {pipeline_mode = #tpu.pipeline_mode<synchronous>, transform_indices = @transform_1, window_bounds = array<i64: 18, 32>}, {pipeline_mode = #tpu.pipeline_mode<synchronous>, transform_indices = @transform_2, window_bounds = array<i64: 1, 32>}, {pipeline_mode = #tpu.pipeline_mode<synchronous>, transform_indices = @transform_3, window_bounds = array<i64: 32, 1280>}, {pipeline_mode = #tpu.pipeline_mode<synchronous>, transform_indices = @transform_4, window_bounds = array<i64: 1, 1280>}, {transform_indices = @transform_5, window_bounds = array<i64: 1, 16, 1280>}]} {
    %c0 = arith.constant 0 : index
    %c0_0 = arith.constant 0 : index
    %c0_1 = arith.constant 0 : index
    %c0_2 = arith.constant 0 : index
    %0 = vector.load %arg2[%c0, %c0_0, %c0_1, %c0_2] : memref<1x1x16x18xbf16, #tpu.memory_space<vmem>>, vector<1x1x16x18xbf16>
    %1 = vector.shape_cast %0 : vector<1x1x16x18xbf16> to vector<16x18xbf16>
    %c0_3 = arith.constant 0 : index
    %c0_4 = arith.constant 0 : index
    %2 = vector.load %arg3[%c0_3, %c0_4] : memref<18x32xbf16, #tpu.memory_space<vmem>>, vector<18x32xbf16>
    %cst = arith.constant dense<0.000000e+00> : vector<16x32xf32>
    %3 = tpu.matmul %1, %2, %cst {dimension_numbers = #tpu.dot_dimension_numbers<[1], [0], [0], [1], [0, 0, 1, 1], [], []>} : vector<16x18xbf16>, vector<18x32xbf16>, vector<16x32xf32> -> vector<16x32xf32>
    %c0_5 = arith.constant 0 : index
    %c0_6 = arith.constant 0 : index
    %4 = vector.load %arg4[%c0_5, %c0_6] : memref<1x32xf32, #tpu.memory_space<vmem>>, vector<1x32xf32>
    %5 = vector.broadcast %4 : vector<1x32xf32> to vector<16x32xf32>
    %6 = arith.addf %3, %5 : vector<16x32xf32>
    %cst_7 = arith.constant 0.000000e+00 : f32
    %7 = vector.broadcast %cst_7 : f32 to vector<16x32xf32>
    %8 = arith.subf %7, %6 : vector<16x32xf32>
    %9 = math.exp %8 : vector<16x32xf32>
    %cst_8 = arith.constant 1.000000e+00 : f32
    %10 = vector.broadcast %cst_8 : f32 to vector<16x32xf32>
    %11 = arith.addf %10, %9 : vector<16x32xf32>
    %12 = tpu.reciprocal %11 {approx = true} : vector<16x32xf32> -> vector<16x32xf32>
    %13 = arith.mulf %6, %12 : vector<16x32xf32>
    %14 = arith.truncf %13 : vector<16x32xf32> to vector<16x32xbf16>
    %c0_9 = arith.constant 0 : index
    %c0_10 = arith.constant 0 : index
    %15 = vector.load %arg5[%c0_9, %c0_10] : memref<32x1280xbf16, #tpu.memory_space<vmem>>, vector<32x1280xbf16>
    %cst_11 = arith.constant dense<0.000000e+00> : vector<16x1280xf32>
    %16 = tpu.matmul %14, %15, %cst_11 {dimension_numbers = #tpu.dot_dimension_numbers<[1], [0], [0], [1], [0, 0, 1, 1], [], []>} : vector<16x32xbf16>, vector<32x1280xbf16>, vector<16x1280xf32> -> vector<16x1280xf32>
    %c0_12 = arith.constant 0 : index
    %c0_13 = arith.constant 0 : index
    %17 = vector.load %arg6[%c0_12, %c0_13] : memref<1x1280xf32, #tpu.memory_space<vmem>>, vector<1x1280xf32>
    %18 = vector.broadcast %17 : vector<1x1280xf32> to vector<16x1280xf32>
    %19 = arith.addf %16, %18 : vector<16x1280xf32>
    %cst_14 = arith.constant 0.000000e+00 : f32
    %20 = vector.broadcast %cst_14 : f32 to vector<16x1280xf32>
    %21 = arith.subf %20, %19 : vector<16x1280xf32>
    %22 = math.exp %21 : vector<16x1280xf32>
    %cst_15 = arith.constant 1.000000e+00 : f32
    %23 = vector.broadcast %cst_15 : f32 to vector<16x1280xf32>
    %24 = arith.addf %23, %22 : vector<16x1280xf32>
    %25 = tpu.reciprocal %24 {approx = true} : vector<16x1280xf32> -> vector<16x1280xf32>
    %26 = arith.mulf %19, %25 : vector<16x1280xf32>
    %c0_i32 = arith.constant 0 : i32
    %27 = arith.cmpi eq, %arg1, %c0_i32 : i32
    %28 = arith.extui %27 : i1 to i32
    %c0_i32_16 = arith.constant 0 : i32
    %29 = arith.cmpi ne, %28, %c0_i32_16 : i32
    scf.if %29 {
      %c0_20 = arith.constant 0 : index
      %c0_21 = arith.constant 0 : index
      %36 = vector.load %arg8[%c0_20, %c0_21] : memref<16x1280xf32, #tpu.memory_space<vmem>>, vector<16x1280xf32>
      tpu.vector_store %arg8[%c0_20, %c0_21], %26 {strides = array<i32>} : memref<16x1280xf32, #tpu.memory_space<vmem>>, vector<16x1280xf32>,
      %c0_22 = arith.constant 0 : index
      %c0_23 = arith.constant 0 : index
      %37 = vector.load %arg9[%c0_22, %c0_23] : memref<16x1280xf32, #tpu.memory_space<vmem>>, vector<16x1280xf32>
      tpu.vector_store %arg9[%c0_22, %c0_23], %26 {strides = array<i32>} : memref<16x1280xf32, #tpu.memory_space<vmem>>, vector<16x1280xf32>,
    } else {
    }
    %c0_i32_17 = arith.constant 0 : i32
    %30 = arith.cmpi sgt, %arg1, %c0_i32_17 : i32
    %31 = arith.extui %30 : i1 to i32
    %c0_i32_18 = arith.constant 0 : i32
    %32 = arith.cmpi ne, %31, %c0_i32_18 : i32
    scf.if %32 {
      %c0_20 = arith.constant 0 : index
      %c0_21 = arith.constant 0 : index
      %36 = vector.load %arg8[%c0_20, %c0_21] : memref<16x1280xf32, #tpu.memory_space<vmem>>, vector<16x1280xf32>
      %37 = arith.addf %36, %26 : vector<16x1280xf32>
      %c0_22 = arith.constant 0 : index
      %c0_23 = arith.constant 0 : index
      %38 = vector.load %arg8[%c0_22, %c0_23] : memref<16x1280xf32, #tpu.memory_space<vmem>>, vector<16x1280xf32>
      tpu.vector_store %arg8[%c0_22, %c0_23], %37 {strides = array<i32>} : memref<16x1280xf32, #tpu.memory_space<vmem>>, vector<16x1280xf32>,
      %c0_24 = arith.constant 0 : index
      %c0_25 = arith.constant 0 : index
      %39 = vector.load %arg9[%c0_24, %c0_25] : memref<16x1280xf32, #tpu.memory_space<vmem>>, vector<16x1280xf32>
      %40 = arith.maximumf %39, %26 : vector<16x1280xf32>
      %c0_26 = arith.constant 0 : index
      %c0_27 = arith.constant 0 : index
      %41 = vector.load %arg9[%c0_26, %c0_27] : memref<16x1280xf32, #tpu.memory_space<vmem>>, vector<16x1280xf32>
      tpu.vector_store %arg9[%c0_26, %c0_27], %40 {strides = array<i32>} : memref<16x1280xf32, #tpu.memory_space<vmem>>, vector<16x1280xf32>,
    } else {
    }
    %c15_i32 = arith.constant 15 : i32
    %33 = arith.cmpi eq, %arg1, %c15_i32 : i32
    %34 = arith.extui %33 : i1 to i32
    %c0_i32_19 = arith.constant 0 : i32
    %35 = arith.cmpi ne, %34, %c0_i32_19 : i32
    scf.if %35 {
      %c0_20 = arith.constant 0 : index
      %c0_21 = arith.constant 0 : index
      %36 = vector.load %arg8[%c0_20, %c0_21] : memref<16x1280xf32, #tpu.memory_space<vmem>>, vector<16x1280xf32>
      %cst_22 = arith.constant 6.250000e-02 : f32
      %37 = vector.broadcast %cst_22 : f32 to vector<16x1280xf32>
      %38 = arith.mulf %36, %37 : vector<16x1280xf32>
      %c0_23 = arith.constant 0 : index
      %c0_24 = arith.constant 0 : index
      %39 = vector.load %arg9[%c0_23, %c0_24] : memref<16x1280xf32, #tpu.memory_space<vmem>>, vector<16x1280xf32>
      %40 = arith.addf %38, %39 : vector<16x1280xf32>
      %41 = vector.shape_cast %40 : vector<16x1280xf32> to vector<1x16x1280xf32>
      %42 = arith.truncf %41 : vector<1x16x1280xf32> to vector<1x16x1280xbf16>
      %c0_25 = arith.constant 0 : index
      %c0_26 = arith.constant 0 : index
      %c0_27 = arith.constant 0 : index
      %43 = vector.load %arg7[%c0_25, %c0_26, %c0_27] : memref<1x16x1280xbf16, #tpu.memory_space<vmem>>, vector<1x16x1280xbf16>
      tpu.vector_store %arg7[%c0_25, %c0_26, %c0_27], %42 {strides = array<i32>} : memref<1x16x1280xbf16, #tpu.memory_space<vmem>>, vector<1x16x1280xbf16>,
    } else {
    }
    return
  }
  func.func @transform_0(%arg0: i32, %arg1: i32) -> (i32, i32, i32, i32) {
    %c0_i32 = arith.constant 0 : i32
    %c0_i32_0 = arith.constant 0 : i32
    %c0_i32_1 = arith.constant 0 : i32
    return %arg0, %arg1, %c0_i32, %c0_i32_0 : i32, i32, i32, i32
  }
  func.func @transform_1(%arg0: i32, %arg1: i32) -> (i32, i32) {
    %c0_i32 = arith.constant 0 : i32
    %c0_i32_0 = arith.constant 0 : i32
    %c0_i32_1 = arith.constant 0 : i32
    return %c0_i32, %c0_i32_0 : i32, i32
  }
  func.func @transform_2(%arg0: i32, %arg1: i32) -> (i32, i32) {
    %c0_i32 = arith.constant 0 : i32
    %c0_i32_0 = arith.constant 0 : i32
    %c0_i32_1 = arith.constant 0 : i32
    return %c0_i32, %c0_i32_0 : i32, i32
  }
  func.func @transform_3(%arg0: i32, %arg1: i32) -> (i32, i32) {
    %c0_i32 = arith.constant 0 : i32
    %c0_i32_0 = arith.constant 0 : i32
    %c0_i32_1 = arith.constant 0 : i32
    return %c0_i32, %c0_i32_0 : i32, i32
  }
  func.func @transform_4(%arg0: i32, %arg1: i32) -> (i32, i32) {
    %c0_i32 = arith.constant 0 : i32
    %c0_i32_0 = arith.constant 0 : i32
    %c0_i32_1 = arith.constant 0 : i32
    return %c0_i32, %c0_i32_0 : i32, i32
  }
  func.func @transform_5(%arg0: i32, %arg1: i32) -> (i32, i32, i32) {
    %c0_i32 = arith.constant 0 : i32
    %c0_i32_0 = arith.constant 0 : i32
    %c0_i32_1 = arith.constant 0 : i32
    return %arg0, %c0_i32, %c0_i32_0 : i32, i32, i32
  }
}

module attributes {stable_mosaic.version = 11 : i64} {
  func.func @_fc_head_kernel(%arg0: i32, %arg1: memref<32x1280xbf16, #tpu.memory_space<vmem>>, %arg2: memref<1280x1280xbf16, #tpu.memory_space<vmem>>, %arg3: memref<1x1280xf32, #tpu.memory_space<vmem>>, %arg4: memref<1280x128xbf16, #tpu.memory_space<vmem>>, %arg5: memref<1x128xf32, #tpu.memory_space<vmem>>, %arg6: memref<32x128xf32, #tpu.memory_space<vmem>>) attributes {dimension_semantics = [#tpu.dimension_semantics<parallel>], iteration_bounds = array<i64: 1>, scalar_prefetch = 0 : i64, scratch_operands = 0 : i64, tpu.core_type = #tpu.core_type<tc>, window_params = [{transform_indices = @transform_0, window_bounds = array<i64: 32, 1280>}, {pipeline_mode = #tpu.pipeline_mode<synchronous>, transform_indices = @transform_1, window_bounds = array<i64: 1280, 1280>}, {pipeline_mode = #tpu.pipeline_mode<synchronous>, transform_indices = @transform_2, window_bounds = array<i64: 1, 1280>}, {pipeline_mode = #tpu.pipeline_mode<synchronous>, transform_indices = @transform_3, window_bounds = array<i64: 1280, 128>}, {pipeline_mode = #tpu.pipeline_mode<synchronous>, transform_indices = @transform_4, window_bounds = array<i64: 1, 128>}, {transform_indices = @transform_5, window_bounds = array<i64: 32, 128>}]} {
    %c0 = arith.constant 0 : index
    %c0_0 = arith.constant 0 : index
    %0 = vector.load %arg1[%c0, %c0_0] : memref<32x1280xbf16, #tpu.memory_space<vmem>>, vector<32x1280xbf16>
    %c0_1 = arith.constant 0 : index
    %c0_2 = arith.constant 0 : index
    %1 = vector.load %arg2[%c0_1, %c0_2] : memref<1280x1280xbf16, #tpu.memory_space<vmem>>, vector<1280x1280xbf16>
    %cst = arith.constant dense<0.000000e+00> : vector<32x1280xf32>
    %2 = tpu.matmul %0, %1, %cst {dimension_numbers = #tpu.dot_dimension_numbers<[1], [0], [0], [1], [0, 0, 1, 1], [], []>} : vector<32x1280xbf16>, vector<1280x1280xbf16>, vector<32x1280xf32> -> vector<32x1280xf32>
    %c0_3 = arith.constant 0 : index
    %c0_4 = arith.constant 0 : index
    %3 = vector.load %arg3[%c0_3, %c0_4] : memref<1x1280xf32, #tpu.memory_space<vmem>>, vector<1x1280xf32>
    %4 = vector.broadcast %3 : vector<1x1280xf32> to vector<32x1280xf32>
    %5 = arith.addf %2, %4 : vector<32x1280xf32>
    %cst_5 = arith.constant 0.000000e+00 : f32
    %6 = vector.broadcast %cst_5 : f32 to vector<32x1280xf32>
    %7 = arith.maximumf %5, %6 : vector<32x1280xf32>
    %8 = arith.truncf %7 : vector<32x1280xf32> to vector<32x1280xbf16>
    %c0_6 = arith.constant 0 : index
    %c0_7 = arith.constant 0 : index
    %9 = vector.load %arg4[%c0_6, %c0_7] : memref<1280x128xbf16, #tpu.memory_space<vmem>>, vector<1280x128xbf16>
    %cst_8 = arith.constant dense<0.000000e+00> : vector<32x128xf32>
    %10 = tpu.matmul %8, %9, %cst_8 {dimension_numbers = #tpu.dot_dimension_numbers<[1], [0], [0], [1], [0, 0, 1, 1], [], []>} : vector<32x1280xbf16>, vector<1280x128xbf16>, vector<32x128xf32> -> vector<32x128xf32>
    %c0_9 = arith.constant 0 : index
    %c0_10 = arith.constant 0 : index
    %11 = vector.load %arg5[%c0_9, %c0_10] : memref<1x128xf32, #tpu.memory_space<vmem>>, vector<1x128xf32>
    %12 = vector.broadcast %11 : vector<1x128xf32> to vector<32x128xf32>
    %13 = arith.addf %10, %12 : vector<32x128xf32>
    %c0_11 = arith.constant 0 : index
    %c0_12 = arith.constant 0 : index
    %14 = vector.load %arg6[%c0_11, %c0_12] : memref<32x128xf32, #tpu.memory_space<vmem>>, vector<32x128xf32>
    tpu.vector_store %arg6[%c0_11, %c0_12], %13 {strides = array<i32>} : memref<32x128xf32, #tpu.memory_space<vmem>>, vector<32x128xf32>,
    return
  }
  func.func @transform_0(%arg0: i32) -> (i32, i32) {
    %c0_i32 = arith.constant 0 : i32
    %c0_i32_0 = arith.constant 0 : i32
    return %arg0, %c0_i32 : i32, i32
  }
  func.func @transform_1(%arg0: i32) -> (i32, i32) {
    %c0_i32 = arith.constant 0 : i32
    %c0_i32_0 = arith.constant 0 : i32
    %c0_i32_1 = arith.constant 0 : i32
    return %c0_i32, %c0_i32_0 : i32, i32
  }
  func.func @transform_2(%arg0: i32) -> (i32, i32) {
    %c0_i32 = arith.constant 0 : i32
    %c0_i32_0 = arith.constant 0 : i32
    %c0_i32_1 = arith.constant 0 : i32
    return %c0_i32, %c0_i32_0 : i32, i32
  }
  func.func @transform_3(%arg0: i32) -> (i32, i32) {
    %c0_i32 = arith.constant 0 : i32
    %c0_i32_0 = arith.constant 0 : i32
    %c0_i32_1 = arith.constant 0 : i32
    return %c0_i32, %c0_i32_0 : i32, i32
  }
  func.func @transform_4(%arg0: i32) -> (i32, i32) {
    %c0_i32 = arith.constant 0 : i32
    %c0_i32_0 = arith.constant 0 : i32
    %c0_i32_1 = arith.constant 0 : i32
    return %c0_i32, %c0_i32_0 : i32, i32
  }
  func.func @transform_5(%arg0: i32) -> (i32, i32) {
    %c0_i32 = arith.constant 0 : i32
    %c0_i32_0 = arith.constant 0 : i32
    return %arg0, %c0_i32 : i32, i32
  }
}

</mosaic_0001>

<bundles_post_ra>
// kernel: efficientnet_simple_forward.4
= control target key start
LH: loop header
LB: loop body
LE: loop exit
PB: predicated region body
PF: predicated region fallthrough
CT: control target
= control target key end

     0   :  { %s663_s9 = smov 0   ;;  %s665_s10 = smov 0   ;;  %s834_s0 = inlined_call_operand.vmem [shape: bf16[2,16,1280], index: 0, kind: input, shape index: {}]   ;;  %s835_s1 = inlined_call_operand.vmem [shape: bf16[2,16,1280], index: 1, kind: output, shape index: {0}]   ;;  %s836_s2 = inlined_call_operand.vmem [shape: f32[2,1,1280], index: 2, kind: output, shape index: {1}]  }
   0x1   :  { %s667_s11 = smov 0   ;;  %s669_s12 = smov 0  }
   0x2   :  { %s671_s13 = smov 0   ;;  %s673_s14 = smov 0  }
   0x3   :  { %s675_s15 = smov 0  }
   0x4 LB: > { %s22_s16 = sadd.s32 1, %s637_s13  ;;  %s25_s17 = sadd.s32 1, %s641_s14  ;;  %s645_s15 = sphi %s675_s15, %s13_s15   ;;  %s641_s14 = sphi %s673_s14, %s843_s14   ;;  %s637_s13 = sphi %s671_s13, %s842_s13   ;;  %s633_s12 = sphi %s669_s12, %s841_s12   ;;  %s629_s11 = sphi %s667_s11, %s840_s11   ;;  %s625_s10 = sphi %s665_s10, %s839_s10   ;;  %s621_s9 = sphi %s663_s9, %s838_s9  }
   0x5   : > { %p23_p0 = scmp.ge.s32.totalorder %s22_s16, 5  ;;  %s511_s18 = sadd.s32 4294967295, %s645_s15  }
   0x6   : > { %p41_p1 = scmp.ne.s32.totalorder %s625_s10, %s621_s9  ;;  %p42_p2 = scmp.eq.s32.totalorder %s645_s15, 0 }
   0x7   : > { %s845_s16 = smov (%p23_p0, %s22_s16), 0  ;;  %s847_s17 = smov (!%p23_p0, %s25_s17), %s641_s14 }
   0x8   : > { %p27_p3 = scmp.ge.s32.totalorder %s847_s17, 2  ;;  %p73_p4 = scmp.eq.s32.totalorder %s511_s18, 9 }
   0x9   : > { %s30_s19 = ssub.s32 %s637_s13, %s845_s16  ;;  %p43_p5 = por %p42_p2, %p41_p1 }
   0xa   : > { %s849_s17 = smov (%p27_p3, %s847_s17), 0  ;;  %p711_p6 = por %p73_p4, %p41_p1 }
   0xb   : > { %s29_s21 = ssub.s32 %s641_s14, %s849_s17  ;;  %s34_s23 = sadd.s32 1, %s625_s10 }
   0xc   : > { %s31_s22 = sor.u32 %s30_s19, %s29_s21  ;;  %p514_p8 = scmp.ge.s32.totalorder %s645_s15, 10 }
   0xd   : > { %p32_p7 = scmp.eq.s32.totalorder %s31_s22, 0 }
   0xe   : > { %123 = sbr.rel (%p514_p8) target bundleno = 30 (0x1e), region = 16 }
   0xf   : > { %s719_s24 = scalar_select %p32_p7, %s625_s10, %s34_s23  }
  0x15   : > { %126 = sbr.rel (!%p43_p5) target bundleno = 30 (0x1e), region = 20  ;;  %s128_s25 = sand.u32 (%p43_p5), 1, %s625_s10  }
  0x16   : > { %s516_s26 = sshll.u32 (%p43_p5), %s637_s13, 1  ;;  %s515_s27 = sshll.u32 (%p43_p5), %s128_s25, 4 }
  0x17   : > { %s531_s28 = smul.u32 (%p43_p5), 20, %s641_s14  ;;  %s130_s6 = scalar_lea.vmem (%p43_p5), [#allocation2], %s515_s27 }
  0x19   : > { %s133_s29 = sadd.s32 (%p43_p5), %s531_s28, %s516_s26 }
  0x1a   : > { %s517_s30 = sshll.u32 (%p43_p5), %s133_s29, 2 }
  0x1b   : > { %s135_s5 = scalar_lea.vmem (%p43_p5), %s834_s0, %s517_s30 }
  0x1c   : > { %v165_v0 = vld [vmem:[%s135_s5] sm:$0xff]  ;;  %v167_v1 = vld [vmem:[%s135_s5 + $0x28] sm:$0xff] }
  0x1d   : > { %166 = vst [vmem:[%s130_s6] sm:$0xff] %v165_v0  ;;  %168 = vst [vmem:[%s130_s6 + $0x8] sm:$0xff] %v167_v1 }
  0x1e PF: > { %p518_p9 = scmp.ge.s32.totalorder %s645_s15, 1  ;;  %p173_p10 = scmp.lt.s32.totalorder %s645_s15, 11 }
  0x20   : > { %p174_p11 = pnand %p518_p9, %p173_p10 }
  0x21   : > { %s180_s7 = sand.u32 (!%p174_p11), 1, %s621_s9   ;;  %v248_v2 = vlaneseq (!%p174_p11)  ;;  %v647_v3 = vmov (!%p174_p11), 1966171168   ;;  %s761_s9 = sshll.u32 (!%p174_p11), %s629_s11, 1 }
  0x22   : > { %177 = sbr.rel (%p174_p11) target bundleno = 71 (0x47), region = 58  ;;  %s731_s8 = sshll.u32 (!%p174_p11), %s180_s7, 4  ;;  %v733_v4 = vunpack.c.l.s4 (!%p174_p11), %v647_v3 }
  0x23   : > { %v736_v5 = vshrl.u32 (!%p174_p11), %v248_v2, 7  ;;  %s182_s18 = scalar_lea.vmem (!%p174_p11), [#allocation2], %s731_s8  ;;  %p211_p12 = scmp.lt.s32.totalorder (!%p174_p11), %s633_s12, 1  ;;  %vm262_vm4 = vcmp.lt.s32.totalorder (!%p174_p11), %v248_v2, 256 }
  0x24   : > { %v219_v6 = vld [vmem:[%s182_s18] sm:$0xff] (!%p174_p11)  ;;  %v220_v7 = vld [vmem:[%s182_s18 + $0x8] sm:$0xff] (!%p174_p11)  ;;  %v247_v12 = vunpack.c.0.s8 (!%p174_p11), %v733_v4  ;;  %p213_p13 = scmp.lt.s32.totalorder (!%p174_p11), %s761_s9, 9  ;;  %s197_s23 = scalar_lea.vmem (!%p174_p11), [#allocation3], %s731_s8 }
  0x25   : > { %v221_v8 = vunpack.c.l.bf16 (!%p174_p11), %v219_v6  ;;  %v222_v9 = vunpack.c.h.bf16 (!%p174_p11), %v219_v6  ;;  %v739_v10 = vunpack.c.l.bf16 (!%p174_p11), %v220_v7  ;;  %v741_v11 = vunpack.c.h.bf16 (!%p174_p11), %v220_v7 }
  0x26   : > { %vm272_vm0 = vcmp.lt.s32.totalorder (!%p174_p11), %v736_v5, 1  ;;  %vm281_vm1 = vcmp.lt.s32.totalorder (!%p174_p11), %v736_v5, 7  ;;  %vm286_vm2 = vcmp.eq.s32.totalorder (!%p174_p11), %v736_v5, 0  ;;  %v267_v27 = vadd.s32 (!%p174_p11), 8, %v736_v5 }
  0x27   : > { %v225_v13 = vadd.f32 (!%p174_p11), %v739_v10, %v221_v8  ;;  %v232_v14 = vadd.f32 (!%p174_p11), %v741_v11, %v222_v9  ;;  %v268_v15 = vrot.slane (!%p174_p11), %v221_v8, 7  ;;  %v269_v16 = vrot.slane (!%p174_p11), %v222_v9, 7 }
  0x28   : > { %v270_v17 = vrot.slane (!%p174_p11), %v739_v10, 7  ;;  %v271_v18 = vrot.slane (!%p174_p11), %v741_v11, 7  ;;  %v277_v19 = vrot.slane (!%p174_p11), %v221_v8, 1  ;;  %v278_v20 = vrot.slane (!%p174_p11), %v222_v9, 1 }
  0x29   : > { %v226_v21 = vrot.slane %v225_v13, 4  ;;  %v233_v22 = vrot.slane %v232_v14, 4  ;;  %v279_v23 = vrot.slane %v739_v10, 1  ;;  %v280_v24 = vrot.slane %v741_v11, 1  ;;  %s784_s11 = scalar_select %p211_p12, %s633_s12, 1 }
  0x2a   : > { %v275_v25 = vsel %vm272_vm0, %v270_v17, %v268_v15  ;;  %v276_v26 = vsel %vm272_vm0, %v271_v18, %v269_v16  ;;  %v273_v28 = vsel %vm272_vm0, %v268_v15, %v270_v17  ;;  %v274_v43 = vsel %vm272_vm0, %v269_v16, %v271_v18  ;;  %s214_s19 = scalar_select %p213_p13, %s761_s9, 9 }
  0x2b   : > { %v227_v29 = vadd.f32 %v226_v21, %v225_v13  ;;  %v234_v30 = vadd.f32 %v233_v22, %v232_v14  ;;  %v282_v31 = vsel %vm281_vm1, %v277_v19, %v279_v23  ;;  %v283_v32 = vsel %vm281_vm1, %v278_v20, %v280_v24  ;;  %s532_s21 = smul.u32 10, %s784_s11 }
  0x2c   : > { %v290_v33 = vsel %vm286_vm2, -inf, %v275_v25  ;;  %v291_v34 = vsel %vm286_vm2, -inf, %v276_v26  ;;  %v306_v35 = vsel %vm286_vm2, 0.0, %v275_v25  ;;  %v307_v36 = vsel %vm286_vm2, 0.0, %v276_v26  ;;  %s533_s28 = smul.u32 (%p711_p6), 20, %s633_s12 }
  0x2d   : > { %v228_v37 = vrot.slane %v227_v29, 2  ;;  %v235_v38 = vrot.slane %v234_v30, 2  ;;  %v298_v39 = vmax.f32 %v290_v33, %v282_v31  ;;  %v299_v40 = vmax.f32 %v291_v34, %v283_v32  ;;  %s216_s22 = sadd.s32 %s532_s21, %s214_s19 }
  0x2e   : > { %v310_v41 = vadd.f32 %v306_v35, %v221_v8  ;;  %v311_v42 = vadd.f32 %v307_v36, %v222_v9  ;;  %v284_v44 = vsel %vm281_vm1, %v279_v23, %v277_v19  ;;  %v285_v51 = vsel %vm281_vm1, %v280_v24, %v278_v20  ;;  %s217_s27 = scalar_lea.vmem %s836_s2, %s216_s22  ;;  %s362_s29 = sadd.s32 (%p711_p6), %s533_s28, %s761_s9 }
  0x2f   : > { %v229_v45 = vadd.f32 %v228_v37, %v227_v29  ;;  %v236_v46 = vadd.f32 %v235_v38, %v234_v30  ;;  %v302_v47 = vmax.f32 %v221_v8, %v298_v39  ;;  %v303_v48 = vmax.f32 %v222_v9, %v299_v40  ;;  %s526_s30 = sshll.u32 (%p711_p6), %s362_s29, 2 }
  0x30   : > { %v318_v49 = vadd.f32 %v310_v41, %v282_v31  ;;  %v319_v50 = vadd.f32 %v311_v42, %v283_v32  ;;  %vm289_vm3 = vcmp.eq.s32.totalorder %v267_v27, 15  ;;  %v312_v62 = vadd.f32 %v273_v28, %v739_v10  ;;  %s364_s5 = scalar_lea.vmem (%p711_p6), %s835_s1, %s526_s30 }
  0x31   : > { %v230_v52 = vrot.slane %v229_v45, 1  ;;  %v237_v53 = vrot.slane %v236_v46, 1  ;;  %v296_v54 = vsel %vm289_vm3, -inf, %v284_v44  ;;  %v297_v55 = vsel %vm289_vm3, -inf, %v285_v51 }
  0x32   : > { %v323_v56 = vmul.f32 0.33333334, %v318_v49  ;;  %v324_v57 = vmul.f32 0.33333334, %v319_v50  ;;  %v300_v58 = vmax.f32 %v273_v28, %v296_v54  ;;  %v301_v59 = vmax.f32 %v274_v43, %v297_v55 }
  0x33   : > { %v231_v60 = vadd.f32 %v230_v52, %v229_v45  ;;  %v238_v61 = vadd.f32 %v237_v53, %v236_v46  ;;  %v313_v63 = vadd.f32 %v274_v43, %v741_v11  ;;  %v250_v0 = vsub.s32 %v247_v12, %v736_v5 }
  0x34   : > { %v327_v1 = vadd.f32 %v323_v56, %v302_v47  ;;  %v328_v3 = vadd.f32 %v324_v57, %v303_v48  ;;  %v304_v4 = vmax.f32 %v739_v10, %v300_v58  ;;  %v316_v8 = vsel %vm289_vm3, 0.0, %v284_v44 }
  0x35   : > { %v240_v6 = vmul.f32 0.0625, %v231_v60  ;;  %v241_v7 = vmul.f32 0.0625, %v238_v61  ;;  %v317_v9 = vsel %vm289_vm3, 0.0, %v285_v51  ;;  %v305_v14 = vmax.f32 %v741_v11, %v301_v59 }
  0x36   : > { %v529_v13 = vpack.c.bf16 %v328_v3, %v327_v1  ;;  %v320_v15 = vadd.f32 %v316_v8, %v312_v62  ;;  %v321_v16 = vadd.f32 %v317_v9, %v313_v63 }
  0x37   : > { %v244_v17 = vcombine.low %v240_v6, %v241_v7 }
  0x38   : > { %343 = vst [vmem:[%s197_s23] sm:$0xff] %v529_v13  ;;  %v325_v5 = vmul.f32 0.33333334, %v320_v15  ;;  %v326_v12 = vmul.f32 0.33333334, %v321_v16  ;;  %359 = sbr.rel (!%p711_p6) target bundleno = 71 (0x47), region = 66 }
  0x39   : > { %v251_v18 = vrot.slane %v244_v17, %v250_v0 }
  0x3a   : > { %v329_v10 = vadd.f32 %v325_v5, %v304_v4  ;;  %v330_v19 = vadd.f32 %v326_v12, %v305_v14 }
  0x3b   : > { %v258_v20 = vrot.slane %v251_v18, %v250_v0 }
  0x3c   : > { %v530_v21 = vpack.c.bf16 %v330_v19, %v329_v10 }
  0x3d   : > { %264 = vst.msk [vmem:[%s217_s27] sm:$0x3] %vm262_vm4, %v258_v20 }
  0x3e   : > { %344 = vst [vmem:[%s197_s23 + $0x8] sm:$0xff] %v530_v21 }
  0x3f   : > { %v394_v11 = vld [vmem:[%s197_s23] sm:$0xff] }
  0x40   : > { %395 = vst [vmem:[%s364_s5] sm:$0xff] %v394_v11 }
  0x45   : > { %v396_v22 = vld [vmem:[%s197_s23 + $0x8] sm:$0xff] }
  0x46   : > { %397 = vst [vmem:[%s364_s5 + $0x28] sm:$0xff] %v396_v22 }
  0x47 PF: > { %s13_s15 = sadd.s32 1, %s645_s15   ;;  %s838_s9 = smov %s625_s10 }
  0x48   : > { %p10_p0 = scmp.ge.s32.totalorder %s13_s15, 12   ;;  %s839_s10 = smov %s719_s24 }
  0x49   : > { %s840_s11 = smov %s637_s13  ;;  %s841_s12 = smov %s641_s14 }
  0x4a   : > { %s842_s13 = smov %s845_s16  ;;  %s843_s14 = smov %s849_s17 }
  0x4b   :  { %12 = sbr.rel (!%p10_p0) target bundleno = 4 (0x4), region = 147 }

// kernel: efficientnet_simple_forward.3
= control target key start
LH: loop header
LB: loop body
LE: loop exit
PB: predicated region body
PF: predicated region fallthrough
CT: control target
= control target key end

     0   :  { %s1563_s18 = smov 0   ;;  %s1565_s19 = smov 0   ;;  %s1943_s0 = inlined_call_operand.vmem [shape: bf16[2,16,16,18], index: 0, kind: input, shape index: {}]   ;;  %s1944_s1 = inlined_call_operand.vmem [shape: bf16[18,32], index: 1, kind: input, shape index: {}]   ;;  %s1945_s2 = inlined_call_operand.vmem [shape: f32[1,32], index: 2, kind: input, shape index: {}]   ;;  %s1946_s3 = inlined_call_operand.vmem [shape: bf16[32,1280], index: 3, kind: input, shape index: {}]   ;;  %s1947_s4 = inlined_call_operand.vmem [shape: f32[1,1280], index: 4, kind: input, shape index: {}]   ;;  %s1948_s5 = inlined_call_operand.vmem [shape: bf16[2,16,1280], index: 5, kind: output, shape index: {}]  }
   0x1   :  { %s1567_s20 = smov 0   ;;  %s1569_s21 = smov 0  }
   0x2   :  { %s1571_s22 = smov 0  }
   0x3 LB: > { %s24_s23 = sadd.s32 1, %s1520_s20  ;;  %s27_s24 = sadd.s32 1, %s1524_s21  ;;  %s1528_s22 = sphi %s1571_s22, %s15_s22   ;;  %s1524_s21 = sphi %s1569_s21, %s1952_s21   ;;  %s1520_s20 = sphi %s1567_s20, %s1951_s20   ;;  %s1516_s19 = sphi %s1565_s19, %s1950_s19   ;;  %s1512_s18 = sphi %s1563_s18, %s1949_s18  }
   0x4   : > { %p25_p0 = scmp.ge.s32.totalorder %s24_s23, 16  ;;  %p1254_p1 = scmp.ge.s32.totalorder %s1528_s22, 1 }
   0x5   : > { %p205_p2 = scmp.lt.s32.totalorder %s1528_s22, 33 }
   0x6   : > { %s1954_s23 = smov (%p25_p0, %s24_s23), 0  ;;  %s1956_s24 = smov (!%p25_p0, %s27_s24), %s1524_s21 }
   0x7   : > { %p206_p3 = pnand %p1254_p1, %p205_p2  ;;  %p29_p4 = scmp.ge.s32.totalorder %s1956_s24, 2 }
   0x8   : > { %v1369_v0 = vld [vmem:[%s1944_s1] sm:$0xff] (!%p206_p3)   ;;  %v1530_v1 = vmov (!%p206_p3), 0.0   ;;  %v1370_v2 = vld [vmem:[%s1944_s1 + $0x8] ss:$0 sps:$4 sm:$0x11] (!%p206_p3)   ;;  %vm282_vm0 = vcmask (!%p206_p3), 1040384   ;;  %v364_v46 = vlaneseq (!%p206_p3) }
   0x9   : > { %s1958_s24 = smov (%p29_p4, %s1956_s24), 0  ;;  %209 = sbr.rel (%p206_p3) target bundleno = 594 (0x252), region = 40 }
   0xa   : > { %1317 = vmatprep.subr.bf16.mxu0 (!%p206_p3), %v1530_v1  ;;  %p237_p5 = scmp.lt.s32.totalorder (!%p206_p3), %s1516_s19, 1  ;;  %p239_p6 = scmp.lt.s32.totalorder (!%p206_p3), %s1512_s18, 15  ;;  %v284_v3 = vsel (!%p206_p3), %vm282_vm0, %v1370_v2, 0  ;;  %vm1531_vm1 = vmmov (!%p206_p3), 0   ;;  %vm278_vm2 = vcmask (!%p206_p3), 146432   ;;  %v1532_v14 = vmov (!%p206_p3), 0  }
   0xb   : > { %1318 = vmatpush3.bf16.msra.mxu0 (!%p206_p3), %v1369_v0  ;;  %1321 = vmatprep.mubr.msk.bf16.mxu0 (!%p206_p3), %vm1531_vm1, %v1530_v1  ;;  %v1372_v5 = vld [vmem:[%s1946_s3 + $0x4] ss:$40 sps:$4 sm:$0xff] (!%p206_p3)   ;;  %v1374_v7 = vld [vmem:[%s1946_s3] ss:$40 sps:$4 sm:$0xff] (!%p206_p3)   ;;  %v1378_v9 = vld [vmem:[%s1946_s3 + $0x54] ss:$40 sps:$4 sm:$0xff] (!%p206_p3)  }
   0xc   : > { %1319 = vmatprep.subr.bf16.mxu0 (!%p206_p3), %v1530_v1  ;;  %v1377_v6 = vld [vmem:[%s1946_s3 + $0xc] ss:$40 sps:$4 sm:$0xff] (!%p206_p3)   ;;  %v1375_v8 = vld [vmem:[%s1946_s3 + $0x8] ss:$40 sps:$4 sm:$0xff] (!%p206_p3)   ;;  %518 = vmatprep.subr.bf16.mxu1 (!%p206_p3), %v1372_v5  ;;  %v1383_v10 = vld [vmem:[%s1946_s3 + $0x5c] ss:$40 sps:$4 sm:$0xff] (!%p206_p3)  }
   0xd   : > { %519 = vmatpush1.bf16.msra.mxu1 (!%p206_p3), %v1374_v7  ;;  %v1380_v11 = vld [vmem:[%s1946_s3 + $0x50] ss:$40 sps:$4 sm:$0xff] (!%p206_p3)   ;;  %v1386_v13 = vld [vmem:[%s1946_s3 + $0x14] ss:$40 sps:$4 sm:$0xff] (!%p206_p3)   ;;  %550 = vmatprep.mubr.bf16.mxu1 (!%p206_p3), %v1532_v14  ;;  %v1259_v16 = vld [vmem:[%s1945_s2] ss:$0 sm:$0xff] (!%p206_p3) }
   0xe   : > { %v1381_v12 = vld [vmem:[%s1946_s3 + $0x58] ss:$40 sps:$4 sm:$0xff] (!%p206_p3)   ;;  %520 = vmatprep.subr.bf16.mxu1 (!%p206_p3), %v1378_v9  ;;  %v1389_v15 = vld [vmem:[%s1946_s3 + $0x1c] ss:$40 sps:$4 sm:$0xff] (!%p206_p3)   ;;  %vm514_vm3 = vcmask (!%p206_p3), 261120   ;;  %v1679_v47 = vshrl.u32 (!%p206_p3), %v364_v46, 7 }
   0xf   : > { %1320 = vmatpush3.bf16.msra.mxu0 (!%p206_p3), %v284_v3  ;;  %v1384_v35 = vld [vmem:[%s1946_s3 + $0x10] ss:$40 sps:$4 sm:$0xff] (!%p206_p3)   ;;  %v1392_v38 = vld [vmem:[%s1946_s3 + $0x64] ss:$40 sps:$4 sm:$0xff] (!%p206_p3)   ;;  %v1390_v40 = vld [vmem:[%s1946_s3 + $0x60] ss:$40 sps:$4 sm:$0xff] (!%p206_p3)  }
  0x10   : > { %s1960_s19 = smov (!%p237_p5, %s1516_s19), 1  ;;  %561 = vmatprep.subr.bf16.mxu0 %v1377_v6  ;;  %v1387_v36 = vld [vmem:[%s1946_s3 + $0x18] ss:$40 sps:$4 sm:$0xff]   ;;  %v1395_v39 = vld [vmem:[%s1946_s3 + $0x6c] ss:$40 sps:$4 sm:$0xff]   ;;  %v366_v48 = vsub.s32 0, %v1679_v47 }
  0x11   : > { %s240_s29 = scalar_select %p239_p6, %s1512_s18, 15  ;;  %521 = vmatpush1.bf16.msra.mxu1 %v1380_v11  ;;  %v1393_v41 = vld [vmem:[%s1946_s3 + $0x68] ss:$40 sps:$4 sm:$0xff]   ;;  %v1398_v42 = vld [vmem:[%s1946_s3 + $0x24] ss:$40 sps:$4 sm:$0xff]   ;;  %v374_v49 = vsub.s32 2, %v1679_v47 }
  0x12   : > { %s1256_s30 = sshll.u32 %s1960_s19, 5  ;;  %s1325_s6 = smul.u32 80, %s1960_s19  ;;  %604 = vmatprep.subr.bf16.mxu1 %v1386_v13  ;;  %v1396_v43 = vld [vmem:[%s1946_s3 + $0x20] ss:$40 sps:$4 sm:$0xff]   ;;  %v1401_v44 = vld [vmem:[%s1946_s3 + $0x74] ss:$40 sps:$4 sm:$0xff]  }
  0x13   : > { %s1255_s7 = sshll.u32 %s240_s29, 1  ;;  %v1399_v45 = vld [vmem:[%s1946_s3 + $0x70] ss:$40 sps:$4 sm:$0xff]   ;;  %v360_v50 = vld [vmem:[%s1947_s4] sm:$0xff]  ;;  %v370_v51 = vsub.s32 1, %v1679_v47  ;;  %v378_v52 = vsub.s32 3, %v1679_v47 }
  0x14   : > { %s243_s8 = sadd.s32 %s1256_s30, %s1255_s7  ;;  %s1606_s11 = scalar_lea.vmem %s1948_s5, %s1325_s6  ;;  %v367_v53 = vrot.slane %v360_v50, %v366_v48  ;;  %v375_v54 = vrot.slane %v360_v50, %v374_v49  ;;  %v382_v55 = vsub.s32 4, %v1679_v47  ;;  %v390_v56 = vsub.s32 6, %v1679_v47 }
  0x15   : > { %s1257_s12 = sshll.u32 %s243_s8, 2  ;;  %v371_v57 = vrot.slane %v360_v50, %v370_v51  ;;  %v379_v58 = vrot.slane %v360_v50, %v378_v52  ;;  %v386_v59 = vsub.s32 5, %v1679_v47  ;;  %v394_v60 = vsub.s32 7, %v1679_v47  ;;  %p1289_p7 = scmp.ne.s32.totalorder %s1512_s18, 0 }
  0x16   : > { %s245_s15 = scalar_lea.vmem %s1943_s0, %s1257_s12  ;;  %v383_v3 = vrot.slane %v360_v50, %v382_v55 }
  0x17   : > { %v1371_v4 = vld [vmem:[%s245_s15] sm:$0xff]   ;;  %v1706_v9 = vrot.slane %v360_v50, %v386_v59 }
  0x18   : > { %1322 = vmatmul.mubr.msk.bf16.vlgmr.msra.gmra.mrb[0].mxu0 %vm278_vm2, %v1371_v4  ;;  %v1700_v4 = vrot.slane %v360_v50, %v390_v56 }
  0x19   : > { %562 = vmatpush1.bf16.msra.mxu0 %v1375_v8  ;;  %593 = vmatprep.mubr.bf16.mxu0 %v1532_v14 }
  0x1a   : > { %563 = vmatprep.subr.bf16.mxu0 %v1383_v10  ;;  %v1708_v10 = vrot.slane %v360_v50, %v394_v60 }
  0x1d   : > { %564 = vmatpush1.bf16.msra.mxu0 %v1381_v12 }
  0x1e   : > { %647 = vmatprep.subr.bf16.mxu0 %v1389_v15 }
  0xeb   : > { %v320_v17 = vpop.f32.mrb[0].mxu0 }
  0xec   : > { %v321_v18 = vadd.f32 %v1259_v16, %v320_v17  ;;  %v1323_v19 = vpop.f32.mrb[1].mxu0 }
  0xed   : > { %v323_v20 = vpop.f32.mrb[2].mxu0 }
  0xee   : > { %v327_v21 = vsub.f32 0.0, %v321_v18  ;;  %v324_v22 = vadd.f32 %v1259_v16, %v323_v20  ;;  %v1324_v23 = vpop.f32.mrb[3].mxu0 }
  0xf0   : > { %v329_v24 = vmul.f32 1.442695, %v327_v21  ;;  %v328_v25 = vsub.f32 0.0, %v324_v22 }
  0xf2   : > { %1402 = vpow2.f32 %v329_v24  ;;  %v331_v26 = vmul.f32 1.442695, %v328_v25 }
  0xf4   : > { %1404 = vpow2.f32 %v331_v26 }
  0xfc   : > { %v1403_v27 = vpop.eup %1402 }
  0xfd   : > { %v333_v28 = vadd.f32 1.0, %v1403_v27 }
  0xfe   : > { %v1405_v29 = vpop.eup %1404 }
  0xff   : > { %1406 = vrcp.f32 %v333_v28  ;;  %v334_v30 = vadd.f32 1.0, %v1405_v29 }
 0x101   : > { %1408 = vrcp.f32 %v334_v30 }
 0x109   : > { %v1407_v31 = vpop.eup %1406 }
 0x10a   : > { %v337_v33 = vmul.f32 %v1407_v31, %v321_v18 }
 0x10b   : > { %v1409_v32 = vpop.eup %1408 }
 0x10c   : > { %v338_v34 = vmul.f32 %v1409_v32, %v324_v22 }
 0x10e   : > { %v339_v37 = vpack.c.bf16 %v338_v34, %v337_v33 }
 0x110   : > { %1284 = vmatmul.mubr.msk.bf16.vlgmr.msra.gmra.mrb[0].mxu1 %vm514_vm3, %v339_v37  ;;  %1285 = vmatmul.mubr.msk.bf16.vlgmr.msra.gmra.mrb[4].mxu0 %vm514_vm3, %v339_v37 }
 0x111   : > { %605 = vmatpush1.bf16.msra.mxu1 %v1384_v35  ;;  %648 = vmatpush1.bf16.msra.mxu0 %v1387_v36 }
 0x112   : > { %606 = vmatprep.subr.bf16.mxu1 %v1392_v38  ;;  %649 = vmatprep.subr.bf16.mxu0 %v1395_v39 }
 0x113   : > { %636 = vmatprep.mubr.bf16.mxu1 %v1532_v14  ;;  %679 = vmatprep.mubr.bf16.mxu0 %v1532_v14 }
 0x115   : > { %607 = vmatpush1.bf16.msra.mxu1 %v1390_v40  ;;  %650 = vmatpush1.bf16.msra.mxu0 %v1393_v41 }
 0x116   : > { %690 = vmatprep.subr.bf16.mxu1 %v1398_v42 }
 0x118   : > { %1286 = vmatmul.mubr.msk.bf16.vlgmr.msra.gmra.mrb[4].mxu1 %vm514_vm3, %v339_v37  ;;  %1287 = vmatmul.mubr.msk.bf16.vlgmr.msra.gmra.mrb[8].mxu0 %vm514_vm3, %v339_v37 }
 0x119   : > { %691 = vmatpush1.bf16.msra.mxu1 %v1396_v43  ;;  %722 = vmatprep.mubr.bf16.mxu1 %v1532_v14 }
 0x11a   : > { %692 = vmatprep.subr.bf16.mxu1 %v1401_v44 }
 0x11d   : > { %693 = vmatpush1.bf16.msra.mxu1 %v1399_v45 }
 0x120   : > { %1288 = vmatmul.mubr.msk.bf16.vlgmr.msra.gmra.mrb[8].mxu1 %vm514_vm3, %v339_v37 }
 0x1e3   : > { %v552_v61 = vpop.f32.mrb[0].mxu1  ;;  %v595_v62 = vpop.f32.mrb[4].mxu0 }
 0x1e4   : > { %v1696_v63 = vadd.f32 %v552_v61, %v367_v53  ;;  %v1698_v0 = vadd.f32 %v595_v62, %v375_v54  ;;  %v554_v1 = vpop.f32.mrb[1].mxu1  ;;  %v597_v2 = vpop.f32.mrb[5].mxu0  ;;  %v361_v61 = vld [vmem:[%s1947_s4 + $0x8] sm:$0x3] }
 0x1e5   : > { %v1702_v5 = vadd.f32 %v554_v1, %v371_v57  ;;  %v1704_v6 = vadd.f32 %v597_v2, %v379_v58  ;;  %v556_v7 = vpop.f32.mrb[2].mxu1  ;;  %v599_v8 = vpop.f32.mrb[6].mxu0 }
 0x1e6   : > { %v733_v11 = vsub.f32 0.0, %v1696_v63  ;;  %v735_v12 = vsub.f32 0.0, %v1698_v0  ;;  %v1712_v13 = vadd.f32 %v556_v7, %v367_v53  ;;  %v1714_v14 = vadd.f32 %v599_v8, %v375_v54  ;;  %v558_v15 = vpop.f32.mrb[3].mxu1  ;;  %v601_v16 = vpop.f32.mrb[7].mxu0 }
 0x1e7   : > { %v734_v17 = vsub.f32 0.0, %v1702_v5  ;;  %v736_v18 = vsub.f32 0.0, %v1704_v6  ;;  %v1718_v19 = vadd.f32 %v558_v15, %v371_v57  ;;  %v1720_v20 = vadd.f32 %v601_v16, %v379_v58 }
 0x1e8   : > { %v753_v21 = vmul.f32 1.442695, %v733_v11  ;;  %v757_v22 = vmul.f32 1.442695, %v735_v12  ;;  %v743_v23 = vsub.f32 0.0, %v1712_v13  ;;  %v745_v24 = vsub.f32 0.0, %v1714_v14 }
 0x1e9   : > { %v755_v25 = vmul.f32 1.442695, %v734_v17  ;;  %v759_v26 = vmul.f32 1.442695, %v736_v18  ;;  %v744_v27 = vsub.f32 0.0, %v1718_v19  ;;  %v746_v28 = vsub.f32 0.0, %v1720_v20 }
 0x1ea   : > { %1410 = vpow2.f32 %v753_v21  ;;  %v773_v29 = vmul.f32 1.442695, %v743_v23  ;;  %v777_v30 = vmul.f32 1.442695, %v745_v24  ;;  %v399_v16 = vrot.slane %v361_v61, %v366_v48 }
 0x1eb   : > { %1412 = vpow2.f32 %v757_v22  ;;  %v638_v31 = vpop.f32.mrb[4].mxu1  ;;  %v681_v32 = vpop.f32.mrb[8].mxu0  ;;  %v775_v33 = vmul.f32 1.442695, %v744_v27  ;;  %v779_v38 = vmul.f32 1.442695, %v746_v28  ;;  %v403_v22 = vrot.slane %v361_v61, %v370_v51 }
 0x1ec   : > { %1414 = vpow2.f32 %v755_v25  ;;  %v1726_v34 = vadd.f32 %v638_v31, %v383_v3  ;;  %v1729_v35 = vadd.f32 %v681_v32, %v1700_v4  ;;  %v640_v36 = vpop.f32.mrb[5].mxu1  ;;  %v683_v37 = vpop.f32.mrb[9].mxu0 }
 0x1ed   : > { %1416 = vpow2.f32 %v759_v26  ;;  %v1732_v39 = vadd.f32 %v640_v36, %v1706_v9  ;;  %v1735_v40 = vadd.f32 %v683_v37, %v1708_v10  ;;  %v642_v41 = vpop.f32.mrb[6].mxu1  ;;  %v685_v42 = vpop.f32.mrb[10].mxu0 }
 0x1ee   : > { %1418 = vpow2.f32 %v773_v29  ;;  %v737_v43 = vsub.f32 0.0, %v1726_v34  ;;  %v739_v44 = vsub.f32 0.0, %v1729_v35  ;;  %v1739_v45 = vadd.f32 %v642_v41, %v383_v3  ;;  %v644_v46 = vpop.f32.mrb[7].mxu1  ;;  %v687_v49 = vpop.f32.mrb[11].mxu0 }
 0x1ef   : > { %1420 = vpow2.f32 %v777_v30  ;;  %v738_v50 = vsub.f32 0.0, %v1732_v39  ;;  %v740_v52 = vsub.f32 0.0, %v1735_v40  ;;  %v1750_v21 = vadd.f32 %v685_v42, %v1700_v4 }
 0x1f0   : > { %1422 = vpow2.f32 %v775_v33  ;;  %v761_v53 = vmul.f32 1.442695, %v737_v43  ;;  %v765_v54 = vmul.f32 1.442695, %v739_v44  ;;  %v747_v55 = vsub.f32 0.0, %v1739_v45 }
 0x1f1   : > { %1424 = vpow2.f32 %v779_v38  ;;  %v763_v56 = vmul.f32 1.442695, %v738_v50  ;;  %v767_v57 = vmul.f32 1.442695, %v740_v52  ;;  %v1755_v25 = vadd.f32 %v644_v46, %v1706_v9 }
 0x1f2   : > { %1426 = vpow2.f32 %v761_v53  ;;  %v781_v58 = vmul.f32 1.442695, %v747_v55  ;;  %v1758_v48 = vadd.f32 %v687_v49, %v1708_v10  ;;  %v749_v51 = vsub.f32 0.0, %v1750_v21 }
 0x1f3   : > { %1428 = vpow2.f32 %v765_v54  ;;  %v724_v59 = vpop.f32.mrb[8].mxu1  ;;  %v748_v33 = vsub.f32 0.0, %v1755_v25 }
 0x1f4   : > { %v1411_v60 = vpop.eup %1410  ;;  %1430 = vpow2.f32 %v763_v56  ;;  %v726_v62 = vpop.f32.mrb[9].mxu1  ;;  %v1760_v4 = vadd.f32 %v724_v59, %v399_v16  ;;  %v750_v38 = vsub.f32 0.0, %v1758_v48  ;;  %v785_v50 = vmul.f32 1.442695, %v749_v51 }
 0x1f5   : > { %v1413_v1 = vpop.eup %1412  ;;  %v793_v2 = vadd.f32 1.0, %v1411_v60  ;;  %1432 = vpow2.f32 %v767_v57  ;;  %v728_v3 = vpop.f32.mrb[10].mxu1  ;;  %v1763_v31 = vadd.f32 %v726_v62, %v403_v22  ;;  %v783_v55 = vmul.f32 1.442695, %v748_v33 }
 0x1f6   : > { %v1415_v7 = vpop.eup %1414  ;;  %v795_v8 = vadd.f32 1.0, %v1413_v1  ;;  %1434 = vpow2.f32 %v781_v58  ;;  %v730_v11 = vpop.f32.mrb[11].mxu1  ;;  %v1766_v36 = vadd.f32 %v728_v3, %v399_v16  ;;  %v741_v44 = vsub.f32 0.0, %v1760_v4 }
 0x1f7   : > { %v1417_v12 = vpop.eup %1416  ;;  %1436 = vrcp.f32 %v793_v2  ;;  %v794_v15 = vadd.f32 1.0, %v1415_v7  ;;  %v1769_v41 = vadd.f32 %v730_v11, %v403_v22  ;;  %v742_v52 = vsub.f32 0.0, %v1763_v31 }
 0x1f8   : > { %v1419_v17 = vpop.eup %1418  ;;  %1438 = vrcp.f32 %v795_v8  ;;  %v796_v18 = vadd.f32 1.0, %v1417_v12  ;;  %v751_v56 = vsub.f32 0.0, %v1766_v36  ;;  %v787_v59 = vmul.f32 1.442695, %v750_v38 }
 0x1f9   : > { %v1421_v23 = vpop.eup %1420  ;;  %1440 = vrcp.f32 %v794_v15  ;;  %v803_v24 = vadd.f32 1.0, %v1419_v17  ;;  %v752_v60 = vsub.f32 0.0, %v1769_v41  ;;  %v769_v1 = vmul.f32 1.442695, %v741_v44 }
 0x1fa   : > { %v1423_v26 = vpop.eup %1422  ;;  %1442 = vrcp.f32 %v796_v18  ;;  %v805_v27 = vadd.f32 1.0, %v1421_v23  ;;  %v771_v7 = vmul.f32 1.442695, %v742_v52  ;;  %v789_v11 = vmul.f32 1.442695, %v751_v56 }
 0x1fb   : > { %v1425_v28 = vpop.eup %1424  ;;  %1444 = vrcp.f32 %v803_v24  ;;  %v804_v29 = vadd.f32 1.0, %v1423_v26 }
 0x1fc   : > { %v1427_v30 = vpop.eup %1426  ;;  %1446 = vrcp.f32 %v805_v27  ;;  %v806_v47 = vadd.f32 1.0, %v1425_v28 }
 0x1fd   : > { %v1429_v9 = vpop.eup %1428  ;;  %1448 = vrcp.f32 %v804_v29  ;;  %v797_v32 = vadd.f32 1.0, %v1427_v30 }
 0x1fe   : > { %v1431_v10 = vpop.eup %1430  ;;  %1450 = vrcp.f32 %v806_v47  ;;  %v799_v37 = vadd.f32 1.0, %v1429_v9 }
 0x1ff   : > { %v1433_v42 = vpop.eup %1432  ;;  %1452 = vrcp.f32 %v797_v32  ;;  %v798_v43 = vadd.f32 1.0, %v1431_v10 }
 0x200   : > { %v1435_v46 = vpop.eup %1434  ;;  %1454 = vrcp.f32 %v799_v37  ;;  %v800_v49 = vadd.f32 1.0, %v1433_v42 }
 0x201   : > { %v1437_v53 = vpop.eup %1436  ;;  %1456 = vrcp.f32 %v798_v43  ;;  %v807_v54 = vadd.f32 1.0, %v1435_v46 }
 0x202   : > { %v1439_v57 = vpop.eup %1438  ;;  %v1775_v58 = vmul.f32 %v1437_v53, %v1696_v63  ;;  %1458 = vrcp.f32 %v800_v49 }
 0x203   : > { %v1441_v61 = vpop.eup %1440  ;;  %v1779_v62 = vmul.f32 %v1439_v57, %v1698_v0  ;;  %1460 = vrcp.f32 %v807_v54  ;;  %v791_v0 = vmul.f32 1.442695, %v752_v60 }
 0x204   : > { %v1443_v2 = vpop.eup %1442  ;;  %v1782_v3 = vmul.f32 %v1441_v61, %v1702_v5  ;;  %1462 = vpow2.f32 %v785_v50  ;;  %857 = vst [vmem:[#allocation2] sm:$0xff] (!%p1289_p7), %v1775_v58  ;;  %877 = vst [vmem:[#allocation3] sm:$0xff] (!%p1289_p7), %v1775_v58 }
 0x205   : > { %v1445_v8 = vpop.eup %1444  ;;  %v1785_v63 = vmul.f32 %v1443_v2, %v1704_v6  ;;  %1464 = vpow2.f32 %v783_v55  ;;  %859 = vst [vmem:[#allocation2 + $0x10] sm:$0xff] (!%p1289_p7), %v1779_v62  ;;  %879 = vst [vmem:[#allocation3 + $0x10] sm:$0xff] (!%p1289_p7), %v1779_v62 }
 0x206   : > { %v1447_v12 = vpop.eup %1446  ;;  %v1788_v15 = vmul.f32 %v1445_v8, %v1712_v13  ;;  %1466 = vpow2.f32 %v787_v59  ;;  %858 = vst [vmem:[#allocation2 + $0x8] sm:$0xff] (!%p1289_p7), %v1782_v3  ;;  %878 = vst [vmem:[#allocation3 + $0x8] sm:$0xff] (!%p1289_p7), %v1782_v3 }
 0x207   : > { %v1449_v16 = vpop.eup %1448  ;;  %v1791_v17 = vmul.f32 %v1447_v12, %v1714_v14  ;;  %1468 = vpow2.f32 %v769_v1  ;;  %860 = vst [vmem:[#allocation2 + $0x18] sm:$0xff] (!%p1289_p7), %v1785_v63  ;;  %880 = vst [vmem:[#allocation3 + $0x18] sm:$0xff] (!%p1289_p7), %v1785_v63 }
 0x208   : > { %v1451_v5 = vpop.eup %1450  ;;  %v1794_v18 = vmul.f32 %v1449_v16, %v1718_v19  ;;  %1470 = vpow2.f32 %v771_v7  ;;  %867 = vst [vmem:[#allocation2 + $0x50] sm:$0xff] (!%p1289_p7), %v1788_v15  ;;  %887 = vst [vmem:[#allocation3 + $0x50] sm:$0xff] (!%p1289_p7), %v1788_v15 }
 0x209   : > { %v1453_v6 = vpop.eup %1452  ;;  %v1797_v22 = vmul.f32 %v1451_v5, %v1720_v20  ;;  %1472 = vpow2.f32 %v789_v11  ;;  %869 = vst [vmem:[#allocation2 + $0x60] sm:$0xff] (!%p1289_p7), %v1791_v17  ;;  %889 = vst [vmem:[#allocation3 + $0x60] sm:$0xff] (!%p1289_p7), %v1791_v17 }
 0x20a   : > { %v1455_v23 = vpop.eup %1454  ;;  %v1800_v13 = vmul.f32 %v1453_v6, %v1726_v34  ;;  %1474 = vpow2.f32 %v791_v0  ;;  %868 = vst [vmem:[#allocation2 + $0x58] sm:$0xff] (!%p1289_p7), %v1794_v18  ;;  %888 = vst [vmem:[#allocation3 + $0x58] sm:$0xff] (!%p1289_p7), %v1794_v18 }
 0x20b   : > { %v1457_v24 = vpop.eup %1456  ;;  %v1803_v14 = vmul.f32 %v1455_v23, %v1729_v35  ;;  %870 = vst [vmem:[#allocation2 + $0x68] sm:$0xff] (!%p1289_p7), %v1797_v22  ;;  %890 = vst [vmem:[#allocation3 + $0x68] sm:$0xff] (!%p1289_p7), %v1797_v22 }
 0x20c   : > { %v1459_v26 = vpop.eup %1458  ;;  %v1806_v27 = vmul.f32 %v1457_v24, %v1732_v39  ;;  %861 = vst [vmem:[#allocation2 + $0x20] sm:$0xff] (!%p1289_p7), %v1800_v13  ;;  %881 = vst [vmem:[#allocation3 + $0x20] sm:$0xff] (!%p1289_p7), %v1800_v13 }
 0x20d   : > { %v1461_v19 = vpop.eup %1460  ;;  %v1809_v28 = vmul.f32 %v1459_v26, %v1735_v40  ;;  %863 = vst [vmem:[#allocation2 + $0x30] sm:$0xff] (!%p1289_p7), %v1803_v14  ;;  %883 = vst [vmem:[#allocation3 + $0x30] sm:$0xff] (!%p1289_p7), %v1803_v14 }
 0x20e   : > { %v1463_v20 = vpop.eup %1462  ;;  %v1812_v29 = vmul.f32 %v1461_v19, %v1739_v45  ;;  %862 = vst [vmem:[#allocation2 + $0x28] sm:$0xff] (!%p1289_p7), %v1806_v27  ;;  %882 = vst [vmem:[#allocation3 + $0x28] sm:$0xff] (!%p1289_p7), %v1806_v27 }
 0x20f   : > { %v1465_v30 = vpop.eup %1464  ;;  %v809_v34 = vadd.f32 1.0, %v1463_v20  ;;  %864 = vst [vmem:[#allocation2 + $0x38] sm:$0xff] (!%p1289_p7), %v1809_v28  ;;  %884 = vst [vmem:[#allocation3 + $0x38] sm:$0xff] (!%p1289_p7), %v1809_v28 }
 0x210   : > { %v1467_v47 = vpop.eup %1466  ;;  %v808_v51 = vadd.f32 1.0, %v1465_v30  ;;  %871 = vst [vmem:[#allocation2 + $0x70] sm:$0xff] (!%p1289_p7), %v1812_v29  ;;  %891 = vst [vmem:[#allocation3 + $0x70] sm:$0xff] (!%p1289_p7), %v1812_v29 }
 0x211   : > { %v1469_v9 = vpop.eup %1468  ;;  %1476 = vrcp.f32 %v809_v34  ;;  %v810_v35 = vadd.f32 1.0, %v1467_v47 }
 0x212   : > { %v1471_v32 = vpop.eup %1470  ;;  %1478 = vrcp.f32 %v808_v51  ;;  %v801_v33 = vadd.f32 1.0, %v1469_v9 }
 0x213   : > { %v1473_v39 = vpop.eup %1472  ;;  %1480 = vrcp.f32 %v810_v35  ;;  %v802_v10 = vadd.f32 1.0, %v1471_v32 }
 0x214   : > { %v1475_v37 = vpop.eup %1474  ;;  %1482 = vrcp.f32 %v801_v33  ;;  %v811_v40 = vadd.f32 1.0, %v1473_v39 }
 0x215   : > { %1484 = vrcp.f32 %v802_v10  ;;  %v812_v38 = vadd.f32 1.0, %v1475_v37 }
 0x216   : > { %1486 = vrcp.f32 %v811_v40 }
 0x217   : > { %1488 = vrcp.f32 %v812_v38 }
 0x21b   : > { %v1477_v45 = vpop.eup %1476 }
 0x21c   : > { %v1479_v42 = vpop.eup %1478  ;;  %v1815_v43 = vmul.f32 %v1477_v45, %v1750_v21  ;;  %856 = sbr.rel (%p1289_p7) target bundleno = 549 (0x225), region = 44 }
 0x21d   : > { %v1481_v44 = vpop.eup %1480  ;;  %v1818_v46 = vmul.f32 %v1479_v42, %v1755_v25 }
 0x21e   : > { %v1483_v49 = vpop.eup %1482  ;;  %v1821_v50 = vmul.f32 %v1481_v44, %v1758_v48  ;;  %873 = vst [vmem:[#allocation2 + $0x80] sm:$0xff] (!%p1289_p7), %v1815_v43  ;;  %893 = vst [vmem:[#allocation3 + $0x80] sm:$0xff] (!%p1289_p7), %v1815_v43 }
 0x21f   : > { %v1485_v52 = vpop.eup %1484  ;;  %v1824_v53 = vmul.f32 %v1483_v49, %v1760_v4  ;;  %872 = vst [vmem:[#allocation2 + $0x78] sm:$0xff] (!%p1289_p7), %v1818_v46  ;;  %892 = vst [vmem:[#allocation3 + $0x78] sm:$0xff] (!%p1289_p7), %v1818_v46 }
 0x220   : > { %v1487_v54 = vpop.eup %1486  ;;  %v1827_v55 = vmul.f32 %v1485_v52, %v1763_v31  ;;  %874 = vst [vmem:[#allocation2 + $0x88] sm:$0xff] (!%p1289_p7), %v1821_v50  ;;  %894 = vst [vmem:[#allocation3 + $0x88] sm:$0xff] (!%p1289_p7), %v1821_v50 }
 0x221   : > { %v1489_v56 = vpop.eup %1488  ;;  %v1830_v21 = vmul.f32 %v1487_v54, %v1766_v36  ;;  %865 = vst [vmem:[#allocation2 + $0x40] sm:$0xff] (!%p1289_p7), %v1824_v53  ;;  %885 = vst [vmem:[#allocation3 + $0x40] sm:$0xff] (!%p1289_p7), %v1824_v53 }
 0x222   : > { %v1833_v57 = vmul.f32 %v1489_v56, %v1769_v41  ;;  %866 = vst [vmem:[#allocation2 + $0x48] sm:$0xff] (!%p1289_p7), %v1827_v55  ;;  %886 = vst [vmem:[#allocation3 + $0x48] sm:$0xff] (!%p1289_p7), %v1827_v55 }
 0x223   : > { %875 = vst [vmem:[#allocation2 + $0x90] sm:$0xff] %v1830_v21  ;;  %895 = vst [vmem:[#allocation3 + $0x90] sm:$0xff] %v1830_v21 }
 0x224   : > { %876 = vst [vmem:[#allocation2 + $0x98] sm:$0xff] %v1833_v57  ;;  %896 = vst [vmem:[#allocation3 + $0x98] sm:$0xff] %v1833_v57 }
 0x225 PF: > { %p1290_p8 = scmp.le.s32.totalorder %s1512_s18, 0 }
 0x226   : > { %v901_v25 = vld [vmem:[#allocation2] sm:$0xff] (!%p1290_p8)  ;;  %v902_v48 = vld [vmem:[#allocation2 + $0x8] sm:$0xff] (!%p1290_p8)  ;;  %v903_v4 = vld [vmem:[#allocation2 + $0x10] sm:$0xff] (!%p1290_p8) }
 0x227   : > { %900 = sbr.rel (%p1290_p8) target bundleno = 573 (0x23d), region = 48  ;;  %v921_v31 = vadd.f32 (!%p1290_p8), %v901_v25, %v1775_v58  ;;  %v922_v36 = vadd.f32 (!%p1290_p8), %v902_v48, %v1782_v3  ;;  %v923_v41 = vadd.f32 (!%p1290_p8), %v903_v4, %v1779_v62  ;;  %v904_v59 = vld [vmem:[#allocation2 + $0x18] sm:$0xff] (!%p1290_p8)  ;;  %v905_v60 = vld [vmem:[#allocation2 + $0x20] sm:$0xff] (!%p1290_p8)  ;;  %v906_v61 = vld [vmem:[#allocation2 + $0x28] sm:$0xff] (!%p1290_p8) }
 0x228   : > { %v924_v1 = vadd.f32 (!%p1290_p8), %v904_v59, %v1785_v63  ;;  %v925_v2 = vadd.f32 (!%p1290_p8), %v905_v60, %v1800_v13  ;;  %v926_v7 = vadd.f32 (!%p1290_p8), %v906_v61, %v1806_v27  ;;  %v907_v8 = vld [vmem:[#allocation2 + $0x30] sm:$0xff] (!%p1290_p8)  ;;  %v908_v11 = vld [vmem:[#allocation2 + $0x38] sm:$0xff] (!%p1290_p8)  ;;  %v913_v30 = vld [vmem:[#allocation2 + $0x60] sm:$0xff] (!%p1290_p8) }
 0x229   : > { %941 = vst [vmem:[#allocation2] sm:$0xff] (!%p1290_p8), %v921_v31  ;;  %942 = vst [vmem:[#allocation2 + $0x8] sm:$0xff] (!%p1290_p8), %v922_v36  ;;  %v927_v0 = vadd.f32 (!%p1290_p8), %v907_v8, %v1803_v14  ;;  %v928_v16 = vadd.f32 (!%p1290_p8), %v908_v11, %v1809_v28  ;;  %v911_v23 = vld [vmem:[#allocation2 + $0x50] sm:$0xff] (!%p1290_p8)  ;;  %v912_v24 = vld [vmem:[#allocation2 + $0x58] sm:$0xff] (!%p1290_p8)  ;;  %v933_v51 = vadd.f32 (!%p1290_p8), %v913_v30, %v1791_v17 }
 0x22a   : > { %v909_v12 = vld [vmem:[#allocation2 + $0x40] sm:$0xff] (!%p1290_p8)  ;;  %943 = vst [vmem:[#allocation2 + $0x10] sm:$0xff] (!%p1290_p8), %v923_v41  ;;  %944 = vst [vmem:[#allocation2 + $0x18] sm:$0xff] (!%p1290_p8), %v924_v1  ;;  %v931_v19 = vadd.f32 (!%p1290_p8), %v911_v23, %v1788_v15  ;;  %v932_v20 = vadd.f32 (!%p1290_p8), %v912_v24, %v1794_v18  ;;  %v914_v34 = vld [vmem:[#allocation2 + $0x68] sm:$0xff] (!%p1290_p8) }
 0x22b   : > { %v929_v5 = vadd.f32 (!%p1290_p8), %v909_v12, %v1824_v53  ;;  %v910_v6 = vld [vmem:[#allocation2 + $0x48] sm:$0xff] (!%p1290_p8)  ;;  %945 = vst [vmem:[#allocation2 + $0x20] sm:$0xff] (!%p1290_p8), %v925_v2  ;;  %946 = vst [vmem:[#allocation2 + $0x28] sm:$0xff] (!%p1290_p8), %v926_v7  ;;  %v915_v47 = vld [vmem:[#allocation2 + $0x70] sm:$0xff] (!%p1290_p8)  ;;  %v934_v9 = vadd.f32 (!%p1290_p8), %v914_v34, %v1797_v22 }
 0x22c   : > { %v930_v26 = vadd.f32 (!%p1290_p8), %v910_v6, %v1827_v55  ;;  %947 = vst [vmem:[#allocation2 + $0x30] sm:$0xff] (!%p1290_p8), %v927_v0  ;;  %948 = vst [vmem:[#allocation2 + $0x38] sm:$0xff] (!%p1290_p8), %v928_v16  ;;  %v935_v35 = vadd.f32 (!%p1290_p8), %v915_v47, %v1812_v29  ;;  %v916_v32 = vld [vmem:[#allocation2 + $0x78] sm:$0xff] (!%p1290_p8)  ;;  %v917_v33 = vld [vmem:[#allocation2 + $0x80] sm:$0xff] (!%p1290_p8) }
 0x22d   : > { %949 = vst [vmem:[#allocation2 + $0x40] sm:$0xff] (!%p1290_p8), %v929_v5  ;;  %v918_v39 = vld [vmem:[#allocation2 + $0x88] sm:$0xff] (!%p1290_p8)  ;;  %951 = vst [vmem:[#allocation2 + $0x50] sm:$0xff] (!%p1290_p8), %v931_v19  ;;  %v936_v10 = vadd.f32 (!%p1290_p8), %v916_v32, %v1818_v46  ;;  %v937_v37 = vadd.f32 (!%p1290_p8), %v917_v33, %v1815_v43  ;;  %v919_v38 = vld [vmem:[#allocation2 + $0x90] sm:$0xff] (!%p1290_p8) }
 0x22e   : > { %950 = vst [vmem:[#allocation2 + $0x48] sm:$0xff] %v930_v26  ;;  %952 = vst [vmem:[#allocation2 + $0x58] sm:$0xff] %v932_v20  ;;  %v938_v40 = vadd.f32 %v918_v39, %v1821_v50  ;;  %v920_v45 = vld [vmem:[#allocation2 + $0x98] sm:$0xff]  ;;  %v961_v42 = vld [vmem:[#allocation3] sm:$0xff]  ;;  %v939_v44 = vadd.f32 %v919_v38, %v1830_v21 }
 0x22f   : > { %953 = vst [vmem:[#allocation2 + $0x60] sm:$0xff] %v933_v51  ;;  %954 = vst [vmem:[#allocation2 + $0x68] sm:$0xff] %v934_v9  ;;  %v940_v49 = vadd.f32 %v920_v45, %v1833_v57  ;;  %v981_v52 = vmax.f32 %v961_v42, %v1775_v58  ;;  %v962_v54 = vld [vmem:[#allocation3 + $0x8] sm:$0xff]  ;;  %v963_v56 = vld [vmem:[#allocation3 + $0x10] sm:$0xff] }
 0x230   : > { %955 = vst [vmem:[#allocation2 + $0x70] sm:$0xff] %v935_v35  ;;  %v964_v25 = vld [vmem:[#allocation3 + $0x18] sm:$0xff]  ;;  %956 = vst [vmem:[#allocation2 + $0x78] sm:$0xff] %v936_v10  ;;  %v982_v48 = vmax.f32 %v962_v54, %v1782_v3  ;;  %v983_v4 = vmax.f32 %v963_v56, %v1779_v62  ;;  %v965_v36 = vld [vmem:[#allocation3 + $0x20] sm:$0xff] }
 0x231   : > { %957 = vst [vmem:[#allocation2 + $0x80] sm:$0xff] %v937_v37  ;;  %958 = vst [vmem:[#allocation2 + $0x88] sm:$0xff] %v938_v40  ;;  %v984_v31 = vmax.f32 %v964_v25, %v1785_v63  ;;  %v966_v41 = vld [vmem:[#allocation3 + $0x28] sm:$0xff]  ;;  %v967_v59 = vld [vmem:[#allocation3 + $0x30] sm:$0xff]  ;;  %v985_v58 = vmax.f32 %v965_v36, %v1800_v13 }
 0x232   : > { %959 = vst [vmem:[#allocation2 + $0x90] sm:$0xff] %v939_v44  ;;  %960 = vst [vmem:[#allocation2 + $0x98] sm:$0xff] %v940_v49  ;;  %v986_v60 = vmax.f32 %v966_v41, %v1806_v27  ;;  %v987_v61 = vmax.f32 %v967_v59, %v1803_v14  ;;  %v968_v1 = vld [vmem:[#allocation3 + $0x38] sm:$0xff]  ;;  %v969_v2 = vld [vmem:[#allocation3 + $0x40] sm:$0xff] }
 0x233   : > { %1001 = vst [vmem:[#allocation3] sm:$0xff] %v981_v52  ;;  %v970_v7 = vld [vmem:[#allocation3 + $0x48] sm:$0xff]  ;;  %1002 = vst [vmem:[#allocation3 + $0x8] sm:$0xff] %v982_v48  ;;  %v988_v62 = vmax.f32 %v968_v1, %v1809_v28  ;;  %v989_v3 = vmax.f32 %v969_v2, %v1824_v53  ;;  %v971_v8 = vld [vmem:[#allocation3 + $0x50] sm:$0xff] }
 0x234   : > { %1003 = vst [vmem:[#allocation3 + $0x10] sm:$0xff] %v983_v4  ;;  %1004 = vst [vmem:[#allocation3 + $0x18] sm:$0xff] %v984_v31  ;;  %v990_v63 = vmax.f32 %v970_v7, %v1827_v55  ;;  %v972_v11 = vld [vmem:[#allocation3 + $0x58] sm:$0xff]  ;;  %v973_v12 = vld [vmem:[#allocation3 + $0x60] sm:$0xff]  ;;  %v991_v13 = vmax.f32 %v971_v8, %v1788_v15 }
 0x235   : > { %1005 = vst [vmem:[#allocation3 + $0x20] sm:$0xff] %v985_v58  ;;  %1006 = vst [vmem:[#allocation3 + $0x28] sm:$0xff] %v986_v60  ;;  %v992_v14 = vmax.f32 %v972_v11, %v1794_v18  ;;  %v993_v27 = vmax.f32 %v973_v12, %v1791_v17  ;;  %v974_v0 = vld [vmem:[#allocation3 + $0x68] sm:$0xff]  ;;  %v975_v16 = vld [vmem:[#allocation3 + $0x70] sm:$0xff] }
 0x236   : > { %1007 = vst [vmem:[#allocation3 + $0x30] sm:$0xff] %v987_v61  ;;  %v976_v5 = vld [vmem:[#allocation3 + $0x78] sm:$0xff]  ;;  %1008 = vst [vmem:[#allocation3 + $0x38] sm:$0xff] %v988_v62  ;;  %v994_v28 = vmax.f32 %v974_v0, %v1797_v22  ;;  %v995_v53 = vmax.f32 %v975_v16, %v1812_v29  ;;  %v977_v6 = vld [vmem:[#allocation3 + $0x80] sm:$0xff] }
 0x237   : > { %1009 = vst [vmem:[#allocation3 + $0x40] sm:$0xff] %v989_v3  ;;  %1010 = vst [vmem:[#allocation3 + $0x48] sm:$0xff] %v990_v63  ;;  %v996_v55 = vmax.f32 %v976_v5, %v1818_v46  ;;  %v978_v23 = vld [vmem:[#allocation3 + $0x88] sm:$0xff]  ;;  %v979_v24 = vld [vmem:[#allocation3 + $0x90] sm:$0xff]  ;;  %v997_v15 = vmax.f32 %v977_v6, %v1815_v43 }
 0x238   : > { %1011 = vst [vmem:[#allocation3 + $0x50] sm:$0xff] %v991_v13  ;;  %1012 = vst [vmem:[#allocation3 + $0x58] sm:$0xff] %v992_v14  ;;  %v998_v17 = vmax.f32 %v978_v23, %v1821_v50  ;;  %v999_v18 = vmax.f32 %v979_v24, %v1830_v21  ;;  %v980_v26 = vld [vmem:[#allocation3 + $0x98] sm:$0xff] }
 0x239   : > { %1013 = vst [vmem:[#allocation3 + $0x60] sm:$0xff] %v993_v27  ;;  %1014 = vst [vmem:[#allocation3 + $0x68] sm:$0xff] %v994_v28  ;;  %v1000_v22 = vmax.f32 %v980_v26, %v1833_v57 }
 0x23a   : > { %1015 = vst [vmem:[#allocation3 + $0x70] sm:$0xff] %v995_v53  ;;  %1016 = vst [vmem:[#allocation3 + $0x78] sm:$0xff] %v996_v55 }
 0x23b   : > { %1017 = vst [vmem:[#allocation3 + $0x80] sm:$0xff] %v997_v15  ;;  %1018 = vst [vmem:[#allocation3 + $0x88] sm:$0xff] %v998_v17 }
 0x23c   : > { %1019 = vst [vmem:[#allocation3 + $0x90] sm:$0xff] %v999_v18  ;;  %1020 = vst [vmem:[#allocation3 + $0x98] sm:$0xff] %v1000_v22 }
 0x23d PF: > { %p1291_p9 = scmp.ne.s32.totalorder %s1512_s18, 15 }
 0x23e   : > { %v1065_v46 = vld [vmem:[#allocation3] sm:$0xff] (!%p1291_p9)  ;;  %v1066_v21 = vld [vmem:[#allocation3 + $0x8] sm:$0xff] (!%p1291_p9)  ;;  %v1067_v51 = vld [vmem:[#allocation3 + $0x10] sm:$0xff] (!%p1291_p9) }
 0x23f   : > { %1024 = sbr.rel (%p1291_p9) target bundleno = 594 (0x252), region = 52  ;;  %v1025_v29 = vld [vmem:[#allocation2] sm:$0xff] (!%p1291_p9)  ;;  %v1026_v43 = vld [vmem:[#allocation2 + $0x8] sm:$0xff] (!%p1291_p9)  ;;  %v1068_v57 = vld [vmem:[#allocation3 + $0x18] sm:$0xff] (!%p1291_p9) }
 0x240   : > { %v1045_v50 = vmul.f32 (!%p1291_p9), 0.0625, %v1025_v29  ;;  %v1046_v19 = vmul.f32 (!%p1291_p9), 0.0625, %v1026_v43  ;;  %v1027_v20 = vld [vmem:[#allocation2 + $0x10] sm:$0xff] (!%p1291_p9)  ;;  %v1028_v30 = vld [vmem:[#allocation2 + $0x18] sm:$0xff] (!%p1291_p9)  ;;  %v1069_v10 = vld [vmem:[#allocation3 + $0x20] sm:$0xff] (!%p1291_p9) }
 0x241   : > { %v1047_v34 = vmul.f32 (!%p1291_p9), 0.0625, %v1027_v20  ;;  %v1048_v47 = vmul.f32 (!%p1291_p9), 0.0625, %v1028_v30  ;;  %v1029_v9 = vld [vmem:[#allocation2 + $0x20] sm:$0xff] (!%p1291_p9)  ;;  %v1030_v33 = vld [vmem:[#allocation2 + $0x28] sm:$0xff] (!%p1291_p9)  ;;  %v1071_v49 = vld [vmem:[#allocation3 + $0x30] sm:$0xff] (!%p1291_p9) }
 0x242   : > { %v1085_v35 = vadd.f32 (!%p1291_p9), %v1065_v46, %v1045_v50  ;;  %v1086_v32 = vadd.f32 (!%p1291_p9), %v1066_v21, %v1046_v19  ;;  %v1049_v39 = vmul.f32 (!%p1291_p9), 0.0625, %v1029_v9  ;;  %v1070_v37 = vld [vmem:[#allocation3 + $0x28] sm:$0xff] (!%p1291_p9)  ;;  %v1050_v45 = vmul.f32 (!%p1291_p9), 0.0625, %v1030_v33  ;;  %v1031_v42 = vld [vmem:[#allocation2 + $0x30] sm:$0xff] (!%p1291_p9)  ;;  %v1032_v44 = vld [vmem:[#allocation2 + $0x38] sm:$0xff] (!%p1291_p9) }
 0x243   : > { %v1087_v40 = vadd.f32 (!%p1291_p9), %v1067_v51, %v1047_v34  ;;  %v1088_v38 = vadd.f32 (!%p1291_p9), %v1068_v57, %v1048_v47  ;;  %v1051_v56 = vmul.f32 (!%p1291_p9), 0.0625, %v1031_v42  ;;  %v1052_v25 = vmul.f32 (!%p1291_p9), 0.0625, %v1032_v44  ;;  %v1072_v48 = vld [vmem:[#allocation3 + $0x38] sm:$0xff] (!%p1291_p9)  ;;  %v1033_v4 = vld [vmem:[#allocation2 + $0x40] sm:$0xff] (!%p1291_p9)  ;;  %v1074_v61 = vld [vmem:[#allocation3 + $0x48] sm:$0xff] (!%p1291_p9) }
 0x244   : > { %v1304_v52 = vpack.c.bf16 (!%p1291_p9), %v1086_v32, %v1085_v35  ;;  %v1089_v54 = vadd.f32 (!%p1291_p9), %v1069_v10, %v1049_v39  ;;  %v1034_v31 = vld [vmem:[#allocation2 + $0x48] sm:$0xff] (!%p1291_p9)  ;;  %v1090_v41 = vadd.f32 (!%p1291_p9), %v1070_v37, %v1050_v45  ;;  %v1053_v59 = vmul.f32 (!%p1291_p9), 0.0625, %v1033_v4  ;;  %v1073_v60 = vld [vmem:[#allocation3 + $0x40] sm:$0xff] (!%p1291_p9)  ;;  %v1035_v1 = vld [vmem:[#allocation2 + $0x50] sm:$0xff] (!%p1291_p9) }
 0x245   : > { %v1305_v36 = vpack.c.bf16 (!%p1291_p9), %v1088_v38, %v1087_v40  ;;  %v1054_v58 = vmul.f32 (!%p1291_p9), 0.0625, %v1034_v31  ;;  %v1091_v2 = vadd.f32 (!%p1291_p9), %v1071_v49, %v1051_v56  ;;  %v1092_v7 = vadd.f32 (!%p1291_p9), %v1072_v48, %v1052_v25  ;;  %v1036_v62 = vld [vmem:[#allocation2 + $0x58] sm:$0xff] (!%p1291_p9)  ;;  %v1075_v63 = vld [vmem:[#allocation3 + $0x50] sm:$0xff] (!%p1291_p9)  ;;  %v1037_v27 = vld [vmem:[#allocation2 + $0x60] sm:$0xff] (!%p1291_p9) }
 0x246   : > { %1165 = vst [vmem:[%s1606_s11] sm:$0xff] %v1304_v52  ;;  %v1055_v3 = vmul.f32 0.0625, %v1035_v1  ;;  %v1076_v8 = vld [vmem:[#allocation3 + $0x58] sm:$0xff]  ;;  %v1306_v11 = vpack.c.bf16 %v1090_v41, %v1089_v54  ;;  %v1093_v12 = vadd.f32 %v1073_v60, %v1053_v59  ;;  %v1056_v14 = vmul.f32 0.0625, %v1036_v62  ;;  %v1038_v0 = vld [vmem:[#allocation2 + $0x68] sm:$0xff]  ;;  %v1077_v16 = vld [vmem:[#allocation3 + $0x60] sm:$0xff] }
 0x247   : > { %1166 = vst [vmem:[%s1606_s11 + $0x8] sm:$0xff] %v1305_v36  ;;  %v1094_v13 = vadd.f32 %v1074_v61, %v1054_v58  ;;  %v1307_v5 = vpack.c.bf16 %v1092_v7, %v1091_v2  ;;  %v1057_v53 = vmul.f32 0.0625, %v1037_v27  ;;  %v1058_v55 = vmul.f32 0.0625, %v1038_v0  ;;  %v1078_v6 = vld [vmem:[#allocation3 + $0x68] sm:$0xff]  ;;  %v1039_v23 = vld [vmem:[#allocation2 + $0x70] sm:$0xff]  ;;  %v1040_v24 = vld [vmem:[#allocation2 + $0x78] sm:$0xff] }
 0x248   : > { %v1095_v28 = vadd.f32 %v1075_v63, %v1055_v3  ;;  %1167 = vst [vmem:[%s1606_s11 + $0x10] sm:$0xff] %v1306_v11  ;;  %v1096_v17 = vadd.f32 %v1076_v8, %v1056_v14  ;;  %v1059_v18 = vmul.f32 0.0625, %v1039_v23  ;;  %v1060_v26 = vmul.f32 0.0625, %v1040_v24  ;;  %v1079_v22 = vld [vmem:[#allocation3 + $0x70] sm:$0xff]  ;;  %v1080_v29 = vld [vmem:[#allocation3 + $0x78] sm:$0xff]  ;;  %v1041_v43 = vld [vmem:[#allocation2 + $0x80] sm:$0xff] }
 0x249   : > { %v1308_v15 = vpack.c.bf16 %v1094_v13, %v1093_v12  ;;  %1168 = vst [vmem:[%s1606_s11 + $0x18] sm:$0xff] %v1307_v5  ;;  %v1097_v46 = vadd.f32 %v1077_v16, %v1057_v53  ;;  %v1098_v50 = vadd.f32 %v1078_v6, %v1058_v55  ;;  %v1042_v19 = vld [vmem:[#allocation2 + $0x88] sm:$0xff]  ;;  %v1061_v21 = vmul.f32 0.0625, %v1041_v43  ;;  %v1081_v20 = vld [vmem:[#allocation3 + $0x80] sm:$0xff]  ;;  %v1043_v9 = vld [vmem:[#allocation2 + $0x90] sm:$0xff] }
 0x24a   : > { %v1082_v30 = vld [vmem:[#allocation3 + $0x88] sm:$0xff]  ;;  %v1309_v34 = vpack.c.bf16 %v1096_v17, %v1095_v28  ;;  %v1099_v47 = vadd.f32 %v1079_v22, %v1059_v18  ;;  %v1100_v51 = vadd.f32 %v1080_v29, %v1060_v26  ;;  %v1062_v57 = vmul.f32 0.0625, %v1042_v19  ;;  %v1044_v35 = vld [vmem:[#allocation2 + $0x98] sm:$0xff]  ;;  %v1083_v32 = vld [vmem:[#allocation3 + $0x90] sm:$0xff] }
 0x24b   : > { %1169 = vst [vmem:[%s1606_s11 + $0x20] sm:$0xff] %v1308_v15  ;;  %v1310_v33 = vpack.c.bf16 %v1098_v50, %v1097_v46  ;;  %v1101_v39 = vadd.f32 %v1081_v20, %v1061_v21  ;;  %v1063_v10 = vmul.f32 0.0625, %v1043_v9  ;;  %v1064_v37 = vmul.f32 0.0625, %v1044_v35  ;;  %v1084_v40 = vld [vmem:[#allocation3 + $0x98] sm:$0xff] }
 0x24c   : > { %1170 = vst [vmem:[%s1606_s11 + $0x28] sm:$0xff] %v1309_v34  ;;  %v1311_v38 = vpack.c.bf16 %v1100_v51, %v1099_v47  ;;  %v1102_v45 = vadd.f32 %v1082_v30, %v1062_v57 }
 0x24d   : > { %1171 = vst [vmem:[%s1606_s11 + $0x30] sm:$0xff] %v1310_v33  ;;  %v1103_v42 = vadd.f32 %v1083_v32, %v1063_v10  ;;  %v1104_v44 = vadd.f32 %v1084_v40, %v1064_v37 }
 0x24e   : > { %1172 = vst [vmem:[%s1606_s11 + $0x38] sm:$0xff] %v1311_v38  ;;  %v1312_v49 = vpack.c.bf16 %v1102_v45, %v1101_v39 }
 0x24f   : > { %v1313_v52 = vpack.c.bf16 %v1104_v44, %v1103_v42 }
 0x250   : > { %1173 = vst [vmem:[%s1606_s11 + $0x40] sm:$0xff] %v1312_v49 }
 0x251   : > { %1174 = vst [vmem:[%s1606_s11 + $0x48] sm:$0xff] %v1313_v52 }
 0x252 PF: > { %s15_s22 = sadd.s32 1, %s1528_s22   ;;  %s1949_s18 = smov %s1520_s20 }
 0x253   : > { %p12_p10 = scmp.ge.s32.totalorder %s15_s22, 34   ;;  %s1950_s19 = smov %s1524_s21 }
 0x254   : > { %s1951_s20 = smov %s1954_s23  ;;  %s1952_s21 = smov %s1958_s24 }
 0x255   :  { %14 = sbr.rel (!%p12_p10) target bundleno = 3 (0x3), region = 82 }

// kernel: efficientnet_simple_forward.5
= control target key start
LH: loop header
LB: loop body
LE: loop exit
PB: predicated region body
PF: predicated region fallthrough
CT: control target
= control target key end

     0   :  { %s12984_s1 = inlined_call_operand.vmem [shape: bf16[1280,1280], index: 1, kind: input, shape index: {}]   ;;  %s12985_s0 = inlined_call_operand.vmem [shape: bf16[32,1280], index: 0, kind: input, shape index: {}]   ;;  %s12986_s2 = inlined_call_operand.vmem [shape: f32[1,1280], index: 2, kind: input, shape index: {}]   ;;  %s12987_s3 = inlined_call_operand.vmem [shape: bf16[1280,128], index: 3, kind: input, shape index: {}]   ;;  %s12988_s4 = inlined_call_operand.vmem [shape: f32[1,128], index: 4, kind: input, shape index: {}]   ;;  %s12989_s5 = inlined_call_operand.vmem [shape: f32[32,128], index: 5, kind: output, shape index: {}]  }
   0x1   :  { %v8521_v0 = vld [vmem:[%s12984_s1 + $0x4] ss:$40 sps:$4 sm:$0xff]   ;;  %v8525_v2 = vld [vmem:[%s12984_s1] ss:$40 sps:$4 sm:$0xff]   ;;  %v8527_v4 = vld [vmem:[%s12984_s1 + $0x54] ss:$40 sps:$4 sm:$0xff]  }
   0x2   :  { %v8523_v1 = vld [vmem:[%s12984_s1 + $0x504] ss:$40 sps:$4 sm:$0xff]   ;;  %4995 = vmatprep.subr.bf16.mxu1 %v8521_v0  ;;  %v8526_v3 = vld [vmem:[%s12984_s1 + $0x500] ss:$40 sps:$4 sm:$0xff]   ;;  %v8529_v5 = vld [vmem:[%s12984_s1 + $0x554] ss:$40 sps:$4 sm:$0xff]  }
   0x3   :  { %5048 = vmatprep.subr.bf16.mxu0 %v8523_v1  ;;  %4996 = vmatpush1.bf16.msra.mxu1 %v8525_v2  ;;  %v8531_v6 = vld [vmem:[%s12984_s1 + $0x50] ss:$40 sps:$4 sm:$0xff]   ;;  %v8533_v8 = vld [vmem:[%s12984_s1 + $0xa4] ss:$40 sps:$4 sm:$0xff]   ;;  %v8537_v10 = vld [vmem:[%s12984_s1 + $0xa0] ss:$40 sps:$4 sm:$0xff]  }
   0x4   :  { %5049 = vmatpush1.bf16.msra.mxu0 %v8526_v3  ;;  %4997 = vmatprep.subr.bf16.mxu1 %v8527_v4  ;;  %v8532_v7 = vld [vmem:[%s12984_s1 + $0x550] ss:$40 sps:$4 sm:$0xff]   ;;  %v8535_v9 = vld [vmem:[%s12984_s1 + $0x5a4] ss:$40 sps:$4 sm:$0xff]   ;;  %v8538_v11 = vld [vmem:[%s12984_s1 + $0x5a0] ss:$40 sps:$4 sm:$0xff]  }
   0x5   :  { %5050 = vmatprep.subr.bf16.mxu0 %v8529_v5  ;;  %v8539_v12 = vld [vmem:[%s12984_s1 + $0xf4] ss:$40 sps:$4 sm:$0xff]   ;;  %v8543_v14 = vld [vmem:[%s12984_s1 + $0xf0] ss:$40 sps:$4 sm:$0xff]   ;;  %v8545_v16 = vld [vmem:[%s12984_s1 + $0x144] ss:$40 sps:$4 sm:$0xff]  }
   0x6   :  { %v8541_v13 = vld [vmem:[%s12984_s1 + $0x5f4] ss:$40 sps:$4 sm:$0xff]   ;;  %v8544_v15 = vld [vmem:[%s12984_s1 + $0x5f0] ss:$40 sps:$4 sm:$0xff]   ;;  %v8547_v17 = vld [vmem:[%s12984_s1 + $0x644] ss:$40 sps:$4 sm:$0xff]  }
   0x7   :  { %4998 = vmatpush1.bf16.msra.mxu1 %v8531_v6  ;;  %v8549_v18 = vld [vmem:[%s12984_s1 + $0x140] ss:$40 sps:$4 sm:$0xff]   ;;  %v8551_v20 = vld [vmem:[%s12984_s1 + $0x194] ss:$40 sps:$4 sm:$0xff]   ;;  %v8555_v22 = vld [vmem:[%s12984_s1 + $0x190] ss:$40 sps:$4 sm:$0xff]  }
   0x8   :  { %5051 = vmatpush1.bf16.msra.mxu0 %v8532_v7  ;;  %4999 = vmatprep.subr.bf16.mxu1 %v8533_v8  ;;  %v8550_v19 = vld [vmem:[%s12984_s1 + $0x640] ss:$40 sps:$4 sm:$0xff]   ;;  %v8553_v21 = vld [vmem:[%s12984_s1 + $0x694] ss:$40 sps:$4 sm:$0xff]   ;;  %v8556_v23 = vld [vmem:[%s12984_s1 + $0x690] ss:$40 sps:$4 sm:$0xff]  }
   0x9   :  { %5052 = vmatprep.subr.bf16.mxu0 %v8535_v9  ;;  %v8557_v24 = vld [vmem:[%s12984_s1 + $0x1e4] ss:$40 sps:$4 sm:$0xff]   ;;  %v8561_v26 = vld [vmem:[%s12984_s1 + $0x1e0] ss:$40 sps:$4 sm:$0xff]   ;;  %v8563_v28 = vld [vmem:[%s12984_s1 + $0x234] ss:$40 sps:$4 sm:$0xff]  }
   0xa   :  { %v8559_v25 = vld [vmem:[%s12984_s1 + $0x6e4] ss:$40 sps:$4 sm:$0xff]   ;;  %v8562_v27 = vld [vmem:[%s12984_s1 + $0x6e0] ss:$40 sps:$4 sm:$0xff]   ;;  %v8565_v29 = vld [vmem:[%s12984_s1 + $0x734] ss:$40 sps:$4 sm:$0xff]  }
   0xb   :  { %5000 = vmatpush1.bf16.msra.mxu1 %v8537_v10  ;;  %v8567_v30 = vld [vmem:[%s12984_s1 + $0x230] ss:$40 sps:$4 sm:$0xff]   ;;  %v8569_v32 = vld [vmem:[%s12984_s1 + $0x284] ss:$40 sps:$4 sm:$0xff]   ;;  %v8573_v34 = vld [vmem:[%s12984_s1 + $0x280] ss:$40 sps:$4 sm:$0xff]  }
   0xc   :  { %5053 = vmatpush1.bf16.msra.mxu0 %v8538_v11  ;;  %5001 = vmatprep.subr.bf16.mxu1 %v8539_v12  ;;  %v8568_v31 = vld [vmem:[%s12984_s1 + $0x730] ss:$40 sps:$4 sm:$0xff]   ;;  %v8571_v33 = vld [vmem:[%s12984_s1 + $0x784] ss:$40 sps:$4 sm:$0xff]   ;;  %v8574_v35 = vld [vmem:[%s12984_s1 + $0x780] ss:$40 sps:$4 sm:$0xff]  }
   0xd   :  { %5054 = vmatprep.subr.bf16.mxu0 %v8541_v13  ;;  %v8575_v36 = vld [vmem:[%s12984_s1 + $0x2d4] ss:$40 sps:$4 sm:$0xff]   ;;  %v8579_v38 = vld [vmem:[%s12984_s1 + $0x2d0] ss:$40 sps:$4 sm:$0xff]   ;;  %v8581_v40 = vld [vmem:[%s12984_s1 + $0x324] ss:$40 sps:$4 sm:$0xff]  }
   0xe   :  { %v8577_v37 = vld [vmem:[%s12984_s1 + $0x7d4] ss:$40 sps:$4 sm:$0xff]   ;;  %v8580_v39 = vld [vmem:[%s12984_s1 + $0x7d0] ss:$40 sps:$4 sm:$0xff]   ;;  %v8583_v41 = vld [vmem:[%s12984_s1 + $0x824] ss:$40 sps:$4 sm:$0xff]  }
   0xf   :  { %5002 = vmatpush1.bf16.msra.mxu1 %v8543_v14  ;;  %v8585_v42 = vld [vmem:[%s12984_s1 + $0x320] ss:$40 sps:$4 sm:$0xff]   ;;  %v8587_v44 = vld [vmem:[%s12984_s1 + $0x374] ss:$40 sps:$4 sm:$0xff]   ;;  %v8591_v46 = vld [vmem:[%s12984_s1 + $0x370] ss:$40 sps:$4 sm:$0xff]  }
  0x10   :  { %5055 = vmatpush1.bf16.msra.mxu0 %v8544_v15  ;;  %5003 = vmatprep.subr.bf16.mxu1 %v8545_v16  ;;  %v8586_v43 = vld [vmem:[%s12984_s1 + $0x820] ss:$40 sps:$4 sm:$0xff]   ;;  %v8589_v45 = vld [vmem:[%s12984_s1 + $0x874] ss:$40 sps:$4 sm:$0xff]   ;;  %v8592_v47 = vld [vmem:[%s12984_s1 + $0x870] ss:$40 sps:$4 sm:$0xff]  }
  0x11   :  { %5056 = vmatprep.subr.bf16.mxu0 %v8547_v17  ;;  %v10058_v48 = vld [vmem:[%s12985_s0 + $0x4] ss:$40 sps:$4 sm:$0xff]   ;;  %v8597_v52 = vld [vmem:[%s12984_s1 + $0x3c0] ss:$40 sps:$4 sm:$0xff]   ;;  %v8599_v54 = vld [vmem:[%s12984_s1 + $0x414] ss:$40 sps:$4 sm:$0xff]  }
  0x12   :  { %v10063_v49 = vld [vmem:[%s12985_s0 + $0xc] ss:$40 sps:$4 sm:$0xff]   ;;  %5027 = vmatprep.mubr.bf16.mxu1 %v10058_v48  ;;  %v8598_v53 = vld [vmem:[%s12984_s1 + $0x8c0] ss:$40 sps:$4 sm:$0xff]   ;;  %v8603_v56 = vld [vmem:[%s12984_s1 + $0x410] ss:$40 sps:$4 sm:$0xff]  }
  0x13   :  { %5004 = vmatpush1.bf16.msra.mxu1 %v8549_v18  ;;  %v8593_v50 = vld [vmem:[%s12984_s1 + $0x3c4] ss:$40 sps:$4 sm:$0xff]   ;;  %5080 = vmatprep.mubr.bf16.mxu0 %v10063_v49  ;;  %v8601_v55 = vld [vmem:[%s12984_s1 + $0x914] ss:$40 sps:$4 sm:$0xff]   ;;  %v8604_v57 = vld [vmem:[%s12984_s1 + $0x910] ss:$40 sps:$4 sm:$0xff]  }
  0x14   :  { %5057 = vmatpush1.bf16.msra.mxu0 %v8550_v19  ;;  %5005 = vmatprep.subr.bf16.mxu1 %v8551_v20  ;;  %v8595_v51 = vld [vmem:[%s12984_s1 + $0x8c4] ss:$40 sps:$4 sm:$0xff]   ;;  %v8609_v60 = vld [vmem:[%s12984_s1 + $0x460] ss:$40 sps:$4 sm:$0xff]   ;;  %v8611_v62 = vld [vmem:[%s12984_s1 + $0x4b4] ss:$40 sps:$4 sm:$0xff]  }
  0x15   :  { %5058 = vmatprep.subr.bf16.mxu0 %v8553_v21  ;;  %v8605_v58 = vld [vmem:[%s12984_s1 + $0x464] ss:$40 sps:$4 sm:$0xff]   ;;  %v8610_v61 = vld [vmem:[%s12984_s1 + $0x960] ss:$40 sps:$4 sm:$0xff]   ;;  %v8613_v63 = vld [vmem:[%s12984_s1 + $0x9b4] ss:$40 sps:$4 sm:$0xff]  }
  0x16   :  { %v8607_v59 = vld [vmem:[%s12984_s1 + $0x964] ss:$40 sps:$4 sm:$0xff]   ;;  %v8615_v0 = vld [vmem:[%s12984_s1 + $0x4b0] ss:$40 sps:$4 sm:$0xff]   ;;  %v8621_v4 = vld [vmem:[%s12984_s1 + $0xa00] ss:$40 sps:$4 sm:$0xff]  }
  0x17   :  { %5006 = vmatpush1.bf16.msra.mxu1 %v8555_v22  ;;  %v8616_v1 = vld [vmem:[%s12984_s1 + $0x9b0] ss:$40 sps:$4 sm:$0xff]   ;;  %v8623_v2 = vld [vmem:[%s12984_s1 + $0xa04] ss:$40 sps:$4 sm:$0xff]   ;;  %v10130_v6 = vld [vmem:[%s12985_s0] ss:$40 sps:$4 sm:$0xff]  }
  0x18   :  { %5059 = vmatpush1.bf16.msra.mxu0 %v8556_v23  ;;  %5007 = vmatprep.subr.bf16.mxu1 %v8557_v24  ;;  %v8626_v3 = vld [vmem:[%s12984_s1 + $0xc] ss:$40 sps:$4 sm:$0xff]   ;;  %v8624_v5 = vld [vmem:[%s12984_s1 + $0x8] ss:$40 sps:$4 sm:$0xff]   ;;  %v8634_v9 = vld [vmem:[%s12984_s1 + $0x5c] ss:$40 sps:$4 sm:$0xff]  }
  0x19   :  { %5060 = vmatprep.subr.bf16.mxu0 %v8559_v25  ;;  %v10135_v7 = vld [vmem:[%s12985_s0 + $0x8] ss:$40 sps:$4 sm:$0xff]   ;;  %v8631_v8 = vld [vmem:[%s12984_s1 + $0xa54] ss:$40 sps:$4 sm:$0xff]   ;;  %v8632_v11 = vld [vmem:[%s12984_s1 + $0x58] ss:$40 sps:$4 sm:$0xff]  }
  0x1a   :  { %v8629_v10 = vld [vmem:[%s12984_s1 + $0xa50] ss:$40 sps:$4 sm:$0xff]   ;;  %v8637_v12 = vld [vmem:[%s12984_s1 + $0xaa4] ss:$40 sps:$4 sm:$0xff]   ;;  %v8635_v14 = vld [vmem:[%s12984_s1 + $0xaa0] ss:$40 sps:$4 sm:$0xff]  }
  0x1b   :  { %5008 = vmatpush1.bf16.msra.mxu1 %v8561_v26  ;;  %v8640_v13 = vld [vmem:[%s12984_s1 + $0xac] ss:$40 sps:$4 sm:$0xff]   ;;  %v8638_v15 = vld [vmem:[%s12984_s1 + $0xa8] ss:$40 sps:$4 sm:$0xff]   ;;  %v8646_v17 = vld [vmem:[%s12984_s1 + $0xfc] ss:$40 sps:$4 sm:$0xff]  }
  0x1c   :  { %5061 = vmatpush1.bf16.msra.mxu0 %v8562_v27  ;;  %5009 = vmatprep.subr.bf16.mxu1 %v8563_v28  ;;  %v8643_v16 = vld [vmem:[%s12984_s1 + $0xaf4] ss:$40 sps:$4 sm:$0xff]   ;;  %v8641_v18 = vld [vmem:[%s12984_s1 + $0xaf0] ss:$40 sps:$4 sm:$0xff]   ;;  %v8649_v20 = vld [vmem:[%s12984_s1 + $0xb44] ss:$40 sps:$4 sm:$0xff]  }
  0x1d   :  { %5062 = vmatprep.subr.bf16.mxu0 %v8565_v29  ;;  %v8644_v19 = vld [vmem:[%s12984_s1 + $0xf8] ss:$40 sps:$4 sm:$0xff]   ;;  %v8652_v21 = vld [vmem:[%s12984_s1 + $0x14c] ss:$40 sps:$4 sm:$0xff]   ;;  %v8650_v23 = vld [vmem:[%s12984_s1 + $0x148] ss:$40 sps:$4 sm:$0xff]  }
  0x1e   :  { %v8647_v22 = vld [vmem:[%s12984_s1 + $0xb40] ss:$40 sps:$4 sm:$0xff]   ;;  %v8655_v24 = vld [vmem:[%s12984_s1 + $0xb94] ss:$40 sps:$4 sm:$0xff]   ;;  %v8653_v26 = vld [vmem:[%s12984_s1 + $0xb90] ss:$40 sps:$4 sm:$0xff]  }
  0x1f   :  { %5010 = vmatpush1.bf16.msra.mxu1 %v8567_v30  ;;  %v8658_v25 = vld [vmem:[%s12984_s1 + $0x19c] ss:$40 sps:$4 sm:$0xff]   ;;  %v8656_v27 = vld [vmem:[%s12984_s1 + $0x198] ss:$40 sps:$4 sm:$0xff]  }
  0x20   :  { %5063 = vmatpush1.bf16.msra.mxu0 %v8568_v31  ;;  %5011 = vmatprep.subr.bf16.mxu1 %v8569_v32  ;;  %v10202_v28 = vld [vmem:[%s12985_s0 + $0x54] ss:$40 sps:$4 sm:$0xff]   ;;  %v8661_v30 = vld [vmem:[%s12984_s1 + $0xbe4] ss:$40 sps:$4 sm:$0xff]   ;;  %v8659_v32 = vld [vmem:[%s12984_s1 + $0xbe0] ss:$40 sps:$4 sm:$0xff]  }
  0x21   :  { %5064 = vmatprep.subr.bf16.mxu0 %v8571_v33  ;;  %v10207_v29 = vld [vmem:[%s12985_s0 + $0x5c] ss:$40 sps:$4 sm:$0xff]   ;;  %v8664_v31 = vld [vmem:[%s12984_s1 + $0x1ec] ss:$40 sps:$4 sm:$0xff]   ;;  %v8662_v33 = vld [vmem:[%s12984_s1 + $0x1e8] ss:$40 sps:$4 sm:$0xff]  }
  0x23   :  { %5012 = vmatpush1.bf16.msra.mxu1 %v8573_v34  ;;  %v10226_v34 = vld [vmem:[%s12985_s0 + $0x50] ss:$40 sps:$4 sm:$0xff]  }
  0x24   :  { %5065 = vmatpush1.bf16.msra.mxu0 %v8574_v35  ;;  %5013 = vmatprep.subr.bf16.mxu1 %v8575_v36  ;;  %v10231_v35 = vld [vmem:[%s12985_s0 + $0x58] ss:$40 sps:$4 sm:$0xff]   ;;  %v8667_v36 = vld [vmem:[%s12984_s1 + $0xc34] ss:$40 sps:$4 sm:$0xff]  }
  0x25   :  { %5066 = vmatprep.subr.bf16.mxu0 %v8577_v37  ;;  %v8670_v37 = vld [vmem:[%s12984_s1 + $0x23c] ss:$40 sps:$4 sm:$0xff]  }
  0x27   :  { %5014 = vmatpush1.bf16.msra.mxu1 %v8579_v38  ;;  %v8665_v38 = vld [vmem:[%s12984_s1 + $0xc30] ss:$40 sps:$4 sm:$0xff]  }
  0x28   :  { %5067 = vmatpush1.bf16.msra.mxu0 %v8580_v39  ;;  %5015 = vmatprep.subr.bf16.mxu1 %v8581_v40  ;;  %v10247_v39 = vld [vmem:[%s12985_s0 + $0x14] ss:$40 sps:$4 sm:$0xff]   ;;  %v8668_v40 = vld [vmem:[%s12984_s1 + $0x238] ss:$40 sps:$4 sm:$0xff]  }
  0x29   :  { %5068 = vmatprep.subr.bf16.mxu0 %v8583_v41  ;;  %v8673_v41 = vld [vmem:[%s12984_s1 + $0xc84] ss:$40 sps:$4 sm:$0xff]  }
  0x2b   :  { %5016 = vmatpush1.bf16.msra.mxu1 %v8585_v42  ;;  %v8676_v42 = vld [vmem:[%s12984_s1 + $0x28c] ss:$40 sps:$4 sm:$0xff]  }
  0x2c   :  { %5069 = vmatpush1.bf16.msra.mxu0 %v8586_v43  ;;  %5017 = vmatprep.subr.bf16.mxu1 %v8587_v44  ;;  %v8671_v43 = vld [vmem:[%s12984_s1 + $0xc80] ss:$40 sps:$4 sm:$0xff]  }
  0x2d   :  { %5070 = vmatprep.subr.bf16.mxu0 %v8589_v45  ;;  %v8674_v44 = vld [vmem:[%s12984_s1 + $0x288] ss:$40 sps:$4 sm:$0xff]   ;;  %v8679_v45 = vld [vmem:[%s12984_s1 + $0xcd4] ss:$40 sps:$4 sm:$0xff]  }
  0x2f   :  { %5018 = vmatpush1.bf16.msra.mxu1 %v8591_v46  ;;  %v8682_v46 = vld [vmem:[%s12984_s1 + $0x2dc] ss:$40 sps:$4 sm:$0xff]  }
  0x30   :  { %5071 = vmatpush1.bf16.msra.mxu0 %v8592_v47  ;;  %5019 = vmatprep.subr.bf16.mxu1 %v8593_v50  ;;  %v8677_v47 = vld [vmem:[%s12984_s1 + $0xcd0] ss:$40 sps:$4 sm:$0xff]   ;;  %v8685_v50 = vld [vmem:[%s12984_s1 + $0xd24] ss:$40 sps:$4 sm:$0xff]  }
  0x31   :  { %5072 = vmatprep.subr.bf16.mxu0 %v8595_v51  ;;  %v8688_v51 = vld [vmem:[%s12984_s1 + $0x32c] ss:$40 sps:$4 sm:$0xff]  }
  0x33   :  { %5020 = vmatpush1.bf16.msra.mxu1 %v8597_v52  ;;  %v8683_v52 = vld [vmem:[%s12984_s1 + $0xd20] ss:$40 sps:$4 sm:$0xff]  }
  0x34   :  { %5073 = vmatpush1.bf16.msra.mxu0 %v8598_v53  ;;  %5021 = vmatprep.subr.bf16.mxu1 %v8599_v54  ;;  %v8686_v53 = vld [vmem:[%s12984_s1 + $0x328] ss:$40 sps:$4 sm:$0xff]   ;;  %v8691_v54 = vld [vmem:[%s12984_s1 + $0xd74] ss:$40 sps:$4 sm:$0xff]  }
  0x35   :  { %5074 = vmatprep.subr.bf16.mxu0 %v8601_v55  ;;  %v8694_v55 = vld [vmem:[%s12984_s1 + $0x37c] ss:$40 sps:$4 sm:$0xff]  }
  0x37   :  { %5022 = vmatpush1.bf16.msra.mxu1 %v8603_v56  ;;  %v8689_v56 = vld [vmem:[%s12984_s1 + $0xd70] ss:$40 sps:$4 sm:$0xff]  }
  0x38   :  { %5075 = vmatpush1.bf16.msra.mxu0 %v8604_v57  ;;  %5023 = vmatprep.subr.bf16.mxu1 %v8605_v58  ;;  %v8692_v57 = vld [vmem:[%s12984_s1 + $0x378] ss:$40 sps:$4 sm:$0xff]   ;;  %v8697_v58 = vld [vmem:[%s12984_s1 + $0xdc4] ss:$40 sps:$4 sm:$0xff]  }
  0x39   :  { %5076 = vmatprep.subr.bf16.mxu0 %v8607_v59  ;;  %v8700_v59 = vld [vmem:[%s12984_s1 + $0x3cc] ss:$40 sps:$4 sm:$0xff]  }
  0x3b   :  { %5024 = vmatpush1.bf16.msra.mxu1 %v8609_v60  ;;  %v8695_v60 = vld [vmem:[%s12984_s1 + $0xdc0] ss:$40 sps:$4 sm:$0xff]  }
  0x3c   :  { %5077 = vmatpush1.bf16.msra.mxu0 %v8610_v61  ;;  %5025 = vmatprep.subr.bf16.mxu1 %v8611_v62  ;;  %v8698_v61 = vld [vmem:[%s12984_s1 + $0x3c8] ss:$40 sps:$4 sm:$0xff]   ;;  %v8703_v62 = vld [vmem:[%s12984_s1 + $0xe14] ss:$40 sps:$4 sm:$0xff]  }
  0x3d   :  { %5078 = vmatprep.subr.bf16.mxu0 %v8613_v63  ;;  %v8706_v63 = vld [vmem:[%s12984_s1 + $0x41c] ss:$40 sps:$4 sm:$0xff]  }
  0x3f   :  { %5026 = vmatpush1.bf16.msra.mxu1 %v8615_v0  ;;  %v8701_v0 = vld [vmem:[%s12984_s1 + $0xe10] ss:$40 sps:$4 sm:$0xff]  }
  0x40   :  { %5079 = vmatpush1.bf16.msra.mxu0 %v8616_v1  ;;  %5260 = vmatprep.subr.bf16.mxu1 %v8626_v3  ;;  %v8704_v1 = vld [vmem:[%s12984_s1 + $0x418] ss:$40 sps:$4 sm:$0xff]   ;;  %v8716_v3 = vld [vmem:[%s12984_s1 + $0x46c] ss:$40 sps:$4 sm:$0xff]  }
  0x41   :  { %5101 = vmatprep.subr.bf16.mxu0 %v8623_v2  ;;  %v8713_v2 = vld [vmem:[%s12984_s1 + $0xe64] ss:$40 sps:$4 sm:$0xff]  }
  0x42   :  { %5028 = vmatmul.mubr.bf16.vlgmr.msra.gmra.mrb[0].mxu1 %v10130_v6 }
  0x43   :  { %5081 = vmatmul.mubr.bf16.vlgmr.msra.gmra.mrb[0].mxu0 %v10135_v7  ;;  %5261 = vmatpush1.bf16.msra.mxu1 %v8624_v5  ;;  %v8714_v5 = vld [vmem:[%s12984_s1 + $0x468] ss:$40 sps:$4 sm:$0xff]  }
  0x44   :  { %5102 = vmatpush1.bf16.msra.mxu0 %v8621_v4  ;;  %5262 = vmatprep.subr.bf16.mxu1 %v8634_v9  ;;  %v8711_v4 = vld [vmem:[%s12984_s1 + $0xe60] ss:$40 sps:$4 sm:$0xff]   ;;  %v8724_v9 = vld [vmem:[%s12984_s1 + $0x4bc] ss:$40 sps:$4 sm:$0xff]  }
  0x45   :  { %5103 = vmatprep.subr.bf16.mxu0 %v8631_v8  ;;  %5037 = vmatprep.mubr.bf16.mxu1 %v10202_v28  ;;  %v8721_v8 = vld [vmem:[%s12984_s1 + $0xeb4] ss:$40 sps:$4 sm:$0xff]  }
  0x46   :  { %5090 = vmatprep.mubr.bf16.mxu0 %v10207_v29 }
  0x47   :  { %5263 = vmatpush1.bf16.msra.mxu1 %v8632_v11  ;;  %v8722_v11 = vld [vmem:[%s12984_s1 + $0x4b8] ss:$40 sps:$4 sm:$0xff]  }
  0x48   :  { %5104 = vmatpush1.bf16.msra.mxu0 %v8629_v10  ;;  %5264 = vmatprep.subr.bf16.mxu1 %v8640_v13  ;;  %v8719_v10 = vld [vmem:[%s12984_s1 + $0xeb0] ss:$40 sps:$4 sm:$0xff]   ;;  %v8732_v13 = vld [vmem:[%s12984_s1 + $0x50c] ss:$40 sps:$4 sm:$0xff]  }
  0x49   :  { %5105 = vmatprep.subr.bf16.mxu0 %v8637_v12  ;;  %v8729_v12 = vld [vmem:[%s12984_s1 + $0xf04] ss:$40 sps:$4 sm:$0xff]  }
  0x4a   :  { %5038 = vmatmul.mubr.bf16.gmra.mrb[4].mxu1 %v10226_v34 }
  0x4b   :  { %5265 = vmatpush1.bf16.msra.mxu1 %v8638_v15  ;;  %5091 = vmatmul.mubr.bf16.gmra.mrb[4].mxu0 %v10231_v35  ;;  %v8730_v15 = vld [vmem:[%s12984_s1 + $0x508] ss:$40 sps:$4 sm:$0xff]  }
  0x4c   :  { %5106 = vmatpush1.bf16.msra.mxu0 %v8635_v14  ;;  %5266 = vmatprep.subr.bf16.mxu1 %v8646_v17  ;;  %v8727_v14 = vld [vmem:[%s12984_s1 + $0xf00] ss:$40 sps:$4 sm:$0xff]   ;;  %v8736_v17 = vld [vmem:[%s12984_s1 + $0xf54] ss:$40 sps:$4 sm:$0xff]  }
  0x4d   :  { %5107 = vmatprep.subr.bf16.mxu0 %v8643_v16  ;;  %5292 = vmatprep.mubr.bf16.mxu1 %v10058_v48  ;;  %v8680_v48 = vld [vmem:[%s12984_s1 + $0x2d8] ss:$40 sps:$4 sm:$0xff]  }
  0x4e   :  { %5133 = vmatprep.mubr.bf16.mxu0 %v10247_v39  ;;  %v10365_v16 = vld [vmem:[%s12985_s0 + $0x10] ss:$40 sps:$4 sm:$0xff]  }
  0x4f   :  { %5267 = vmatpush1.bf16.msra.mxu1 %v8644_v19  ;;  %v10376_v19 = vld [vmem:[%s12985_s0 + $0x64] ss:$40 sps:$4 sm:$0xff]  }
  0x50   :  { %5108 = vmatpush1.bf16.msra.mxu0 %v8641_v18  ;;  %5268 = vmatprep.subr.bf16.mxu1 %v8652_v21  ;;  %v8739_v18 = vld [vmem:[%s12984_s1 + $0x55c] ss:$40 sps:$4 sm:$0xff]   ;;  %v8737_v21 = vld [vmem:[%s12984_s1 + $0x558] ss:$40 sps:$4 sm:$0xff]  }
  0x51   :  { %5109 = vmatprep.subr.bf16.mxu0 %v8649_v20  ;;  %v8734_v20 = vld [vmem:[%s12984_s1 + $0xf50] ss:$40 sps:$4 sm:$0xff]  }
  0x53   :  { %5269 = vmatpush1.bf16.msra.mxu1 %v8650_v23  ;;  %v8740_v23 = vld [vmem:[%s12984_s1 + $0xfa0] ss:$40 sps:$4 sm:$0xff]  }
  0x54   :  { %5110 = vmatpush1.bf16.msra.mxu0 %v8647_v22  ;;  %5270 = vmatprep.subr.bf16.mxu1 %v8658_v25  ;;  %v8742_v22 = vld [vmem:[%s12984_s1 + $0xfa4] ss:$40 sps:$4 sm:$0xff]   ;;  %v10403_v25 = vld [vmem:[%s12985_s0 + $0x60] ss:$40 sps:$4 sm:$0xff]  }
  0x55   :  { %5111 = vmatprep.subr.bf16.mxu0 %v8655_v24  ;;  %v8743_v24 = vld [vmem:[%s12984_s1 + $0x5a8] ss:$40 sps:$4 sm:$0xff]  }
  0x57   :  { %5271 = vmatpush1.bf16.msra.mxu1 %v8656_v27  ;;  %v8751_v27 = vld [vmem:[%s12984_s1 + $0x5fc] ss:$40 sps:$4 sm:$0xff]  }
  0x58   :  { %5112 = vmatpush1.bf16.msra.mxu0 %v8653_v26  ;;  %5272 = vmatprep.subr.bf16.mxu1 %v8664_v31  ;;  %v8748_v26 = vld [vmem:[%s12984_s1 + $0xff4] ss:$40 sps:$4 sm:$0xff]   ;;  %v8749_v31 = vld [vmem:[%s12984_s1 + $0x5f8] ss:$40 sps:$4 sm:$0xff]  }
  0x59   :  { %5113 = vmatprep.subr.bf16.mxu0 %v8661_v30  ;;  %v8746_v30 = vld [vmem:[%s12984_s1 + $0xff0] ss:$40 sps:$4 sm:$0xff]  }
  0x5b   :  { %5273 = vmatpush1.bf16.msra.mxu1 %v8662_v33  ;;  %v8757_v33 = vld [vmem:[%s12984_s1 + $0x64c] ss:$40 sps:$4 sm:$0xff]  }
  0x5c   :  { %5114 = vmatpush1.bf16.msra.mxu0 %v8659_v32  ;;  %5274 = vmatprep.subr.bf16.mxu1 %v8670_v37  ;;  %v8754_v32 = vld [vmem:[%s12984_s1 + $0x1044] ss:$40 sps:$4 sm:$0xff]   ;;  %v8760_v37 = vld [vmem:[%s12984_s1 + $0x1094] ss:$40 sps:$4 sm:$0xff]  }
  0x5d   :  { %5115 = vmatprep.subr.bf16.mxu0 %v8667_v36  ;;  %v8755_v36 = vld [vmem:[%s12984_s1 + $0x648] ss:$40 sps:$4 sm:$0xff]  }
  0x5f   :  { %5275 = vmatpush1.bf16.msra.mxu1 %v8668_v40  ;;  %v8761_v40 = vld [vmem:[%s12984_s1 + $0x698] ss:$40 sps:$4 sm:$0xff]  }
  0x60   :  { %5116 = vmatpush1.bf16.msra.mxu0 %v8665_v38  ;;  %5276 = vmatprep.subr.bf16.mxu1 %v8676_v42  ;;  %v8758_v38 = vld [vmem:[%s12984_s1 + $0x1090] ss:$40 sps:$4 sm:$0xff]   ;;  %v8769_v42 = vld [vmem:[%s12984_s1 + $0x6ec] ss:$40 sps:$4 sm:$0xff]  }
  0x61   :  { %5117 = vmatprep.subr.bf16.mxu0 %v8673_v41  ;;  %v8766_v41 = vld [vmem:[%s12984_s1 + $0x10e4] ss:$40 sps:$4 sm:$0xff]  }
  0x63   :  { %5277 = vmatpush1.bf16.msra.mxu1 %v8674_v44  ;;  %v8767_v44 = vld [vmem:[%s12984_s1 + $0x6e8] ss:$40 sps:$4 sm:$0xff]  }
  0x64   :  { %5118 = vmatpush1.bf16.msra.mxu0 %v8671_v43  ;;  %5278 = vmatprep.subr.bf16.mxu1 %v8682_v46  ;;  %v8764_v43 = vld [vmem:[%s12984_s1 + $0x10e0] ss:$40 sps:$4 sm:$0xff]   ;;  %v8775_v46 = vld [vmem:[%s12984_s1 + $0x73c] ss:$40 sps:$4 sm:$0xff]  }
  0x65   :  { %5119 = vmatprep.subr.bf16.mxu0 %v8679_v45  ;;  %v8772_v45 = vld [vmem:[%s12984_s1 + $0x1134] ss:$40 sps:$4 sm:$0xff]  }
  0x67   :  { %5279 = vmatpush1.bf16.msra.mxu1 %v8680_v48  ;;  %v8773_v48 = vld [vmem:[%s12984_s1 + $0x738] ss:$40 sps:$4 sm:$0xff]  }
  0x68   :  { %5120 = vmatpush1.bf16.msra.mxu0 %v8677_v47  ;;  %5280 = vmatprep.subr.bf16.mxu1 %v8688_v51  ;;  %v8770_v47 = vld [vmem:[%s12984_s1 + $0x1130] ss:$40 sps:$4 sm:$0xff]   ;;  %v8781_v51 = vld [vmem:[%s12984_s1 + $0x78c] ss:$40 sps:$4 sm:$0xff]  }
  0x69   :  { %5121 = vmatprep.subr.bf16.mxu0 %v8685_v50  ;;  %v8778_v50 = vld [vmem:[%s12984_s1 + $0x1184] ss:$40 sps:$4 sm:$0xff]  }
  0x6b   :  { %5281 = vmatpush1.bf16.msra.mxu1 %v8686_v53  ;;  %v8779_v53 = vld [vmem:[%s12984_s1 + $0x788] ss:$40 sps:$4 sm:$0xff]  }
  0x6c   :  { %5122 = vmatpush1.bf16.msra.mxu0 %v8683_v52  ;;  %5282 = vmatprep.subr.bf16.mxu1 %v8694_v55  ;;  %v8776_v52 = vld [vmem:[%s12984_s1 + $0x1180] ss:$40 sps:$4 sm:$0xff]   ;;  %v8787_v55 = vld [vmem:[%s12984_s1 + $0x7dc] ss:$40 sps:$4 sm:$0xff]  }
  0x6d   :  { %5123 = vmatprep.subr.bf16.mxu0 %v8691_v54  ;;  %v8784_v54 = vld [vmem:[%s12984_s1 + $0x11d4] ss:$40 sps:$4 sm:$0xff]  }
  0x6f   :  { %5283 = vmatpush1.bf16.msra.mxu1 %v8692_v57  ;;  %v8785_v57 = vld [vmem:[%s12984_s1 + $0x7d8] ss:$40 sps:$4 sm:$0xff]  }
  0x70   :  { %5124 = vmatpush1.bf16.msra.mxu0 %v8689_v56  ;;  %5284 = vmatprep.subr.bf16.mxu1 %v8700_v59  ;;  %v8782_v56 = vld [vmem:[%s12984_s1 + $0x11d0] ss:$40 sps:$4 sm:$0xff]   ;;  %v8793_v59 = vld [vmem:[%s12984_s1 + $0x82c] ss:$40 sps:$4 sm:$0xff]  }
  0x71   :  { %5125 = vmatprep.subr.bf16.mxu0 %v8697_v58  ;;  %v8790_v58 = vld [vmem:[%s12984_s1 + $0x1224] ss:$40 sps:$4 sm:$0xff]  }
  0x73   :  { %5285 = vmatpush1.bf16.msra.mxu1 %v8698_v61  ;;  %v8791_v61 = vld [vmem:[%s12984_s1 + $0x828] ss:$40 sps:$4 sm:$0xff]  }
  0x74   :  { %5126 = vmatpush1.bf16.msra.mxu0 %v8695_v60  ;;  %5286 = vmatprep.subr.bf16.mxu1 %v8706_v63  ;;  %v8788_v60 = vld [vmem:[%s12984_s1 + $0x1220] ss:$40 sps:$4 sm:$0xff]   ;;  %v8799_v63 = vld [vmem:[%s12984_s1 + $0x87c] ss:$40 sps:$4 sm:$0xff]  }
  0x75   :  { %5127 = vmatprep.subr.bf16.mxu0 %v8703_v62  ;;  %v8796_v62 = vld [vmem:[%s12984_s1 + $0x1274] ss:$40 sps:$4 sm:$0xff]  }
  0x77   :  { %5287 = vmatpush1.bf16.msra.mxu1 %v8704_v1  ;;  %v8797_v1 = vld [vmem:[%s12984_s1 + $0x878] ss:$40 sps:$4 sm:$0xff]  }
  0x78   :  { %5128 = vmatpush1.bf16.msra.mxu0 %v8701_v0  ;;  %5288 = vmatprep.subr.bf16.mxu1 %v8716_v3  ;;  %v8794_v0 = vld [vmem:[%s12984_s1 + $0x1270] ss:$40 sps:$4 sm:$0xff]   ;;  %v8805_v3 = vld [vmem:[%s12984_s1 + $0x8cc] ss:$40 sps:$4 sm:$0xff]  }
  0x79   :  { %5129 = vmatprep.subr.bf16.mxu0 %v8713_v2  ;;  %v8802_v2 = vld [vmem:[%s12984_s1 + $0x12c4] ss:$40 sps:$4 sm:$0xff]  }
  0x7b   :  { %5289 = vmatpush1.bf16.msra.mxu1 %v8714_v5  ;;  %v8803_v5 = vld [vmem:[%s12984_s1 + $0x8c8] ss:$40 sps:$4 sm:$0xff]  }
  0x7c   :  { %5130 = vmatpush1.bf16.msra.mxu0 %v8711_v4  ;;  %5290 = vmatprep.subr.bf16.mxu1 %v8724_v9  ;;  %v8800_v4 = vld [vmem:[%s12984_s1 + $0x12c0] ss:$40 sps:$4 sm:$0xff]   ;;  %v8811_v9 = vld [vmem:[%s12984_s1 + $0x91c] ss:$40 sps:$4 sm:$0xff]  }
  0x7d   :  { %5131 = vmatprep.subr.bf16.mxu0 %v8721_v8  ;;  %v8808_v8 = vld [vmem:[%s12984_s1 + $0x1314] ss:$40 sps:$4 sm:$0xff]  }
  0x7f   :  { %5291 = vmatpush1.bf16.msra.mxu1 %v8722_v11  ;;  %v8809_v11 = vld [vmem:[%s12984_s1 + $0x918] ss:$40 sps:$4 sm:$0xff]  }
  0x80   :  { %5132 = vmatpush1.bf16.msra.mxu0 %v8719_v10  ;;  %5313 = vmatprep.subr.bf16.mxu1 %v8732_v13  ;;  %v8806_v10 = vld [vmem:[%s12984_s1 + $0x1310] ss:$40 sps:$4 sm:$0xff]   ;;  %v8819_v13 = vld [vmem:[%s12984_s1 + $0x96c] ss:$40 sps:$4 sm:$0xff]  }
  0x81   :  { %5154 = vmatprep.subr.bf16.mxu0 %v8729_v12  ;;  %v8816_v12 = vld [vmem:[%s12984_s1 + $0x1364] ss:$40 sps:$4 sm:$0xff]  }
  0x82   :  { %5293 = vmatmul.mubr.bf16.vlgmr.msra.gmra.mrb[8].mxu1 %v10130_v6  ;;  %v8745_v6 = vld [vmem:[%s12984_s1 + $0x5ac] ss:$40 sps:$4 sm:$0xff]  }
  0x83   :  { %5134 = vmatmul.mubr.bf16.vlgmr.msra.gmra.mrb[0].mxu0 %v10365_v16  ;;  %5314 = vmatpush1.bf16.msra.mxu1 %v8730_v15  ;;  %v8817_v15 = vld [vmem:[%s12984_s1 + $0x968] ss:$40 sps:$4 sm:$0xff]  }
  0x84   :  { %5155 = vmatpush1.bf16.msra.mxu0 %v8727_v14  ;;  %5315 = vmatprep.subr.bf16.mxu1 %v8739_v18  ;;  %v8814_v14 = vld [vmem:[%s12984_s1 + $0x1360] ss:$40 sps:$4 sm:$0xff]   ;;  %v8826_v18 = vld [vmem:[%s12984_s1 + $0x9bc] ss:$40 sps:$4 sm:$0xff]  }
  0x85   :  { %5156 = vmatprep.subr.bf16.mxu0 %v8736_v17  ;;  %5143 = vmatprep.mubr.bf16.mxu0 %v10376_v19  ;;  %v8823_v17 = vld [vmem:[%s12984_s1 + $0x13b4] ss:$40 sps:$4 sm:$0xff]  }
  0x86   :  { %5302 = vmatprep.mubr.bf16.mxu1 %v10202_v28  ;;  %v10414_v28 = vld [vmem:[%s12985_s0 + $0x1c] ss:$40 sps:$4 sm:$0xff]  }
  0x87   :  { %5316 = vmatpush1.bf16.msra.mxu1 %v8737_v21  ;;  %v8824_v21 = vld [vmem:[%s12984_s1 + $0x9b8] ss:$40 sps:$4 sm:$0xff]  }
  0x88   :  { %5157 = vmatpush1.bf16.msra.mxu0 %v8734_v20  ;;  %5317 = vmatprep.subr.bf16.mxu1 %v8745_v6  ;;  %v8821_v20 = vld [vmem:[%s12984_s1 + $0x13b0] ss:$40 sps:$4 sm:$0xff]   ;;  %v8834_v6 = vld [vmem:[%s12984_s1 + $0xa0c] ss:$40 sps:$4 sm:$0xff]  }
  0x89   :  { %5158 = vmatprep.subr.bf16.mxu0 %v8742_v22  ;;  %v8831_v22 = vld [vmem:[%s12984_s1 + $0x1404] ss:$40 sps:$4 sm:$0xff]  }
  0x8a   :  { %5303 = vmatmul.mubr.bf16.gmra.mrb[12].mxu1 %v10226_v34  ;;  %v8752_v34 = vld [vmem:[%s12984_s1 + $0x1040] ss:$40 sps:$4 sm:$0xff]  }
  0x8b   :  { %5144 = vmatmul.mubr.bf16.gmra.mrb[4].mxu0 %v10403_v25  ;;  %5318 = vmatpush1.bf16.msra.mxu1 %v8743_v24  ;;  %v8832_v24 = vld [vmem:[%s12984_s1 + $0xa08] ss:$40 sps:$4 sm:$0xff]  }
  0x8c   :  { %5159 = vmatpush1.bf16.msra.mxu0 %v8740_v23  ;;  %5319 = vmatprep.subr.bf16.mxu1 %v8751_v27  ;;  %v8829_v23 = vld [vmem:[%s12984_s1 + $0x1400] ss:$40 sps:$4 sm:$0xff]   ;;  %v8838_v27 = vld [vmem:[%s12984_s1 + $0x1454] ss:$40 sps:$4 sm:$0xff]  }
  0x8d   :  { %5160 = vmatprep.subr.bf16.mxu0 %v8748_v26  ;;  %5186 = vmatprep.mubr.bf16.mxu0 %v10414_v28  ;;  %v10585_v26 = vld [vmem:[%s12985_s0 + $0x18] ss:$40 sps:$4 sm:$0xff]  }
  0x8e   :  { %5345 = vmatprep.mubr.bf16.mxu1 %v10063_v49  ;;  %v8763_v49 = vld [vmem:[%s12984_s1 + $0x69c] ss:$40 sps:$4 sm:$0xff]  }
  0x8f   :  { %5320 = vmatpush1.bf16.msra.mxu1 %v8749_v31  ;;  %v10596_v31 = vld [vmem:[%s12985_s0 + $0x6c] ss:$40 sps:$4 sm:$0xff]  }
  0x90   :  { %5161 = vmatpush1.bf16.msra.mxu0 %v8746_v30  ;;  %5321 = vmatprep.subr.bf16.mxu1 %v8757_v33  ;;  %v8841_v30 = vld [vmem:[%s12984_s1 + $0xa5c] ss:$40 sps:$4 sm:$0xff]   ;;  %v8839_v33 = vld [vmem:[%s12984_s1 + $0xa58] ss:$40 sps:$4 sm:$0xff]  }
  0x91   :  { %5162 = vmatprep.subr.bf16.mxu0 %v8754_v32  ;;  %v8836_v32 = vld [vmem:[%s12984_s1 + $0x1450] ss:$40 sps:$4 sm:$0xff]  }
  0x93   :  { %5322 = vmatpush1.bf16.msra.mxu1 %v8755_v36  ;;  %v8842_v36 = vld [vmem:[%s12984_s1 + $0x14a0] ss:$40 sps:$4 sm:$0xff]  }
  0x94   :  { %5163 = vmatpush1.bf16.msra.mxu0 %v8752_v34  ;;  %5323 = vmatprep.subr.bf16.mxu1 %v8763_v49  ;;  %v8844_v34 = vld [vmem:[%s12984_s1 + $0x14a4] ss:$40 sps:$4 sm:$0xff]   ;;  %v10623_v49 = vld [vmem:[%s12985_s0 + $0x68] ss:$40 sps:$4 sm:$0xff]  }
  0x95   :  { %5164 = vmatprep.subr.bf16.mxu0 %v8760_v37  ;;  %v8845_v37 = vld [vmem:[%s12984_s1 + $0xaa8] ss:$40 sps:$4 sm:$0xff]  }
  0x97   :  { %5324 = vmatpush1.bf16.msra.mxu1 %v8761_v40  ;;  %v10634_v40 = vld [vmem:[%s12985_s0 + $0x24] ss:$40 sps:$4 sm:$0xff]  }
  0x98   :  { %5165 = vmatpush1.bf16.msra.mxu0 %v8758_v38  ;;  %5325 = vmatprep.subr.bf16.mxu1 %v8769_v42  ;;  %v8850_v38 = vld [vmem:[%s12984_s1 + $0x14f4] ss:$40 sps:$4 sm:$0xff]   ;;  %v8851_v42 = vld [vmem:[%s12984_s1 + $0xaf8] ss:$40 sps:$4 sm:$0xff]  }
  0x99   :  { %5166 = vmatprep.subr.bf16.mxu0 %v8766_v41  ;;  %v8848_v41 = vld [vmem:[%s12984_s1 + $0x14f0] ss:$40 sps:$4 sm:$0xff]  }
  0x9b   :  { %5326 = vmatpush1.bf16.msra.mxu1 %v8767_v44  ;;  %v8859_v44 = vld [vmem:[%s12984_s1 + $0xb4c] ss:$40 sps:$4 sm:$0xff]  }
  0x9c   :  { %5167 = vmatpush1.bf16.msra.mxu0 %v8764_v43  ;;  %5327 = vmatprep.subr.bf16.mxu1 %v8775_v46  ;;  %v8856_v43 = vld [vmem:[%s12984_s1 + $0x1544] ss:$40 sps:$4 sm:$0xff]   ;;  %v8862_v46 = vld [vmem:[%s12984_s1 + $0x1594] ss:$40 sps:$4 sm:$0xff]  }
  0x9d   :  { %5168 = vmatprep.subr.bf16.mxu0 %v8772_v45  ;;  %v8857_v45 = vld [vmem:[%s12984_s1 + $0xb48] ss:$40 sps:$4 sm:$0xff]  }
  0x9f   :  { %5328 = vmatpush1.bf16.msra.mxu1 %v8773_v48  ;;  %v8863_v48 = vld [vmem:[%s12984_s1 + $0xb98] ss:$40 sps:$4 sm:$0xff]  }
  0xa0   :  { %5169 = vmatpush1.bf16.msra.mxu0 %v8770_v47  ;;  %5329 = vmatprep.subr.bf16.mxu1 %v8781_v51  ;;  %v8860_v47 = vld [vmem:[%s12984_s1 + $0x1590] ss:$40 sps:$4 sm:$0xff]   ;;  %v8871_v51 = vld [vmem:[%s12984_s1 + $0xbec] ss:$40 sps:$4 sm:$0xff]  }
  0xa1   :  { %5170 = vmatprep.subr.bf16.mxu0 %v8778_v50  ;;  %v8868_v50 = vld [vmem:[%s12984_s1 + $0x15e4] ss:$40 sps:$4 sm:$0xff]  }
  0xa3   :  { %5330 = vmatpush1.bf16.msra.mxu1 %v8779_v53  ;;  %v8869_v53 = vld [vmem:[%s12984_s1 + $0xbe8] ss:$40 sps:$4 sm:$0xff]  }
  0xa4   :  { %5171 = vmatpush1.bf16.msra.mxu0 %v8776_v52  ;;  %5331 = vmatprep.subr.bf16.mxu1 %v8787_v55  ;;  %v8866_v52 = vld [vmem:[%s12984_s1 + $0x15e0] ss:$40 sps:$4 sm:$0xff]   ;;  %v8877_v55 = vld [vmem:[%s12984_s1 + $0xc3c] ss:$40 sps:$4 sm:$0xff]  }
  0xa5   :  { %5172 = vmatprep.subr.bf16.mxu0 %v8784_v54  ;;  %v8874_v54 = vld [vmem:[%s12984_s1 + $0x1634] ss:$40 sps:$4 sm:$0xff]  }
  0xa7   :  { %5332 = vmatpush1.bf16.msra.mxu1 %v8785_v57  ;;  %v8875_v57 = vld [vmem:[%s12984_s1 + $0xc38] ss:$40 sps:$4 sm:$0xff]  }
  0xa8   :  { %5173 = vmatpush1.bf16.msra.mxu0 %v8782_v56  ;;  %5333 = vmatprep.subr.bf16.mxu1 %v8793_v59  ;;  %v8872_v56 = vld [vmem:[%s12984_s1 + $0x1630] ss:$40 sps:$4 sm:$0xff]   ;;  %v8883_v59 = vld [vmem:[%s12984_s1 + $0xc8c] ss:$40 sps:$4 sm:$0xff]  }
  0xa9   :  { %5174 = vmatprep.subr.bf16.mxu0 %v8790_v58  ;;  %v8880_v58 = vld [vmem:[%s12984_s1 + $0x1684] ss:$40 sps:$4 sm:$0xff]  }
  0xab   :  { %5334 = vmatpush1.bf16.msra.mxu1 %v8791_v61  ;;  %v8881_v61 = vld [vmem:[%s12984_s1 + $0xc88] ss:$40 sps:$4 sm:$0xff]  }
  0xac   :  { %5175 = vmatpush1.bf16.msra.mxu0 %v8788_v60  ;;  %5335 = vmatprep.subr.bf16.mxu1 %v8799_v63  ;;  %v8878_v60 = vld [vmem:[%s12984_s1 + $0x1680] ss:$40 sps:$4 sm:$0xff]   ;;  %v8889_v63 = vld [vmem:[%s12984_s1 + $0xcdc] ss:$40 sps:$4 sm:$0xff]  }
  0xad   :  { %5176 = vmatprep.subr.bf16.mxu0 %v8796_v62  ;;  %v8886_v62 = vld [vmem:[%s12984_s1 + $0x16d4] ss:$40 sps:$4 sm:$0xff]  }
  0xaf   :  { %5336 = vmatpush1.bf16.msra.mxu1 %v8797_v1  ;;  %v8887_v1 = vld [vmem:[%s12984_s1 + $0xcd8] ss:$40 sps:$4 sm:$0xff]  }
  0xb0   :  { %5177 = vmatpush1.bf16.msra.mxu0 %v8794_v0  ;;  %5337 = vmatprep.subr.bf16.mxu1 %v8805_v3  ;;  %v8884_v0 = vld [vmem:[%s12984_s1 + $0x16d0] ss:$40 sps:$4 sm:$0xff]   ;;  %v8895_v3 = vld [vmem:[%s12984_s1 + $0xd2c] ss:$40 sps:$4 sm:$0xff]  }
  0xb1   :  { %5178 = vmatprep.subr.bf16.mxu0 %v8802_v2  ;;  %v8892_v2 = vld [vmem:[%s12984_s1 + $0x1724] ss:$40 sps:$4 sm:$0xff]  }
  0xb3   :  { %5338 = vmatpush1.bf16.msra.mxu1 %v8803_v5  ;;  %v8893_v5 = vld [vmem:[%s12984_s1 + $0xd28] ss:$40 sps:$4 sm:$0xff]  }
  0xb4   :  { %5179 = vmatpush1.bf16.msra.mxu0 %v8800_v4  ;;  %5339 = vmatprep.subr.bf16.mxu1 %v8811_v9  ;;  %v8890_v4 = vld [vmem:[%s12984_s1 + $0x1720] ss:$40 sps:$4 sm:$0xff]   ;;  %v8901_v9 = vld [vmem:[%s12984_s1 + $0xd7c] ss:$40 sps:$4 sm:$0xff]  }
  0xb5   :  { %5180 = vmatprep.subr.bf16.mxu0 %v8808_v8  ;;  %v8898_v8 = vld [vmem:[%s12984_s1 + $0x1774] ss:$40 sps:$4 sm:$0xff]  }
  0xb7   :  { %5340 = vmatpush1.bf16.msra.mxu1 %v8809_v11  ;;  %v8899_v11 = vld [vmem:[%s12984_s1 + $0xd78] ss:$40 sps:$4 sm:$0xff]  }
  0xb8   :  { %5181 = vmatpush1.bf16.msra.mxu0 %v8806_v10  ;;  %5341 = vmatprep.subr.bf16.mxu1 %v8819_v13  ;;  %v8896_v10 = vld [vmem:[%s12984_s1 + $0x1770] ss:$40 sps:$4 sm:$0xff]   ;;  %v8907_v13 = vld [vmem:[%s12984_s1 + $0xdcc] ss:$40 sps:$4 sm:$0xff]  }
  0xb9   :  { %5182 = vmatprep.subr.bf16.mxu0 %v8816_v12  ;;  %v8904_v12 = vld [vmem:[%s12984_s1 + $0x17c4] ss:$40 sps:$4 sm:$0xff]  }
  0xbb   :  { %5342 = vmatpush1.bf16.msra.mxu1 %v8817_v15  ;;  %v8905_v15 = vld [vmem:[%s12984_s1 + $0xdc8] ss:$40 sps:$4 sm:$0xff]  }
  0xbc   :  { %5183 = vmatpush1.bf16.msra.mxu0 %v8814_v14  ;;  %5343 = vmatprep.subr.bf16.mxu1 %v8826_v18  ;;  %v8902_v14 = vld [vmem:[%s12984_s1 + $0x17c0] ss:$40 sps:$4 sm:$0xff]   ;;  %v8913_v18 = vld [vmem:[%s12984_s1 + $0xe1c] ss:$40 sps:$4 sm:$0xff]  }
  0xbd   :  { %5184 = vmatprep.subr.bf16.mxu0 %v8823_v17  ;;  %v8910_v17 = vld [vmem:[%s12984_s1 + $0x1814] ss:$40 sps:$4 sm:$0xff]  }
  0xbf   :  { %5344 = vmatpush1.bf16.msra.mxu1 %v8824_v21  ;;  %v8911_v21 = vld [vmem:[%s12984_s1 + $0xe18] ss:$40 sps:$4 sm:$0xff]  }
  0xc0   :  { %5185 = vmatpush1.bf16.msra.mxu0 %v8821_v20  ;;  %5366 = vmatprep.subr.bf16.mxu1 %v8834_v6  ;;  %v8908_v20 = vld [vmem:[%s12984_s1 + $0x1810] ss:$40 sps:$4 sm:$0xff]   ;;  %v8922_v6 = vld [vmem:[%s12984_s1 + $0xe6c] ss:$40 sps:$4 sm:$0xff]  }
  0xc1   :  { %5207 = vmatprep.subr.bf16.mxu0 %v8831_v22  ;;  %v8919_v22 = vld [vmem:[%s12984_s1 + $0x1864] ss:$40 sps:$4 sm:$0xff]  }
  0xc2   :  { %5346 = vmatmul.mubr.bf16.vlgmr.msra.gmra.mrb[8].mxu1 %v10135_v7  ;;  %v8847_v7 = vld [vmem:[%s12984_s1 + $0xaac] ss:$40 sps:$4 sm:$0xff]  }
  0xc3   :  { %5187 = vmatmul.mubr.bf16.vlgmr.msra.gmra.mrb[0].mxu0 %v10585_v26  ;;  %5367 = vmatpush1.bf16.msra.mxu1 %v8832_v24  ;;  %v8920_v24 = vld [vmem:[%s12984_s1 + $0xe68] ss:$40 sps:$4 sm:$0xff]  }
  0xc4   :  { %5208 = vmatpush1.bf16.msra.mxu0 %v8829_v23  ;;  %5368 = vmatprep.subr.bf16.mxu1 %v8841_v30  ;;  %v8917_v23 = vld [vmem:[%s12984_s1 + $0x1860] ss:$40 sps:$4 sm:$0xff]   ;;  %v8928_v30 = vld [vmem:[%s12984_s1 + $0xebc] ss:$40 sps:$4 sm:$0xff]  }
  0xc5   :  { %5209 = vmatprep.subr.bf16.mxu0 %v8838_v27  ;;  %5196 = vmatprep.mubr.bf16.mxu0 %v10596_v31  ;;  %v8925_v27 = vld [vmem:[%s12984_s1 + $0x18b4] ss:$40 sps:$4 sm:$0xff]  }
  0xc6   :  { %5355 = vmatprep.mubr.bf16.mxu1 %v10207_v29  ;;  %v8853_v29 = vld [vmem:[%s12984_s1 + $0xafc] ss:$40 sps:$4 sm:$0xff]  }
  0xc7   :  { %5369 = vmatpush1.bf16.msra.mxu1 %v8839_v33  ;;  %v8926_v33 = vld [vmem:[%s12984_s1 + $0xeb8] ss:$40 sps:$4 sm:$0xff]  }
  0xc8   :  { %5210 = vmatpush1.bf16.msra.mxu0 %v8836_v32  ;;  %5370 = vmatprep.subr.bf16.mxu1 %v8847_v7  ;;  %v8923_v32 = vld [vmem:[%s12984_s1 + $0x18b0] ss:$40 sps:$4 sm:$0xff]   ;;  %v8937_v7 = vld [vmem:[%s12984_s1 + $0x14] ss:$40 sps:$4 sm:$0xff]  }
  0xc9   :  { %5211 = vmatprep.subr.bf16.mxu0 %v8844_v34  ;;  %v8934_v34 = vld [vmem:[%s12984_s1 + $0xf0c] ss:$40 sps:$4 sm:$0xff]  }
  0xca   :  { %5356 = vmatmul.mubr.bf16.gmra.mrb[12].mxu1 %v10231_v35  ;;  %v8854_v35 = vld [vmem:[%s12984_s1 + $0x1540] ss:$40 sps:$4 sm:$0xff]  }
  0xcb   :  { %5197 = vmatmul.mubr.bf16.gmra.mrb[4].mxu0 %v10623_v49  ;;  %5371 = vmatpush1.bf16.msra.mxu1 %v8845_v37  ;;  %v8932_v37 = vld [vmem:[%s12984_s1 + $0xf08] ss:$40 sps:$4 sm:$0xff]  }
  0xcc   :  { %5212 = vmatpush1.bf16.msra.mxu0 %v8842_v36  ;;  %5372 = vmatprep.subr.bf16.mxu1 %v8853_v29  ;;  %v8931_v36 = vld [vmem:[%s12985_s0 + $0x20] ss:$40 sps:$4 sm:$0xff]   ;;  %v8940_v29 = vld [vmem:[%s12984_s1 + $0xf5c] ss:$40 sps:$4 sm:$0xff]  }
  0xcd   :  { %5213 = vmatprep.subr.bf16.mxu0 %v8850_v38  ;;  %5239 = vmatprep.mubr.bf16.mxu0 %v10634_v40  ;;  %v8935_v38 = vld [vmem:[%s12984_s1 + $0x10] ss:$40 sps:$4 sm:$0xff]  }
  0xce   :  { %5398 = vmatprep.mubr.bf16.mxu1 %v10247_v39  ;;  %v8865_v39 = vld [vmem:[%s12984_s1 + $0xb9c] ss:$40 sps:$4 sm:$0xff]  }
  0xcf   :  { %5373 = vmatpush1.bf16.msra.mxu1 %v8851_v42  ;;  %v8944_v42 = vld [vmem:[%s12985_s0 + $0x74] ss:$40 sps:$4 sm:$0xff]  }
  0xd0   :  { %5214 = vmatpush1.bf16.msra.mxu0 %v8848_v41  ;;  %5374 = vmatprep.subr.bf16.mxu1 %v8859_v44  ;;  %v8943_v41 = vld [vmem:[%s12984_s1 + $0x64] ss:$40 sps:$4 sm:$0xff]   ;;  %v8941_v44 = vld [vmem:[%s12984_s1 + $0x60] ss:$40 sps:$4 sm:$0xff]  }
  0xd1   :  { %5215 = vmatprep.subr.bf16.mxu0 %v8856_v43  ;;  %v8938_v43 = vld [vmem:[%s12984_s1 + $0xf58] ss:$40 sps:$4 sm:$0xff]  }
  0xd3   :  { %5375 = vmatpush1.bf16.msra.mxu1 %v8857_v45  ;;  %v8946_v45 = vld [vmem:[%s12985_s0 + $0x70] ss:$40 sps:$4 sm:$0xff]  }
  0xd4   :  { %5216 = vmatpush1.bf16.msra.mxu0 %v8854_v35  ;;  %5376 = vmatprep.subr.bf16.mxu1 %v8865_v39  ;;  %v8949_v35 = vld [vmem:[%s12984_s1 + $0xfac] ss:$40 sps:$4 sm:$0xff]   ;;  %v8950_v39 = vld [vmem:[%s12984_s1 + $0xb0] ss:$40 sps:$4 sm:$0xff]  }
  0xd5   :  { %5217 = vmatprep.subr.bf16.mxu0 %v8862_v46  ;;  %v8947_v46 = vld [vmem:[%s12984_s1 + $0xfa8] ss:$40 sps:$4 sm:$0xff]  }
  0xd7   :  { %5377 = vmatpush1.bf16.msra.mxu1 %v8863_v48  ;;  %v8953_v48 = vld [vmem:[%s12984_s1 + $0xff8] ss:$40 sps:$4 sm:$0xff]  }
  0xd8   :  { %5218 = vmatpush1.bf16.msra.mxu0 %v8860_v47  ;;  %5378 = vmatprep.subr.bf16.mxu1 %v8871_v51  ;;  %v8955_v47 = vld [vmem:[%s12984_s1 + $0xffc] ss:$40 sps:$4 sm:$0xff]   ;;  %v8961_v51 = vld [vmem:[%s12984_s1 + $0x104c] ss:$40 sps:$4 sm:$0xff]  }
  0xd9   :  { %5219 = vmatprep.subr.bf16.mxu0 %v8868_v50  ;;  %v8956_v50 = vld [vmem:[%s12984_s1 + $0x100] ss:$40 sps:$4 sm:$0xff]  }
  0xdb   :  { %5379 = vmatpush1.bf16.msra.mxu1 %v8869_v53  ;;  %v9831_v53 = vld [vmem:[%s12985_s0 + $0x4] ss:$40 sps:$4 sm:$0xff]  }
  0xdc   :  { %5220 = vmatpush1.bf16.msra.mxu0 %v8866_v52  ;;  %5380 = vmatprep.subr.bf16.mxu1 %v8877_v55  ;;  %v8964_v52 = vld [vmem:[%s12984_s1 + $0x154] ss:$40 sps:$4 sm:$0xff]  }
  0xdd   :  { %5221 = vmatprep.subr.bf16.mxu0 %v8874_v54  ;;  %v8962_v54 = vld [vmem:[%s12984_s1 + $0x150] ss:$40 sps:$4 sm:$0xff]   ;;  %v8967_v55 = vld [vmem:[%s12984_s1 + $0x109c] ss:$40 sps:$4 sm:$0xff]  }
  0xdf   :  { %5381 = vmatpush1.bf16.msra.mxu1 %v8875_v57  ;;  %v8968_v57 = vld [vmem:[%s12984_s1 + $0x1a0] ss:$40 sps:$4 sm:$0xff]  }
  0xe0   :  { %5222 = vmatpush1.bf16.msra.mxu0 %v8872_v56  ;;  %5382 = vmatprep.subr.bf16.mxu1 %v8883_v59  ;;  %v8965_v56 = vld [vmem:[%s12984_s1 + $0x1098] ss:$40 sps:$4 sm:$0xff]   ;;  %v8976_v59 = vld [vmem:[%s12984_s1 + $0x1f4] ss:$40 sps:$4 sm:$0xff]  }
  0xe1   :  { %5223 = vmatprep.subr.bf16.mxu0 %v8880_v58  ;;  %v8973_v58 = vld [vmem:[%s12984_s1 + $0x10ec] ss:$40 sps:$4 sm:$0xff]  }
  0xe3   :  { %5383 = vmatpush1.bf16.msra.mxu1 %v8881_v61  ;;  %v8974_v61 = vld [vmem:[%s12984_s1 + $0x1f0] ss:$40 sps:$4 sm:$0xff]  }
  0xe4   :  { %5224 = vmatpush1.bf16.msra.mxu0 %v8878_v60  ;;  %5384 = vmatprep.subr.bf16.mxu1 %v8889_v63  ;;  %v8971_v60 = vld [vmem:[%s12984_s1 + $0x10e8] ss:$40 sps:$4 sm:$0xff]   ;;  %v8982_v63 = vld [vmem:[%s12984_s1 + $0x244] ss:$40 sps:$4 sm:$0xff]  }
  0xe5   :  { %5225 = vmatprep.subr.bf16.mxu0 %v8886_v62  ;;  %v8979_v62 = vld [vmem:[%s12984_s1 + $0x113c] ss:$40 sps:$4 sm:$0xff]  }
  0xe7   :  { %5385 = vmatpush1.bf16.msra.mxu1 %v8887_v1  ;;  %v8980_v1 = vld [vmem:[%s12984_s1 + $0x240] ss:$40 sps:$4 sm:$0xff]  }
  0xe8   :  { %5226 = vmatpush1.bf16.msra.mxu0 %v8884_v0  ;;  %5386 = vmatprep.subr.bf16.mxu1 %v8895_v3  ;;  %v8977_v0 = vld [vmem:[%s12984_s1 + $0x1138] ss:$40 sps:$4 sm:$0xff]   ;;  %v8988_v3 = vld [vmem:[%s12984_s1 + $0x294] ss:$40 sps:$4 sm:$0xff]  }
  0xe9   :  { %5227 = vmatprep.subr.bf16.mxu0 %v8892_v2  ;;  %v8985_v2 = vld [vmem:[%s12984_s1 + $0x118c] ss:$40 sps:$4 sm:$0xff]  }
  0xeb   :  { %5387 = vmatpush1.bf16.msra.mxu1 %v8893_v5  ;;  %v8986_v5 = vld [vmem:[%s12984_s1 + $0x290] ss:$40 sps:$4 sm:$0xff]  }
  0xec   :  { %5228 = vmatpush1.bf16.msra.mxu0 %v8890_v4  ;;  %5388 = vmatprep.subr.bf16.mxu1 %v8901_v9  ;;  %v8983_v4 = vld [vmem:[%s12984_s1 + $0x1188] ss:$40 sps:$4 sm:$0xff]   ;;  %v8994_v9 = vld [vmem:[%s12984_s1 + $0x2e4] ss:$40 sps:$4 sm:$0xff]  }
  0xed   :  { %5229 = vmatprep.subr.bf16.mxu0 %v8898_v8  ;;  %v8991_v8 = vld [vmem:[%s12984_s1 + $0x11dc] ss:$40 sps:$4 sm:$0xff]  }
  0xef   :  { %5389 = vmatpush1.bf16.msra.mxu1 %v8899_v11  ;;  %v8992_v11 = vld [vmem:[%s12984_s1 + $0x2e0] ss:$40 sps:$4 sm:$0xff]  }
  0xf0   :  { %5230 = vmatpush1.bf16.msra.mxu0 %v8896_v10  ;;  %5390 = vmatprep.subr.bf16.mxu1 %v8907_v13  ;;  %v8989_v10 = vld [vmem:[%s12984_s1 + $0x11d8] ss:$40 sps:$4 sm:$0xff]   ;;  %v9000_v13 = vld [vmem:[%s12984_s1 + $0x334] ss:$40 sps:$4 sm:$0xff]  }
  0xf1   :  { %5231 = vmatprep.subr.bf16.mxu0 %v8904_v12  ;;  %v8997_v12 = vld [vmem:[%s12984_s1 + $0x122c] ss:$40 sps:$4 sm:$0xff]  }
  0xf3   :  { %5391 = vmatpush1.bf16.msra.mxu1 %v8905_v15  ;;  %v8998_v15 = vld [vmem:[%s12984_s1 + $0x330] ss:$40 sps:$4 sm:$0xff]  }
  0xf4   :  { %5232 = vmatpush1.bf16.msra.mxu0 %v8902_v14  ;;  %5392 = vmatprep.subr.bf16.mxu1 %v8913_v18  ;;  %v8995_v14 = vld [vmem:[%s12984_s1 + $0x1228] ss:$40 sps:$4 sm:$0xff]   ;;  %v9006_v18 = vld [vmem:[%s12984_s1 + $0x384] ss:$40 sps:$4 sm:$0xff]  }
  0xf5   :  { %5233 = vmatprep.subr.bf16.mxu0 %v8910_v17  ;;  %v9003_v17 = vld [vmem:[%s12984_s1 + $0x127c] ss:$40 sps:$4 sm:$0xff]  }
  0xf7   :  { %5393 = vmatpush1.bf16.msra.mxu1 %v8911_v21  ;;  %v9004_v21 = vld [vmem:[%s12984_s1 + $0x380] ss:$40 sps:$4 sm:$0xff]  }
  0xf8   :  { %5234 = vmatpush1.bf16.msra.mxu0 %v8908_v20  ;;  %5394 = vmatprep.subr.bf16.mxu1 %v8922_v6  ;;  %v9001_v20 = vld [vmem:[%s12984_s1 + $0x1278] ss:$40 sps:$4 sm:$0xff]   ;;  %v9012_v6 = vld [vmem:[%s12984_s1 + $0x3d4] ss:$40 sps:$4 sm:$0xff]  }
  0xf9   :  { %5235 = vmatprep.subr.bf16.mxu0 %v8919_v22  ;;  %v9009_v22 = vld [vmem:[%s12984_s1 + $0x12cc] ss:$40 sps:$4 sm:$0xff]  }
  0xfb   :  { %5395 = vmatpush1.bf16.msra.mxu1 %v8920_v24  ;;  %v9010_v24 = vld [vmem:[%s12984_s1 + $0x3d0] ss:$40 sps:$4 sm:$0xff]  }
  0xfc   :  { %5236 = vmatpush1.bf16.msra.mxu0 %v8917_v23  ;;  %5396 = vmatprep.subr.bf16.mxu1 %v8928_v30  ;;  %v9007_v23 = vld [vmem:[%s12984_s1 + $0x12c8] ss:$40 sps:$4 sm:$0xff]   ;;  %v9018_v30 = vld [vmem:[%s12984_s1 + $0x424] ss:$40 sps:$4 sm:$0xff]  }
  0xfd   :  { %5237 = vmatprep.subr.bf16.mxu0 %v8925_v27  ;;  %v9015_v27 = vld [vmem:[%s12984_s1 + $0x131c] ss:$40 sps:$4 sm:$0xff]  }
  0xff   :  { %5397 = vmatpush1.bf16.msra.mxu1 %v8926_v33  ;;  %v9016_v33 = vld [vmem:[%s12984_s1 + $0x420] ss:$40 sps:$4 sm:$0xff]  }
 0x100   :  { %5238 = vmatpush1.bf16.msra.mxu0 %v8923_v32  ;;  %5419 = vmatprep.subr.bf16.mxu1 %v8934_v34  ;;  %v9013_v32 = vld [vmem:[%s12984_s1 + $0x1318] ss:$40 sps:$4 sm:$0xff]  }
 0x101   :  { %5525 = vmatprep.subr.bf16.mxu0 %v8937_v7  ;;  %v9021_v7 = vld [vmem:[%s12984_s1 + $0x136c] ss:$40 sps:$4 sm:$0xff]  }
 0x102   :  { %5399 = vmatmul.mubr.bf16.vlgmr.msra.gmra.mrb[8].mxu1 %v10365_v16  ;;  %v8952_v16 = vld [vmem:[%s12984_s1 + $0xb4] ss:$40 sps:$4 sm:$0xff]  }
 0x103   :  { %5240 = vmatmul.mubr.bf16.vlgmr.msra.gmra.mrb[0].mxu0 %v8931_v36  ;;  %5420 = vmatpush1.bf16.msra.mxu1 %v8932_v37  ;;  %v9024_v36 = vld [vmem:[%s12984_s1 + $0x474] ss:$40 sps:$4 sm:$0xff]  }
 0x104   :  { %5526 = vmatpush1.bf16.msra.mxu0 %v8935_v38  ;;  %5421 = vmatprep.subr.bf16.mxu1 %v8940_v29 }
 0x105   :  { %5527 = vmatprep.subr.bf16.mxu0 %v8943_v41  ;;  %5249 = vmatprep.mubr.bf16.mxu0 %v8944_v42  ;;  %v9019_v41 = vld [vmem:[%s12984_s1 + $0x1368] ss:$40 sps:$4 sm:$0xff]  }
 0x106   :  { %5408 = vmatprep.mubr.bf16.mxu1 %v10376_v19  ;;  %v8958_v19 = vld [vmem:[%s12984_s1 + $0x104] ss:$40 sps:$4 sm:$0xff]   ;;  %v9022_v42 = vld [vmem:[%s12984_s1 + $0x470] ss:$40 sps:$4 sm:$0xff]  }
 0x107   :  { %5422 = vmatpush1.bf16.msra.mxu1 %v8938_v43  ;;  %v9027_v43 = vld [vmem:[%s12984_s1 + $0x13bc] ss:$40 sps:$4 sm:$0xff]  }
 0x108   :  { %5528 = vmatpush1.bf16.msra.mxu0 %v8941_v44  ;;  %5423 = vmatprep.subr.bf16.mxu1 %v8949_v35  ;;  %v9030_v44 = vld [vmem:[%s12984_s1 + $0x4c4] ss:$40 sps:$4 sm:$0xff]   ;;  %v9025_v35 = vld [vmem:[%s12984_s1 + $0x13b8] ss:$40 sps:$4 sm:$0xff]  }
 0x109   :  { %5529 = vmatprep.subr.bf16.mxu0 %v8952_v16  ;;  %v9028_v16 = vld [vmem:[%s12984_s1 + $0x4c0] ss:$40 sps:$4 sm:$0xff]  }
 0x10a   :  { %5409 = vmatmul.mubr.bf16.gmra.mrb[12].mxu1 %v10403_v25  ;;  %v8959_v25 = vld [vmem:[%s12984_s1 + $0x1048] ss:$40 sps:$4 sm:$0xff]  }
 0x10b   :  { %5250 = vmatmul.mubr.bf16.gmra.mrb[4].mxu0 %v8946_v45  ;;  %5424 = vmatpush1.bf16.msra.mxu1 %v8947_v46  ;;  %v9033_v45 = vld [vmem:[%s12984_s1 + $0x140c] ss:$40 sps:$4 sm:$0xff]  }
 0x10c   :  { %5530 = vmatpush1.bf16.msra.mxu0 %v8950_v39  ;;  %5425 = vmatprep.subr.bf16.mxu1 %v8955_v47  ;;  %v9036_v46 = vld [vmem:[%s12984_s1 + $0x514] ss:$40 sps:$4 sm:$0xff]   ;;  %v9031_v39 = vld [vmem:[%s12984_s1 + $0x1408] ss:$40 sps:$4 sm:$0xff]  }
 0x10d   :  { %5531 = vmatprep.subr.bf16.mxu0 %v8958_v19  ;;  %5451 = vmatprep.mubr.bf16.mxu1 %v10414_v28  ;;  %v8970_v28 = vld [vmem:[%s12984_s1 + $0x1a4] ss:$40 sps:$4 sm:$0xff]   ;;  %v9034_v47 = vld [vmem:[%s12984_s1 + $0x510] ss:$40 sps:$4 sm:$0xff]  }
 0x10e   :  { %5557 = vmatprep.mubr.bf16.mxu0 %v9831_v53  ;;  %v9039_v19 = vld [vmem:[%s12984_s1 + $0x145c] ss:$40 sps:$4 sm:$0xff]  }
 0x10f   :  { %5426 = vmatpush1.bf16.msra.mxu1 %v8953_v48  ;;  %v9042_v48 = vld [vmem:[%s12984_s1 + $0x564] ss:$40 sps:$4 sm:$0xff]   ;;  %v9048_v53 = vld [vmem:[%s12984_s1 + $0x5b4] ss:$40 sps:$4 sm:$0xff]  }
 0x110   :  { %5532 = vmatpush1.bf16.msra.mxu0 %v8956_v50  ;;  %5427 = vmatprep.subr.bf16.mxu1 %v8961_v51  ;;  %v9832_v50 = vld [vmem:[%s12985_s0] ss:$40 sps:$4 sm:$0xff]  }
 0x111   :  { %5533 = vmatprep.subr.bf16.mxu0 %v8964_v52  ;;  %v9037_v51 = vld [vmem:[%s12984_s1 + $0x1458] ss:$40 sps:$4 sm:$0xff]  }
 0x112   :  { %v9040_v52 = vld [vmem:[%s12984_s1 + $0x560] ss:$40 sps:$4 sm:$0xff]  }
 0x113   :  { %5428 = vmatpush1.bf16.msra.mxu1 %v8959_v25  ;;  %v9833_v25 = vld [vmem:[%s12985_s0 + $0x54] ss:$40 sps:$4 sm:$0xff]  }
 0x114   :  { %5534 = vmatpush1.bf16.msra.mxu0 %v8962_v54  ;;  %5429 = vmatprep.subr.bf16.mxu1 %v8967_v55  ;;  %v9043_v54 = vld [vmem:[%s12984_s1 + $0x14a8] ss:$40 sps:$4 sm:$0xff]  }
 0x115   :  { %5535 = vmatprep.subr.bf16.mxu0 %v8970_v28  ;;  %v10974_v34 = vpop.f32.mrb[0].mxu1  ;;  %v9046_v55 = vld [vmem:[%s12984_s1 + $0x5b0] ss:$40 sps:$4 sm:$0xff]   ;;  %v9054_v28 = vld [vmem:[%s12984_s1 + $0x604] ss:$40 sps:$4 sm:$0xff]  }
 0x116   :  { %v10982_v37 = vpop.f32.mrb[1].mxu1 }
 0x117   :  { %5430 = vmatpush1.bf16.msra.mxu1 %v8965_v56  ;;  %v10984_v38 = vpop.f32.mrb[2].mxu1  ;;  %v9834_v56 = vld [vmem:[%s12985_s0 + $0x50] ss:$40 sps:$4 sm:$0xff]  }
 0x118   :  { %5536 = vmatpush1.bf16.msra.mxu0 %v8968_v57  ;;  %5431 = vmatprep.subr.bf16.mxu1 %v8973_v58  ;;  %v10986_v29 = vpop.f32.mrb[3].mxu1  ;;  %v9049_v57 = vld [vmem:[%s12984_s1 + $0x14f8] ss:$40 sps:$4 sm:$0xff]  }
 0x119   :  { %5537 = vmatprep.subr.bf16.mxu0 %v8976_v59  ;;  %v9052_v58 = vld [vmem:[%s12984_s1 + $0x600] ss:$40 sps:$4 sm:$0xff]   ;;  %v9060_v59 = vld [vmem:[%s12984_s1 + $0x654] ss:$40 sps:$4 sm:$0xff]  }
 0x11b   :  { %5432 = vmatpush1.bf16.msra.mxu1 %v8971_v60  ;;  %v9835_v60 = vld [vmem:[%s12985_s0 + $0xc] ss:$40 sps:$4 sm:$0xff]  }
 0x11c   :  { %5538 = vmatpush1.bf16.msra.mxu0 %v8974_v61  ;;  %5433 = vmatprep.subr.bf16.mxu1 %v8979_v62  ;;  %v9055_v61 = vld [vmem:[%s12984_s1 + $0x1548] ss:$40 sps:$4 sm:$0xff]  }
 0x11d   :  { %5539 = vmatprep.subr.bf16.mxu0 %v8982_v63  ;;  %v9058_v62 = vld [vmem:[%s12984_s1 + $0x650] ss:$40 sps:$4 sm:$0xff]   ;;  %v9066_v63 = vld [vmem:[%s12984_s1 + $0x6a4] ss:$40 sps:$4 sm:$0xff]  }
 0x11f   :  { %5434 = vmatpush1.bf16.msra.mxu1 %v8977_v0  ;;  %v9061_v0 = vld [vmem:[%s12984_s1 + $0x1598] ss:$40 sps:$4 sm:$0xff]  }
 0x120   :  { %5540 = vmatpush1.bf16.msra.mxu0 %v8980_v1  ;;  %5435 = vmatprep.subr.bf16.mxu1 %v8985_v2  ;;  %v9064_v1 = vld [vmem:[%s12984_s1 + $0x6a0] ss:$40 sps:$4 sm:$0xff]   ;;  %v9069_v2 = vld [vmem:[%s12984_s1 + $0x15ec] ss:$40 sps:$4 sm:$0xff]  }
 0x121   :  { %5541 = vmatprep.subr.bf16.mxu0 %v8988_v3  ;;  %v9072_v3 = vld [vmem:[%s12984_s1 + $0x6f4] ss:$40 sps:$4 sm:$0xff]  }
 0x123   :  { %5436 = vmatpush1.bf16.msra.mxu1 %v8983_v4  ;;  %v9067_v4 = vld [vmem:[%s12984_s1 + $0x15e8] ss:$40 sps:$4 sm:$0xff]  }
 0x124   :  { %5542 = vmatpush1.bf16.msra.mxu0 %v8986_v5  ;;  %5437 = vmatprep.subr.bf16.mxu1 %v8991_v8  ;;  %v9070_v5 = vld [vmem:[%s12984_s1 + $0x6f0] ss:$40 sps:$4 sm:$0xff]   ;;  %v9075_v8 = vld [vmem:[%s12984_s1 + $0x163c] ss:$40 sps:$4 sm:$0xff]  }
 0x125   :  { %5543 = vmatprep.subr.bf16.mxu0 %v8994_v9  ;;  %v9078_v9 = vld [vmem:[%s12984_s1 + $0x744] ss:$40 sps:$4 sm:$0xff]  }
 0x127   :  { %5438 = vmatpush1.bf16.msra.mxu1 %v8989_v10  ;;  %v9073_v10 = vld [vmem:[%s12984_s1 + $0x1638] ss:$40 sps:$4 sm:$0xff]  }
 0x128   :  { %5544 = vmatpush1.bf16.msra.mxu0 %v8992_v11  ;;  %5439 = vmatprep.subr.bf16.mxu1 %v8997_v12  ;;  %v9076_v11 = vld [vmem:[%s12984_s1 + $0x740] ss:$40 sps:$4 sm:$0xff]   ;;  %v11118_v12 = vpop.f32.mrb[4].mxu1 }
 0x129   :  { %5545 = vmatprep.subr.bf16.mxu0 %v9000_v13  ;;  %v9081_v13 = vld [vmem:[%s12984_s1 + $0x168c] ss:$40 sps:$4 sm:$0xff]  }
 0x12b   :  { %5440 = vmatpush1.bf16.msra.mxu1 %v8995_v14  ;;  %v9084_v14 = vld [vmem:[%s12984_s1 + $0x794] ss:$40 sps:$4 sm:$0xff]  }
 0x12c   :  { %5546 = vmatpush1.bf16.msra.mxu0 %v8998_v15  ;;  %5441 = vmatprep.subr.bf16.mxu1 %v9003_v17  ;;  %v11126_v15 = vpop.f32.mrb[5].mxu1  ;;  %v9079_v17 = vld [vmem:[%s12984_s1 + $0x1688] ss:$40 sps:$4 sm:$0xff]  }
 0x12d   :  { %5547 = vmatprep.subr.bf16.mxu0 %v9006_v18  ;;  %v9082_v18 = vld [vmem:[%s12984_s1 + $0x790] ss:$40 sps:$4 sm:$0xff]  }
 0x12f   :  { %5442 = vmatpush1.bf16.msra.mxu1 %v9001_v20  ;;  %v11134_v20 = vpop.f32.mrb[6].mxu1 }
 0x130   :  { %5548 = vmatpush1.bf16.msra.mxu0 %v9004_v21  ;;  %5443 = vmatprep.subr.bf16.mxu1 %v9009_v22  ;;  %v11136_v21 = vpop.f32.mrb[7].mxu1  ;;  %v9087_v22 = vld [vmem:[%s12984_s1 + $0x16dc] ss:$40 sps:$4 sm:$0xff]  }
 0x131   :  { %5549 = vmatprep.subr.bf16.mxu0 %v9012_v6  ;;  %v9090_v6 = vld [vmem:[%s12984_s1 + $0x7e4] ss:$40 sps:$4 sm:$0xff]  }
 0x133   :  { %5444 = vmatpush1.bf16.msra.mxu1 %v9007_v23  ;;  %v9085_v23 = vld [vmem:[%s12984_s1 + $0x16d8] ss:$40 sps:$4 sm:$0xff]  }
 0x134   :  { %5550 = vmatpush1.bf16.msra.mxu0 %v9010_v24  ;;  %5445 = vmatprep.subr.bf16.mxu1 %v9015_v27  ;;  %v9088_v24 = vld [vmem:[%s12984_s1 + $0x7e0] ss:$40 sps:$4 sm:$0xff]   ;;  %v9093_v27 = vld [vmem:[%s12984_s1 + $0x172c] ss:$40 sps:$4 sm:$0xff]  }
 0x135   :  { %5551 = vmatprep.subr.bf16.mxu0 %v9018_v30  ;;  %v9096_v30 = vld [vmem:[%s12984_s1 + $0x834] ss:$40 sps:$4 sm:$0xff]  }
 0x137   :  { %5446 = vmatpush1.bf16.msra.mxu1 %v9013_v32  ;;  %v9091_v32 = vld [vmem:[%s12984_s1 + $0x1728] ss:$40 sps:$4 sm:$0xff]  }
 0x138   :  { %5552 = vmatpush1.bf16.msra.mxu0 %v9016_v33  ;;  %5447 = vmatprep.subr.bf16.mxu1 %v9021_v7  ;;  %v9094_v33 = vld [vmem:[%s12984_s1 + $0x830] ss:$40 sps:$4 sm:$0xff]   ;;  %v9099_v7 = vld [vmem:[%s12984_s1 + $0x177c] ss:$40 sps:$4 sm:$0xff]  }
 0x139   :  { %5553 = vmatprep.subr.bf16.mxu0 %v9024_v36  ;;  %v9102_v36 = vld [vmem:[%s12984_s1 + $0x884] ss:$40 sps:$4 sm:$0xff]  }
 0x13b   :  { %5448 = vmatpush1.bf16.msra.mxu1 %v9019_v41  ;;  %v9097_v41 = vld [vmem:[%s12984_s1 + $0x1778] ss:$40 sps:$4 sm:$0xff]  }
 0x13c   :  { %5554 = vmatpush1.bf16.msra.mxu0 %v9022_v42  ;;  %5449 = vmatprep.subr.bf16.mxu1 %v9027_v43  ;;  %v9100_v42 = vld [vmem:[%s12984_s1 + $0x880] ss:$40 sps:$4 sm:$0xff]   ;;  %v9105_v43 = vld [vmem:[%s12984_s1 + $0x17cc] ss:$40 sps:$4 sm:$0xff]  }
 0x13d   :  { %5555 = vmatprep.subr.bf16.mxu0 %v9030_v44  ;;  %v9108_v44 = vld [vmem:[%s12984_s1 + $0x8d4] ss:$40 sps:$4 sm:$0xff]  }
 0x13f   :  { %5450 = vmatpush1.bf16.msra.mxu1 %v9025_v35  ;;  %v9103_v35 = vld [vmem:[%s12984_s1 + $0x17c8] ss:$40 sps:$4 sm:$0xff]  }
 0x140   :  { %5556 = vmatpush1.bf16.msra.mxu0 %v9028_v16  ;;  %5472 = vmatprep.subr.bf16.mxu1 %v9033_v45  ;;  %v9106_v16 = vld [vmem:[%s12984_s1 + $0x8d0] ss:$40 sps:$4 sm:$0xff]   ;;  %v9111_v45 = vld [vmem:[%s12984_s1 + $0x181c] ss:$40 sps:$4 sm:$0xff]  }
 0x141   :  { %5578 = vmatprep.subr.bf16.mxu0 %v9036_v46  ;;  %v9114_v46 = vld [vmem:[%s12984_s1 + $0x924] ss:$40 sps:$4 sm:$0xff]  }
 0x142   :  { %5452 = vmatmul.mubr.bf16.vlgmr.msra.gmra.mrb[8].mxu1 %v10585_v26  ;;  %v9045_v26 = vld [vmem:[%s12984_s1 + $0x14ac] ss:$40 sps:$4 sm:$0xff]  }
 0x143   :  { %5558 = vmatmul.mubr.bf16.vlgmr.msra.gmra.mrb[8].mxu0 %v9832_v50  ;;  %5473 = vmatpush1.bf16.msra.mxu1 %v9031_v39  ;;  %v9109_v39 = vld [vmem:[%s12984_s1 + $0x1818] ss:$40 sps:$4 sm:$0xff]   ;;  %v9115_v50 = vld [vmem:[%s12984_s1 + $0x1868] ss:$40 sps:$4 sm:$0xff]  }
 0x144   :  { %5579 = vmatpush1.bf16.msra.mxu0 %v9034_v47  ;;  %5474 = vmatprep.subr.bf16.mxu1 %v9039_v19  ;;  %v9112_v47 = vld [vmem:[%s12984_s1 + $0x920] ss:$40 sps:$4 sm:$0xff]   ;;  %v9117_v19 = vld [vmem:[%s12984_s1 + $0x186c] ss:$40 sps:$4 sm:$0xff]  }
 0x145   :  { %5580 = vmatprep.subr.bf16.mxu0 %v9042_v48  ;;  %5461 = vmatprep.mubr.bf16.mxu1 %v10596_v31  ;;  %v9051_v31 = vld [vmem:[%s12984_s1 + $0x14fc] ss:$40 sps:$4 sm:$0xff]  }
 0x146   :  { %5567 = vmatprep.mubr.bf16.mxu0 %v9833_v25  ;;  %v9120_v48 = vld [vmem:[%s12984_s1 + $0x974] ss:$40 sps:$4 sm:$0xff]   ;;  %v9124_v25 = vld [vmem:[%s12984_s1 + $0x9c0] ss:$40 sps:$4 sm:$0xff]  }
 0x147   :  { %5475 = vmatpush1.bf16.msra.mxu1 %v9037_v51  ;;  %v9118_v51 = vld [vmem:[%s12984_s1 + $0x970] ss:$40 sps:$4 sm:$0xff]  }
 0x148   :  { %5581 = vmatpush1.bf16.msra.mxu0 %v9040_v52  ;;  %5476 = vmatprep.subr.bf16.mxu1 %v9045_v26  ;;  %v9123_v52 = vld [vmem:[%s12984_s1 + $0x18bc] ss:$40 sps:$4 sm:$0xff]  }
 0x149   :  { %5582 = vmatprep.subr.bf16.mxu0 %v9048_v53  ;;  %v9126_v26 = vld [vmem:[%s12984_s1 + $0x9c4] ss:$40 sps:$4 sm:$0xff]   ;;  %v9121_v53 = vld [vmem:[%s12984_s1 + $0x18b8] ss:$40 sps:$4 sm:$0xff]  }
 0x14a   :  { %5462 = vmatmul.mubr.bf16.gmra.mrb[12].mxu1 %v10623_v49  ;;  %v9057_v49 = vld [vmem:[%s12984_s1 + $0x154c] ss:$40 sps:$4 sm:$0xff]  }
 0x14b   :  { %5568 = vmatmul.mubr.bf16.gmra.mrb[12].mxu0 %v9834_v56  ;;  %5477 = vmatpush1.bf16.msra.mxu1 %v9043_v54  ;;  %v9129_v54 = vld [vmem:[%s12984_s1 + $0xa14] ss:$40 sps:$4 sm:$0xff]   ;;  %v9135_v56 = vld [vmem:[%s12984_s1 + $0xa64] ss:$40 sps:$4 sm:$0xff]  }
 0x14c   :  { %5583 = vmatpush1.bf16.msra.mxu0 %v9046_v55  ;;  %5478 = vmatprep.subr.bf16.mxu1 %v9051_v31  ;;  %v9132_v55 = vld [vmem:[%s12984_s1 + $0x1c] ss:$40 sps:$4 sm:$0xff]   ;;  %v9127_v31 = vld [vmem:[%s12984_s1 + $0xa10] ss:$40 sps:$4 sm:$0xff]  }
 0x14d   :  { %5584 = vmatprep.subr.bf16.mxu0 %v9054_v28  ;;  %5504 = vmatprep.mubr.bf16.mxu1 %v10634_v40  ;;  %v9063_v40 = vld [vmem:[%s12984_s1 + $0x159c] ss:$40 sps:$4 sm:$0xff]   ;;  %v9130_v28 = vld [vmem:[%s12984_s1 + $0x18] ss:$40 sps:$4 sm:$0xff]  }
 0x14e   :  { %5610 = vmatprep.mubr.bf16.mxu0 %v9835_v60  ;;  %v9136_v60 = vld [vmem:[%s12984_s1 + $0x68] ss:$40 sps:$4 sm:$0xff]  }
 0x14f   :  { %5479 = vmatpush1.bf16.msra.mxu1 %v9049_v57  ;;  %v9138_v57 = vld [vmem:[%s12984_s1 + $0x6c] ss:$40 sps:$4 sm:$0xff]  }
 0x150   :  { %5585 = vmatpush1.bf16.msra.mxu0 %v9052_v58  ;;  %5480 = vmatprep.subr.bf16.mxu1 %v9057_v49  ;;  %v9836_v58 = vld [vmem:[%s12985_s0 + $0x20] ss:$40 sps:$4 sm:$0xff]  }
 0x151   :  { %5586 = vmatprep.subr.bf16.mxu0 %v9060_v59  ;;  %v9837_v49 = vld [vmem:[%s12985_s0 + $0x8] ss:$40 sps:$4 sm:$0xff]  }
 0x152   :  { %v9133_v59 = vld [vmem:[%s12984_s1 + $0xa60] ss:$40 sps:$4 sm:$0xff]  }
 0x153   :  { %5481 = vmatpush1.bf16.msra.mxu1 %v9055_v61  ;;  %v9141_v61 = vld [vmem:[%s12984_s1 + $0xab4] ss:$40 sps:$4 sm:$0xff]  }
 0x154   :  { %5587 = vmatpush1.bf16.msra.mxu0 %v9058_v62  ;;  %5482 = vmatprep.subr.bf16.mxu1 %v9063_v40  ;;  %v9144_v62 = vld [vmem:[%s12984_s1 + $0xbc] ss:$40 sps:$4 sm:$0xff]  }
 0x155   :  { %5588 = vmatprep.subr.bf16.mxu0 %v9066_v63  ;;  %v9838_v40 = vld [vmem:[%s12985_s0 + $0x74] ss:$40 sps:$4 sm:$0xff]  }
 0x156   :  { %v11264_v63 = vld [vmem:[%s12985_s0 + $0x5c] ss:$40 sps:$4 sm:$0xff]  }
 0x157   :  { %5483 = vmatpush1.bf16.msra.mxu1 %v9061_v0  ;;  %v9139_v0 = vld [vmem:[%s12984_s1 + $0xab0] ss:$40 sps:$4 sm:$0xff]  }
 0x158   :  { %5589 = vmatpush1.bf16.msra.mxu0 %v9064_v1  ;;  %5484 = vmatprep.subr.bf16.mxu1 %v9069_v2  ;;  %v9142_v1 = vld [vmem:[%s12984_s1 + $0xb8] ss:$40 sps:$4 sm:$0xff]   ;;  %v9147_v2 = vld [vmem:[%s12984_s1 + $0xb04] ss:$40 sps:$4 sm:$0xff]  }
 0x159   :  { %5590 = vmatprep.subr.bf16.mxu0 %v9072_v3  ;;  %v9150_v3 = vld [vmem:[%s12984_s1 + $0x10c] ss:$40 sps:$4 sm:$0xff]  }
 0x15b   :  { %5485 = vmatpush1.bf16.msra.mxu1 %v9067_v4  ;;  %v9840_v4 = vld [vmem:[%s12985_s0 + $0x70] ss:$40 sps:$4 sm:$0xff]  }
 0x15c   :  { %5591 = vmatpush1.bf16.msra.mxu0 %v9070_v5  ;;  %5486 = vmatprep.subr.bf16.mxu1 %v9075_v8  ;;  %v11285_v5 = vld [vmem:[%s12985_s0 + $0x58] ss:$40 sps:$4 sm:$0xff]  }
 0x15d   :  { %5592 = vmatprep.subr.bf16.mxu0 %v9078_v9  ;;  %v9145_v8 = vld [vmem:[%s12984_s1 + $0xb00] ss:$40 sps:$4 sm:$0xff]  }
 0x15e   :  { %v9148_v9 = vld [vmem:[%s12984_s1 + $0x108] ss:$40 sps:$4 sm:$0xff]  }
 0x15f   :  { %5487 = vmatpush1.bf16.msra.mxu1 %v9073_v10  ;;  %v9153_v10 = vld [vmem:[%s12984_s1 + $0xb54] ss:$40 sps:$4 sm:$0xff]  }
 0x160   :  { %5593 = vmatpush1.bf16.msra.mxu0 %v9076_v11  ;;  %5488 = vmatprep.subr.bf16.mxu1 %v9081_v13  ;;  %v9156_v11 = vld [vmem:[%s12984_s1 + $0x15c] ss:$40 sps:$4 sm:$0xff]  }
 0x161   :  { %5594 = vmatprep.subr.bf16.mxu0 %v9084_v14  ;;  %v11303_v13 = vld [vmem:[%s12985_s0 + $0x14] ss:$40 sps:$4 sm:$0xff]   ;;  %v9843_v14 = vld [vmem:[%s12985_s0 + $0x4] ss:$40 sps:$4 sm:$0xff]  }
 0x163   :  { %5489 = vmatpush1.bf16.msra.mxu1 %v9079_v17  ;;  %v9151_v17 = vld [vmem:[%s12984_s1 + $0xb50] ss:$40 sps:$4 sm:$0xff]  }
 0x164   :  { %5595 = vmatpush1.bf16.msra.mxu0 %v9082_v18  ;;  %5490 = vmatprep.subr.bf16.mxu1 %v9087_v22  ;;  %v9154_v18 = vld [vmem:[%s12984_s1 + $0x158] ss:$40 sps:$4 sm:$0xff]   ;;  %v9159_v22 = vld [vmem:[%s12984_s1 + $0xba4] ss:$40 sps:$4 sm:$0xff]  }
 0x165   :  { %5596 = vmatprep.subr.bf16.mxu0 %v9090_v6  ;;  %v9162_v6 = vld [vmem:[%s12984_s1 + $0x1ac] ss:$40 sps:$4 sm:$0xff]  }
 0x167   :  { %5491 = vmatpush1.bf16.msra.mxu1 %v9085_v23  ;;  %v9157_v23 = vld [vmem:[%s12984_s1 + $0xba0] ss:$40 sps:$4 sm:$0xff]  }
 0x168   :  { %5597 = vmatpush1.bf16.msra.mxu0 %v9088_v24  ;;  %5492 = vmatprep.subr.bf16.mxu1 %v9093_v27  ;;  %v9160_v24 = vld [vmem:[%s12984_s1 + $0x1a8] ss:$40 sps:$4 sm:$0xff]   ;;  %v9165_v27 = vld [vmem:[%s12984_s1 + $0xbf4] ss:$40 sps:$4 sm:$0xff]  }
 0x169   :  { %5598 = vmatprep.subr.bf16.mxu0 %v9096_v30  ;;  %v9168_v30 = vld [vmem:[%s12984_s1 + $0x1fc] ss:$40 sps:$4 sm:$0xff]  }
 0x16b   :  { %5493 = vmatpush1.bf16.msra.mxu1 %v9091_v32  ;;  %v9163_v32 = vld [vmem:[%s12984_s1 + $0xbf0] ss:$40 sps:$4 sm:$0xff]  }
 0x16c   :  { %5599 = vmatpush1.bf16.msra.mxu0 %v9094_v33  ;;  %5494 = vmatprep.subr.bf16.mxu1 %v9099_v7  ;;  %v9166_v33 = vld [vmem:[%s12984_s1 + $0x1f8] ss:$40 sps:$4 sm:$0xff]   ;;  %v9171_v7 = vld [vmem:[%s12984_s1 + $0xc44] ss:$40 sps:$4 sm:$0xff]  }
 0x16d   :  { %5600 = vmatprep.subr.bf16.mxu0 %v9102_v36  ;;  %v9174_v36 = vld [vmem:[%s12984_s1 + $0x24c] ss:$40 sps:$4 sm:$0xff]  }
 0x16f   :  { %5495 = vmatpush1.bf16.msra.mxu1 %v9097_v41  ;;  %v9169_v41 = vld [vmem:[%s12984_s1 + $0xc40] ss:$40 sps:$4 sm:$0xff]  }
 0x170   :  { %5601 = vmatpush1.bf16.msra.mxu0 %v9100_v42  ;;  %5496 = vmatprep.subr.bf16.mxu1 %v9105_v43  ;;  %v9172_v42 = vld [vmem:[%s12984_s1 + $0x248] ss:$40 sps:$4 sm:$0xff]   ;;  %v9177_v43 = vld [vmem:[%s12984_s1 + $0xc94] ss:$40 sps:$4 sm:$0xff]  }
 0x171   :  { %5602 = vmatprep.subr.bf16.mxu0 %v9108_v44  ;;  %v9180_v44 = vld [vmem:[%s12984_s1 + $0x29c] ss:$40 sps:$4 sm:$0xff]  }
 0x173   :  { %5497 = vmatpush1.bf16.msra.mxu1 %v9103_v35  ;;  %v9175_v35 = vld [vmem:[%s12984_s1 + $0xc90] ss:$40 sps:$4 sm:$0xff]  }
 0x174   :  { %5603 = vmatpush1.bf16.msra.mxu0 %v9106_v16  ;;  %5498 = vmatprep.subr.bf16.mxu1 %v9111_v45  ;;  %v9178_v16 = vld [vmem:[%s12984_s1 + $0x298] ss:$40 sps:$4 sm:$0xff]   ;;  %v9183_v45 = vld [vmem:[%s12984_s1 + $0xce4] ss:$40 sps:$4 sm:$0xff]  }
 0x175   :  { %5604 = vmatprep.subr.bf16.mxu0 %v9114_v46  ;;  %v9186_v46 = vld [vmem:[%s12984_s1 + $0x2ec] ss:$40 sps:$4 sm:$0xff]  }
 0x177   :  { %5499 = vmatpush1.bf16.msra.mxu1 %v9109_v39  ;;  %v9181_v39 = vld [vmem:[%s12984_s1 + $0xce0] ss:$40 sps:$4 sm:$0xff]  }
 0x178   :  { %5605 = vmatpush1.bf16.msra.mxu0 %v9112_v47  ;;  %5500 = vmatprep.subr.bf16.mxu1 %v9117_v19  ;;  %v9184_v47 = vld [vmem:[%s12984_s1 + $0x2e8] ss:$40 sps:$4 sm:$0xff]   ;;  %v9189_v19 = vld [vmem:[%s12984_s1 + $0xd34] ss:$40 sps:$4 sm:$0xff]  }
 0x179   :  { %5606 = vmatprep.subr.bf16.mxu0 %v9120_v48  ;;  %v9192_v48 = vld [vmem:[%s12984_s1 + $0x33c] ss:$40 sps:$4 sm:$0xff]  }
 0x17b   :  { %5501 = vmatpush1.bf16.msra.mxu1 %v9115_v50  ;;  %v9187_v50 = vld [vmem:[%s12984_s1 + $0xd30] ss:$40 sps:$4 sm:$0xff]  }
 0x17c   :  { %5607 = vmatpush1.bf16.msra.mxu0 %v9118_v51  ;;  %5502 = vmatprep.subr.bf16.mxu1 %v9123_v52  ;;  %v9190_v51 = vld [vmem:[%s12984_s1 + $0x338] ss:$40 sps:$4 sm:$0xff]   ;;  %v9195_v52 = vld [vmem:[%s12984_s1 + $0xd84] ss:$40 sps:$4 sm:$0xff]  }
 0x17d   :  { %5608 = vmatprep.subr.bf16.mxu0 %v9126_v26  ;;  %v9198_v26 = vld [vmem:[%s12984_s1 + $0x38c] ss:$40 sps:$4 sm:$0xff]  }
 0x17f   :  { %5503 = vmatpush1.bf16.msra.mxu1 %v9121_v53  ;;  %v9193_v53 = vld [vmem:[%s12984_s1 + $0xd80] ss:$40 sps:$4 sm:$0xff]  }
 0x180   :  { %5609 = vmatpush1.bf16.msra.mxu0 %v9124_v25  ;;  %5790 = vmatprep.subr.bf16.mxu1 %v9132_v55  ;;  %v9196_v25 = vld [vmem:[%s12984_s1 + $0x388] ss:$40 sps:$4 sm:$0xff]   ;;  %v9204_v55 = vld [vmem:[%s12984_s1 + $0x3dc] ss:$40 sps:$4 sm:$0xff]  }
 0x181   :  { %5631 = vmatprep.subr.bf16.mxu0 %v9129_v54  ;;  %v9201_v54 = vld [vmem:[%s12984_s1 + $0xdd4] ss:$40 sps:$4 sm:$0xff]  }
 0x182   :  { %5505 = vmatmul.mubr.bf16.vlgmr.msra.gmra.mrb[8].mxu1 %v9836_v58  ;;  %v9205_v58 = vld [vmem:[%s12984_s1 + $0xe20] ss:$40 sps:$4 sm:$0xff]  }
 0x183   :  { %5611 = vmatmul.mubr.bf16.vlgmr.msra.gmra.mrb[8].mxu0 %v9837_v49  ;;  %5791 = vmatpush1.bf16.msra.mxu1 %v9130_v28  ;;  %v9202_v28 = vld [vmem:[%s12984_s1 + $0x3d8] ss:$40 sps:$4 sm:$0xff]   ;;  %v9208_v49 = vld [vmem:[%s12984_s1 + $0x428] ss:$40 sps:$4 sm:$0xff]  }
 0x184   :  { %5632 = vmatpush1.bf16.msra.mxu0 %v9127_v31  ;;  %5792 = vmatprep.subr.bf16.mxu1 %v9138_v57  ;;  %v9199_v31 = vld [vmem:[%s12984_s1 + $0xdd0] ss:$40 sps:$4 sm:$0xff]   ;;  %v9210_v57 = vld [vmem:[%s12984_s1 + $0x42c] ss:$40 sps:$4 sm:$0xff]  }
 0x185   :  { %5633 = vmatprep.subr.bf16.mxu0 %v9135_v56  ;;  %5514 = vmatprep.mubr.bf16.mxu1 %v9838_v40  ;;  %v9207_v56 = vld [vmem:[%s12984_s1 + $0xe24] ss:$40 sps:$4 sm:$0xff]  }
 0x186   :  { %5620 = vmatprep.mubr.bf16.mxu0 %v11264_v63  ;;  %v9219_v40 = vld [vmem:[%s12984_s1 + $0xec4] ss:$40 sps:$4 sm:$0xff]  }
 0x187   :  { %5793 = vmatpush1.bf16.msra.mxu1 %v9136_v60  ;;  %v9216_v60 = vld [vmem:[%s12984_s1 + $0x47c] ss:$40 sps:$4 sm:$0xff]  }
 0x188   :  { %5634 = vmatpush1.bf16.msra.mxu0 %v9133_v59  ;;  %5794 = vmatprep.subr.bf16.mxu1 %v9144_v62  ;;  %v9213_v59 = vld [vmem:[%s12984_s1 + $0xe74] ss:$40 sps:$4 sm:$0xff]   ;;  %v9214_v62 = vld [vmem:[%s12984_s1 + $0x478] ss:$40 sps:$4 sm:$0xff]  }
 0x189   :  { %5635 = vmatprep.subr.bf16.mxu0 %v9141_v61  ;;  %v9211_v61 = vld [vmem:[%s12984_s1 + $0xe70] ss:$40 sps:$4 sm:$0xff]  }
 0x18a   :  { %5515 = vmatmul.mubr.bf16.gmra.mrb[12].mxu1 %v9840_v4  ;;  %v9228_v4 = vld [vmem:[%s12984_s1 + $0x51c] ss:$40 sps:$4 sm:$0xff]  }
 0x18b   :  { %5621 = vmatmul.mubr.bf16.gmra.mrb[12].mxu0 %v11285_v5  ;;  %5795 = vmatpush1.bf16.msra.mxu1 %v9142_v1  ;;  %v9217_v1 = vld [vmem:[%s12984_s1 + $0xec0] ss:$40 sps:$4 sm:$0xff]  }
 0x18c   :  { %5636 = vmatpush1.bf16.msra.mxu0 %v9139_v0  ;;  %5796 = vmatprep.subr.bf16.mxu1 %v9150_v3  ;;  %v9222_v0 = vld [vmem:[%s12984_s1 + $0x4cc] ss:$40 sps:$4 sm:$0xff]  }
 0x18d   :  { %5637 = vmatprep.subr.bf16.mxu0 %v9147_v2  ;;  %5663 = vmatprep.mubr.bf16.mxu0 %v11303_v13  ;;  %v9220_v2 = vld [vmem:[%s12984_s1 + $0x4c8] ss:$40 sps:$4 sm:$0xff]   ;;  %v9225_v3 = vld [vmem:[%s12984_s1 + $0xf14] ss:$40 sps:$4 sm:$0xff]  }
 0x18e   :  { %5822 = vmatprep.mubr.bf16.mxu1 %v9843_v14  ;;  %v11468_v14 = vld [vmem:[%s12985_s0 + $0x10] ss:$40 sps:$4 sm:$0xff]  }
 0x18f   :  { %5797 = vmatpush1.bf16.msra.mxu1 %v9148_v9  ;;  %v9226_v9 = vld [vmem:[%s12984_s1 + $0x518] ss:$40 sps:$4 sm:$0xff]  }
 0x190   :  { %5638 = vmatpush1.bf16.msra.mxu0 %v9145_v8  ;;  %5798 = vmatprep.subr.bf16.mxu1 %v9156_v11  ;;  %v9223_v8 = vld [vmem:[%s12984_s1 + $0xf10] ss:$40 sps:$4 sm:$0xff]   ;;  %v9234_v11 = vld [vmem:[%s12984_s1 + $0x56c] ss:$40 sps:$4 sm:$0xff]  }
 0x191   :  { %5639 = vmatprep.subr.bf16.mxu0 %v9153_v10  ;;  %v9231_v10 = vld [vmem:[%s12984_s1 + $0xf64] ss:$40 sps:$4 sm:$0xff]  }
 0x193   :  { %5799 = vmatpush1.bf16.msra.mxu1 %v9154_v18  ;;  %v9229_v18 = vld [vmem:[%s12984_s1 + $0xf60] ss:$40 sps:$4 sm:$0xff]  }
 0x194   :  { %5640 = vmatpush1.bf16.msra.mxu0 %v9151_v17  ;;  %5800 = vmatprep.subr.bf16.mxu1 %v9162_v6  ;;  %v9845_v17 = vld [vmem:[%s12985_s0] ss:$40 sps:$4 sm:$0xff]   ;;  %v845_v6 = vlaneseq }
 0x195   :  { %5641 = vmatprep.subr.bf16.mxu0 %v9159_v22  ;;  %v9232_v22 = vld [vmem:[%s12984_s1 + $0x568] ss:$40 sps:$4 sm:$0xff]  }
 0x197   :  { %5801 = vmatpush1.bf16.msra.mxu1 %v9160_v24  ;;  %v9240_v24 = vld [vmem:[%s12984_s1 + $0x5bc] ss:$40 sps:$4 sm:$0xff]  }
 0x198   :  { %5642 = vmatpush1.bf16.msra.mxu0 %v9157_v23  ;;  %5802 = vmatprep.subr.bf16.mxu1 %v9168_v30  ;;  %v9237_v23 = vld [vmem:[%s12984_s1 + $0xfb4] ss:$40 sps:$4 sm:$0xff]   ;;  %v9238_v30 = vld [vmem:[%s12984_s1 + $0x5b8] ss:$40 sps:$4 sm:$0xff]  }
 0x199   :  { %5643 = vmatprep.subr.bf16.mxu0 %v9165_v27  ;;  %v9235_v27 = vld [vmem:[%s12984_s1 + $0xfb0] ss:$40 sps:$4 sm:$0xff]  }
 0x19b   :  { %5803 = vmatpush1.bf16.msra.mxu1 %v9166_v33  ;;  %v9847_v33 = vld [vmem:[%s12985_s0 + $0x54] ss:$40 sps:$4 sm:$0xff]  }
 0x19c   :  { %5644 = vmatpush1.bf16.msra.mxu0 %v9163_v32  ;;  %5804 = vmatprep.subr.bf16.mxu1 %v9174_v36  ;;  %v11495_v32 = vld [vmem:[%s12985_s0 + $0x64] ss:$40 sps:$4 sm:$0xff]  }
 0x19d   :  { %5645 = vmatprep.subr.bf16.mxu0 %v9171_v7  ;;  %v11501_v7 = vshrl.u32 %v845_v6, 7  ;;  %v9243_v36 = vld [vmem:[%s12984_s1 + $0x1004] ss:$40 sps:$4 sm:$0xff]  }
 0x19f   :  { %5805 = vmatpush1.bf16.msra.mxu1 %v9172_v42  ;;  %v11512_v42 = vld [vmem:[%s12985_s0 + $0x60] ss:$40 sps:$4 sm:$0xff]  }
 0x1a0   :  { %5646 = vmatpush1.bf16.msra.mxu0 %v9169_v41  ;;  %5806 = vmatprep.subr.bf16.mxu1 %v9180_v44  ;;  %v9246_v41 = vld [vmem:[%s12984_s1 + $0x60c] ss:$40 sps:$4 sm:$0xff]   ;;  %v11521_v44 = vld [vmem:[%s12986_s2] sm:$0xff] }
 0x1a1   :  { %5647 = vmatprep.subr.bf16.mxu0 %v9177_v43  ;;  %v9849_v43 = vld [vmem:[%s12985_s0 + $0x50] ss:$40 sps:$4 sm:$0xff]  }
 0x1a3   :  { %5807 = vmatpush1.bf16.msra.mxu1 %v9178_v16  ;;  %v9244_v16 = vld [vmem:[%s12984_s1 + $0x608] ss:$40 sps:$4 sm:$0xff]  }
 0x1a4   :  { %5648 = vmatpush1.bf16.msra.mxu0 %v9175_v35  ;;  %5808 = vmatprep.subr.bf16.mxu1 %v9186_v46  ;;  %v9241_v35 = vld [vmem:[%s12984_s1 + $0x1000] ss:$40 sps:$4 sm:$0xff]   ;;  %v9249_v46 = vld [vmem:[%s12984_s1 + $0x1054] ss:$40 sps:$4 sm:$0xff]  }
 0x1a5   :  { %5649 = vmatprep.subr.bf16.mxu0 %v9183_v45  ;;  %v847_v45 = vsub.s32 0, %v11501_v7 }
 0x1a7   :  { %5809 = vmatpush1.bf16.msra.mxu1 %v9184_v47  ;;  %v851_v47 = vsub.s32 1, %v11501_v7 }
 0x1a8   :  { %5650 = vmatpush1.bf16.msra.mxu0 %v9181_v39  ;;  %5810 = vmatprep.subr.bf16.mxu1 %v9192_v48  ;;  %v9252_v39 = vld [vmem:[%s12984_s1 + $0x65c] ss:$40 sps:$4 sm:$0xff]   ;;  %v9851_v48 = vld [vmem:[%s12985_s0 + $0xc] ss:$40 sps:$4 sm:$0xff]  }
 0x1a9   :  { %5651 = vmatprep.subr.bf16.mxu0 %v9189_v19  ;;  %v11540_v19 = vld [vmem:[%s12985_s0 + $0x1c] ss:$40 sps:$4 sm:$0xff]  }
 0x1ab   :  { %5811 = vmatpush1.bf16.msra.mxu1 %v9190_v51  ;;  %v9250_v51 = vld [vmem:[%s12984_s1 + $0x658] ss:$40 sps:$4 sm:$0xff]  }
 0x1ac   :  { %5652 = vmatpush1.bf16.msra.mxu0 %v9187_v50  ;;  %5812 = vmatprep.subr.bf16.mxu1 %v9198_v26  ;;  %v9247_v50 = vld [vmem:[%s12984_s1 + $0x1050] ss:$40 sps:$4 sm:$0xff]   ;;  %v9255_v26 = vld [vmem:[%s12984_s1 + $0x10a4] ss:$40 sps:$4 sm:$0xff]  }
 0x1ad   :  { %5653 = vmatprep.subr.bf16.mxu0 %v9195_v52  ;;  %v848_v52 = vrot.slane %v11521_v44, %v847_v45 }
 0x1af   :  { %5813 = vmatpush1.bf16.msra.mxu1 %v9196_v25  ;;  %v852_v25 = vrot.slane %v11521_v44, %v851_v47  ;;  %v5044_v6 = vadd.f32 %v11134_v20, %v848_v52  ;;  %v9274_v20 = vld [vmem:[%s12984_s1 + $0x798] ss:$40 sps:$4 sm:$0xff]  }
 0x1b0   :  { %5654 = vmatpush1.bf16.msra.mxu0 %v9193_v53  ;;  %5814 = vmatprep.subr.bf16.mxu1 %v9204_v55  ;;  %v9258_v53 = vld [vmem:[%s12984_s1 + $0x6ac] ss:$40 sps:$4 sm:$0xff]   ;;  %v9256_v55 = vld [vmem:[%s12984_s1 + $0x6a8] ss:$40 sps:$4 sm:$0xff]  }
 0x1b1   :  { %5655 = vmatprep.subr.bf16.mxu0 %v9201_v54  ;;  %v9253_v54 = vld [vmem:[%s12984_s1 + $0x10a0] ss:$40 sps:$4 sm:$0xff]  }
 0x1b3   :  { %5815 = vmatpush1.bf16.msra.mxu1 %v9202_v28  ;;  %v9261_v28 = vld [vmem:[%s12984_s1 + $0x10f4] ss:$40 sps:$4 sm:$0xff]  }
 0x1b4   :  { %5656 = vmatpush1.bf16.msra.mxu0 %v9199_v31  ;;  %5816 = vmatprep.subr.bf16.mxu1 %v9210_v57  ;;  %v5030_v31 = vadd.f32 %v10974_v34, %v848_v52  ;;  %v5032_v57 = vadd.f32 %v10982_v37, %v852_v25  ;;  %v9262_v34 = vld [vmem:[%s12984_s1 + $0x6f8] ss:$40 sps:$4 sm:$0xff]  }
 0x1b5   :  { %5657 = vmatprep.subr.bf16.mxu0 %v9207_v56  ;;  %v9264_v56 = vld [vmem:[%s12984_s1 + $0x6fc] ss:$40 sps:$4 sm:$0xff]  }
 0x1b7   :  { %5817 = vmatpush1.bf16.msra.mxu1 %v9208_v49  ;;  %v9259_v49 = vld [vmem:[%s12984_s1 + $0x10f0] ss:$40 sps:$4 sm:$0xff]  }
 0x1b8   :  { %5658 = vmatpush1.bf16.msra.mxu0 %v9205_v58  ;;  %5818 = vmatprep.subr.bf16.mxu1 %v9216_v60 }
 0x1b9   :  { %5659 = vmatprep.subr.bf16.mxu0 %v9213_v59  ;;  %v5034_v59 = vadd.f32 %v10984_v38, %v848_v52  ;;  %v9270_v38 = vld [vmem:[%s12984_s1 + $0x74c] ss:$40 sps:$4 sm:$0xff]  }
 0x1bb   :  { %5819 = vmatpush1.bf16.msra.mxu1 %v9214_v62  ;;  %v5036_v62 = vadd.f32 %v10986_v29, %v852_v25  ;;  %v9265_v29 = vld [vmem:[%s12984_s1 + $0x1140] ss:$40 sps:$4 sm:$0xff]  }
 0x1bc   :  { %5660 = vmatpush1.bf16.msra.mxu0 %v9211_v61  ;;  %5820 = vmatprep.subr.bf16.mxu1 %v9222_v0 }
 0x1bd   :  { %5661 = vmatprep.subr.bf16.mxu0 %v9219_v40 }
 0x1bf   :  { %5821 = vmatpush1.bf16.msra.mxu1 %v9220_v2  ;;  %v9267_v2 = vld [vmem:[%s12984_s1 + $0x1144] ss:$40 sps:$4 sm:$0xff]  }
 0x1c0   :  { %5662 = vmatpush1.bf16.msra.mxu0 %v9217_v1  ;;  %5843 = vmatprep.subr.bf16.mxu1 %v9228_v4  ;;  %v9268_v4 = vld [vmem:[%s12984_s1 + $0x748] ss:$40 sps:$4 sm:$0xff]  }
 0x1c1   :  { %5684 = vmatprep.subr.bf16.mxu0 %v9225_v3 }
 0x1c2   :  { %5823 = vmatmul.mubr.bf16.vlgmr.msra.gmra.mrb[16].mxu1 %v9845_v17 }
 0x1c3   :  { %5664 = vmatmul.mubr.bf16.vlgmr.msra.gmra.mrb[8].mxu0 %v11468_v14  ;;  %5844 = vmatpush1.bf16.msra.mxu1 %v9226_v9 }
 0x1c4   :  { %5685 = vmatpush1.bf16.msra.mxu0 %v9223_v8  ;;  %5845 = vmatprep.subr.bf16.mxu1 %v9234_v11 }
 0x1c5   :  { %5686 = vmatprep.subr.bf16.mxu0 %v9231_v10  ;;  %5673 = vmatprep.mubr.bf16.mxu0 %v11495_v32  ;;  %v5040_v10 = vadd.f32 %v11118_v12, %v848_v52  ;;  %v9276_v12 = vld [vmem:[%s12984_s1 + $0x79c] ss:$40 sps:$4 sm:$0xff]  }
 0x1c6   :  { %5832 = vmatprep.mubr.bf16.mxu1 %v9847_v33 }
 0x1c7   :  { %5846 = vmatpush1.bf16.msra.mxu1 %v9232_v22 }
 0x1c8   :  { %5687 = vmatpush1.bf16.msra.mxu0 %v9229_v18  ;;  %5847 = vmatprep.subr.bf16.mxu1 %v9240_v24  ;;  %v5042_v18 = vadd.f32 %v11126_v15, %v852_v25  ;;  %v9271_v15 = vld [vmem:[%s12984_s1 + $0x1190] ss:$40 sps:$4 sm:$0xff]  }
 0x1c9   :  { %5688 = vmatprep.subr.bf16.mxu0 %v9237_v23  ;;  %v9273_v23 = vld [vmem:[%s12984_s1 + $0x1194] ss:$40 sps:$4 sm:$0xff]  }
 0x1ca   :  { %5833 = vmatmul.mubr.bf16.gmra.mrb[20].mxu1 %v9849_v43 }
 0x1cb   :  { %5674 = vmatmul.mubr.bf16.gmra.mrb[12].mxu0 %v11512_v42  ;;  %5848 = vmatpush1.bf16.msra.mxu1 %v9238_v30  ;;  %v5046_v30 = vadd.f32 %v11136_v21, %v852_v25  ;;  %v9279_v21 = vld [vmem:[%s12984_s1 + $0x11e4] ss:$40 sps:$4 sm:$0xff]  }
 0x1cc   :  { %5689 = vmatpush1.bf16.msra.mxu0 %v9235_v27  ;;  %5849 = vmatprep.subr.bf16.mxu1 %v9246_v41 }
 0x1cd   :  { %5690 = vmatprep.subr.bf16.mxu0 %v9243_v36  ;;  %5716 = vmatprep.mubr.bf16.mxu0 %v11540_v19 }
 0x1ce   :  { %5875 = vmatprep.mubr.bf16.mxu1 %v9851_v48  ;;  %v9277_v48 = vld [vmem:[%s12984_s1 + $0x11e0] ss:$40 sps:$4 sm:$0xff]  }
 0x1cf   :  { %5850 = vmatpush1.bf16.msra.mxu1 %v9244_v16 }
 0x1d0   :  { %5691 = vmatpush1.bf16.msra.mxu0 %v9241_v35  ;;  %5851 = vmatprep.subr.bf16.mxu1 %v9252_v39 }
 0x1d1   :  { %5692 = vmatprep.subr.bf16.mxu0 %v9249_v46  ;;  %v9282_v46 = vld [vmem:[%s12984_s1 + $0x7ec] ss:$40 sps:$4 sm:$0xff]  }
 0x1d3   :  { %5852 = vmatpush1.bf16.msra.mxu1 %v9250_v51 }
 0x1d4   :  { %5693 = vmatpush1.bf16.msra.mxu0 %v9247_v50  ;;  %5853 = vmatprep.subr.bf16.mxu1 %v9258_v53  ;;  %v9280_v50 = vld [vmem:[%s12984_s1 + $0x7e8] ss:$40 sps:$4 sm:$0xff]  }
 0x1d5   :  { %5694 = vmatprep.subr.bf16.mxu0 %v9255_v26 }
 0x1d6   :  { %v5241_v58 = vpop.f32.mrb[0].mxu0 }
 0x1d7   :  { %v8322_v60 = vadd.f32 %v5241_v58, %v5030_v31  ;;  %v5243_v61 = vpop.f32.mrb[1].mxu0  ;;  %5854 = vmatpush1.bf16.msra.mxu1 %v9256_v55  ;;  %v9288_v55 = vld [vmem:[%s12984_s1 + $0x83c] ss:$40 sps:$4 sm:$0xff]   ;;  %v9294_v58 = vld [vmem:[%s12984_s1 + $0x88c] ss:$40 sps:$4 sm:$0xff]  }
 0x1d8   :  { %v8324_v40 = vadd.f32 %v5243_v61, %v5032_v57  ;;  %v5245_v0 = vpop.f32.mrb[2].mxu0  ;;  %5695 = vmatpush1.bf16.msra.mxu0 %v9253_v54  ;;  %5855 = vmatprep.subr.bf16.mxu1 %v9264_v56  ;;  %v9285_v54 = vld [vmem:[%s12984_s1 + $0x1234] ss:$40 sps:$4 sm:$0xff]   ;;  %v9286_v56 = vld [vmem:[%s12984_s1 + $0x838] ss:$40 sps:$4 sm:$0xff]  }
 0x1d9   :  { %v8326_v37 = vadd.f32 %v5245_v0, %v5034_v59  ;;  %v5247_v1 = vpop.f32.mrb[3].mxu0  ;;  %5696 = vmatprep.subr.bf16.mxu0 %v9261_v28  ;;  %v6320_v8 = vmax.f32 %v8322_v60, 0.0  ;;  %v9283_v28 = vld [vmem:[%s12984_s1 + $0x1230] ss:$40 sps:$4 sm:$0xff]   ;;  %v9291_v57 = vld [vmem:[%s12984_s1 + $0x1284] ss:$40 sps:$4 sm:$0xff]  }
 0x1da   :  { %v8328_v3 = vadd.f32 %v5247_v1, %v5036_v62  ;;  %v6321_v11 = vmax.f32 %v8324_v40, 0.0  ;;  %v9297_v59 = vld [vmem:[%s12984_s1 + $0x12d4] ss:$40 sps:$4 sm:$0xff]   ;;  %v9295_v61 = vld [vmem:[%s12984_s1 + $0x12d0] ss:$40 sps:$4 sm:$0xff]  }
 0x1db   :  { %v6330_v9 = vmax.f32 %v8326_v37, 0.0  ;;  %5856 = vmatpush1.bf16.msra.mxu1 %v9262_v34  ;;  %v9292_v34 = vld [vmem:[%s12984_s1 + $0x888] ss:$40 sps:$4 sm:$0xff]   ;;  %v9300_v60 = vld [vmem:[%s12984_s1 + $0x8dc] ss:$40 sps:$4 sm:$0xff]  }
 0x1dc   :  { %v6331_v17 = vmax.f32 %v8328_v3, 0.0  ;;  %5697 = vmatpush1.bf16.msra.mxu0 %v9259_v49  ;;  %5857 = vmatprep.subr.bf16.mxu1 %v9270_v38  ;;  %v9289_v49 = vld [vmem:[%s12984_s1 + $0x1280] ss:$40 sps:$4 sm:$0xff]   ;;  %v9303_v40 = vld [vmem:[%s12984_s1 + $0x1324] ss:$40 sps:$4 sm:$0xff]  }
 0x1dd   :  { %v11600_v22 = vpack.c.bf16 %v6330_v9, %v6320_v8  ;;  %5698 = vmatprep.subr.bf16.mxu0 %v9267_v2  ;;  %v9298_v62 = vld [vmem:[%s12984_s1 + $0x8d8] ss:$40 sps:$4 sm:$0xff]   ;;  %v9306_v0 = vld [vmem:[%s12984_s1 + $0x92c] ss:$40 sps:$4 sm:$0xff]   ;;  %v9304_v1 = vld [vmem:[%s12984_s1 + $0x928] ss:$40 sps:$4 sm:$0xff]  }
 0x1de   :  { %v11609_v24 = vpack.c.bf16 %v6331_v17, %v6321_v11  ;;  %v5251_v27 = vpop.f32.mrb[4].mxu0  ;;  %v9301_v37 = vld [vmem:[%s12984_s1 + $0x1320] ss:$40 sps:$4 sm:$0xff]   ;;  %v9309_v2 = vld [vmem:[%s12984_s1 + $0x1374] ss:$40 sps:$4 sm:$0xff]  }
 0x1df   :  { %v8330_v33 = vadd.f32 %v5251_v27, %v5040_v10  ;;  %v5253_v36 = vpop.f32.mrb[5].mxu0  ;;  %5858 = vmatpush1.bf16.msra.mxu1 %v9268_v4  ;;  %v9312_v38 = vld [vmem:[%s12984_s1 + $0x97c] ss:$40 sps:$4 sm:$0xff]   ;;  %v9307_v3 = vld [vmem:[%s12984_s1 + $0x1370] ss:$40 sps:$4 sm:$0xff]  }
 0x1e0   :  { %v8332_v41 = vadd.f32 %v5253_v36, %v5042_v18  ;;  %v5255_v43 = vpop.f32.mrb[6].mxu0  ;;  %5699 = vmatpush1.bf16.msra.mxu0 %v9265_v29  ;;  %5859 = vmatprep.subr.bf16.mxu1 %v9276_v12  ;;  %v9310_v29 = vld [vmem:[%s12984_s1 + $0x978] ss:$40 sps:$4 sm:$0xff]   ;;  %v9315_v4 = vld [vmem:[%s12984_s1 + $0x13c4] ss:$40 sps:$4 sm:$0xff]  }
 0x1e1   :  { %v8334_v35 = vadd.f32 %v5255_v43, %v5044_v6  ;;  %v5257_v16 = vpop.f32.mrb[7].mxu0  ;;  %5700 = vmatprep.subr.bf16.mxu0 %v9273_v23  ;;  %v6340_v51 = vmax.f32 %v8330_v33, 0.0  ;;  %v9318_v8 = vld [vmem:[%s12984_s1 + $0x9cc] ss:$40 sps:$4 sm:$0xff]   ;;  %v9313_v9 = vld [vmem:[%s12984_s1 + $0x13c0] ss:$40 sps:$4 sm:$0xff]  }
 0x1e2   :  { %v8336_v39 = vadd.f32 %v5257_v16, %v5046_v30  ;;  %v6341_v26 = vmax.f32 %v8332_v41, 0.0  ;;  %v9316_v10 = vld [vmem:[%s12984_s1 + $0x9c8] ss:$40 sps:$4 sm:$0xff]   ;;  %v9321_v11 = vld [vmem:[%s12984_s1 + $0x1414] ss:$40 sps:$4 sm:$0xff]  }
 0x1e3   :  { %v6350_v52 = vmax.f32 %v8334_v35, 0.0  ;;  %5860 = vmatpush1.bf16.msra.mxu1 %v9274_v20  ;;  %v9324_v17 = vld [vmem:[%s12984_s1 + $0xa1c] ss:$40 sps:$4 sm:$0xff]   ;;  %v9319_v18 = vld [vmem:[%s12984_s1 + $0x1410] ss:$40 sps:$4 sm:$0xff]  }
 0x1e4   :  { %v6351_v53 = vmax.f32 %v8336_v39, 0.0  ;;  %5701 = vmatpush1.bf16.msra.mxu0 %v9271_v15  ;;  %5861 = vmatprep.subr.bf16.mxu1 %v9282_v46  ;;  %v9322_v6 = vld [vmem:[%s12984_s1 + $0xa18] ss:$40 sps:$4 sm:$0xff]   ;;  %v9327_v23 = vld [vmem:[%s12984_s1 + $0x1464] ss:$40 sps:$4 sm:$0xff]  }
 0x1e5   :  { %v11630_v25 = vpack.c.bf16 %v6350_v52, %v6340_v51  ;;  %5702 = vmatprep.subr.bf16.mxu0 %v9279_v21  ;;  %v9330_v12 = vld [vmem:[%s12984_s1 + $0xa6c] ss:$40 sps:$4 sm:$0xff]   ;;  %v11727_v27 = vld [vmem:[%s12985_s0 + $0x18] ss:$40 sps:$4 sm:$0xff]   ;;  %v9853_v30 = vld [vmem:[%s12985_s0 + $0x8] ss:$40 sps:$4 sm:$0xff]  }
 0x1e6   :  { %v11638_v31 = vpack.c.bf16 %v6351_v53, %v6341_v26  ;;  %v9325_v15 = vld [vmem:[%s12984_s1 + $0x1460] ss:$40 sps:$4 sm:$0xff]   ;;  %v9333_v33 = vld [vmem:[%s12984_s1 + $0x14b4] ss:$40 sps:$4 sm:$0xff]   ;;  %v9331_v43 = vld [vmem:[%s12984_s1 + $0x14b0] ss:$40 sps:$4 sm:$0xff]  }
 0x1e7   :  { %5862 = vmatpush1.bf16.msra.mxu1 %v9280_v50  ;;  %v9328_v20 = vld [vmem:[%s12984_s1 + $0xa68] ss:$40 sps:$4 sm:$0xff]   ;;  %v9336_v36 = vld [vmem:[%s12984_s1 + $0xabc] ss:$40 sps:$4 sm:$0xff]   ;;  %v11748_v41 = vld [vmem:[%s12985_s0 + $0x6c] ss:$40 sps:$4 sm:$0xff]  }
 0x1e8   :  { %5703 = vmatpush1.bf16.msra.mxu0 %v9277_v48  ;;  %5863 = vmatprep.subr.bf16.mxu1 %v9288_v55  ;;  %v9334_v35 = vld [vmem:[%s12984_s1 + $0xab8] ss:$40 sps:$4 sm:$0xff]   ;;  %v9339_v16 = vld [vmem:[%s12984_s1 + $0x1504] ss:$40 sps:$4 sm:$0xff]   ;;  %v11767_v21 = vld [vmem:[%s12985_s0 + $0x68] ss:$40 sps:$4 sm:$0xff]  }
 0x1e9   :  { %5704 = vmatprep.subr.bf16.mxu0 %v9285_v54  ;;  %v9337_v46 = vld [vmem:[%s12984_s1 + $0x1500] ss:$40 sps:$4 sm:$0xff]   ;;  %v9345_v48 = vld [vmem:[%s12984_s1 + $0x1554] ss:$40 sps:$4 sm:$0xff]   ;;  %v11786_v50 = vld [vmem:[%s12985_s0 + $0x24] ss:$40 sps:$4 sm:$0xff]  }
 0x1ea   :  { %v9340_v39 = vld [vmem:[%s12984_s1 + $0xb08] ss:$40 sps:$4 sm:$0xff]   ;;  %v9346_v52 = vld [vmem:[%s12984_s1 + $0xb58] ss:$40 sps:$4 sm:$0xff]   ;;  %v9351_v26 = vld [vmem:[%s12984_s1 + $0x15a4] ss:$40 sps:$4 sm:$0xff]  }
 0x1eb   :  { %5864 = vmatpush1.bf16.msra.mxu1 %v9286_v56  ;;  %v9343_v51 = vld [vmem:[%s12984_s1 + $0x1550] ss:$40 sps:$4 sm:$0xff]   ;;  %v9349_v53 = vld [vmem:[%s12984_s1 + $0x15a0] ss:$40 sps:$4 sm:$0xff]   ;;  %v9357_v55 = vld [vmem:[%s12984_s1 + $0x15f4] ss:$40 sps:$4 sm:$0xff]  }
 0x1ec   :  { %5705 = vmatpush1.bf16.msra.mxu0 %v9283_v28  ;;  %5865 = vmatprep.subr.bf16.mxu1 %v9294_v58  ;;  %v9352_v54 = vld [vmem:[%s12984_s1 + $0xba8] ss:$40 sps:$4 sm:$0xff]   ;;  %v9360_v28 = vld [vmem:[%s12984_s1 + $0xbfc] ss:$40 sps:$4 sm:$0xff]  }
 0x1ed   :  { %5706 = vmatprep.subr.bf16.mxu0 %v9291_v57  ;;  %v9355_v56 = vld [vmem:[%s12984_s1 + $0x15f0] ss:$40 sps:$4 sm:$0xff]   ;;  %v9363_v58 = vld [vmem:[%s12984_s1 + $0x1644] ss:$40 sps:$4 sm:$0xff]  }
 0x1ee   :  { %v9358_v57 = vld [vmem:[%s12984_s1 + $0xbf8] ss:$40 sps:$4 sm:$0xff]  }
 0x1ef   :  { %5866 = vmatpush1.bf16.msra.mxu1 %v9292_v34  ;;  %v9361_v34 = vld [vmem:[%s12984_s1 + $0x1640] ss:$40 sps:$4 sm:$0xff]  }
 0x1f0   :  { %5707 = vmatpush1.bf16.msra.mxu0 %v9289_v49  ;;  %5867 = vmatprep.subr.bf16.mxu1 %v9300_v60  ;;  %v9366_v49 = vld [vmem:[%s12984_s1 + $0xc4c] ss:$40 sps:$4 sm:$0xff]  }
 0x1f1   :  { %5708 = vmatprep.subr.bf16.mxu0 %v9297_v59  ;;  %v9364_v59 = vld [vmem:[%s12984_s1 + $0xc48] ss:$40 sps:$4 sm:$0xff]   ;;  %v9369_v60 = vld [vmem:[%s12984_s1 + $0x1694] ss:$40 sps:$4 sm:$0xff]  }
 0x1f3   :  { %5868 = vmatpush1.bf16.msra.mxu1 %v9298_v62  ;;  %v9367_v62 = vld [vmem:[%s12984_s1 + $0x1690] ss:$40 sps:$4 sm:$0xff]  }
 0x1f4   :  { %5709 = vmatpush1.bf16.msra.mxu0 %v9295_v61  ;;  %5869 = vmatprep.subr.bf16.mxu1 %v9306_v0  ;;  %v9372_v61 = vld [vmem:[%s12984_s1 + $0xc9c] ss:$40 sps:$4 sm:$0xff]  }
 0x1f5   :  { %5710 = vmatprep.subr.bf16.mxu0 %v9303_v40  ;;  %v9370_v40 = vld [vmem:[%s12984_s1 + $0xc98] ss:$40 sps:$4 sm:$0xff]   ;;  %v9375_v0 = vld [vmem:[%s12984_s1 + $0x16e4] ss:$40 sps:$4 sm:$0xff]  }
 0x1f7   :  { %5870 = vmatpush1.bf16.msra.mxu1 %v9304_v1  ;;  %v9373_v1 = vld [vmem:[%s12984_s1 + $0x16e0] ss:$40 sps:$4 sm:$0xff]  }
 0x1f8   :  { %5711 = vmatpush1.bf16.msra.mxu0 %v9301_v37  ;;  %5871 = vmatprep.subr.bf16.mxu1 %v9312_v38  ;;  %v9378_v37 = vld [vmem:[%s12984_s1 + $0xcec] ss:$40 sps:$4 sm:$0xff]  }
 0x1f9   :  { %5712 = vmatprep.subr.bf16.mxu0 %v9309_v2  ;;  %v9376_v2 = vld [vmem:[%s12984_s1 + $0xce8] ss:$40 sps:$4 sm:$0xff]   ;;  %v9381_v38 = vld [vmem:[%s12984_s1 + $0x1734] ss:$40 sps:$4 sm:$0xff]  }
 0x1fb   :  { %5872 = vmatpush1.bf16.msra.mxu1 %v9310_v29  ;;  %v9379_v29 = vld [vmem:[%s12984_s1 + $0x1730] ss:$40 sps:$4 sm:$0xff]  }
 0x1fc   :  { %5713 = vmatpush1.bf16.msra.mxu0 %v9307_v3  ;;  %5873 = vmatprep.subr.bf16.mxu1 %v9318_v8  ;;  %v9384_v3 = vld [vmem:[%s12984_s1 + $0xd3c] ss:$40 sps:$4 sm:$0xff]  }
 0x1fd   :  { %5714 = vmatprep.subr.bf16.mxu0 %v9315_v4  ;;  %v9382_v4 = vld [vmem:[%s12984_s1 + $0xd38] ss:$40 sps:$4 sm:$0xff]   ;;  %v9387_v8 = vld [vmem:[%s12984_s1 + $0x1784] ss:$40 sps:$4 sm:$0xff]  }
 0x1ff   :  { %5874 = vmatpush1.bf16.msra.mxu1 %v9316_v10  ;;  %v9385_v10 = vld [vmem:[%s12984_s1 + $0x1780] ss:$40 sps:$4 sm:$0xff]  }
 0x200   :  { %5715 = vmatpush1.bf16.msra.mxu0 %v9313_v9  ;;  %5896 = vmatprep.subr.bf16.mxu1 %v9324_v17  ;;  %v9390_v9 = vld [vmem:[%s12984_s1 + $0xd8c] ss:$40 sps:$4 sm:$0xff]  }
 0x201   :  { %5737 = vmatprep.subr.bf16.mxu0 %v9321_v11  ;;  %v9388_v11 = vld [vmem:[%s12984_s1 + $0xd88] ss:$40 sps:$4 sm:$0xff]   ;;  %v9393_v17 = vld [vmem:[%s12984_s1 + $0x17d4] ss:$40 sps:$4 sm:$0xff]  }
 0x202   :  { %5876 = vmatmul.mubr.bf16.vlgmr.msra.gmra.mrb[16].mxu1 %v9853_v30  ;;  %v9402_v30 = vld [vmem:[%s12984_s1 + $0xe2c] ss:$40 sps:$4 sm:$0xff]  }
 0x203   :  { %5717 = vmatmul.mubr.bf16.vlgmr.msra.gmra.mrb[8].mxu0 %v11727_v27  ;;  %5897 = vmatpush1.bf16.msra.mxu1 %v9322_v6  ;;  %v9391_v6 = vld [vmem:[%s12984_s1 + $0x17d0] ss:$40 sps:$4 sm:$0xff]  }
 0x204   :  { %5738 = vmatpush1.bf16.msra.mxu0 %v9319_v18  ;;  %5898 = vmatprep.subr.bf16.mxu1 %v9330_v12  ;;  %v9396_v18 = vld [vmem:[%s12984_s1 + $0xddc] ss:$40 sps:$4 sm:$0xff]  }
 0x205   :  { %5739 = vmatprep.subr.bf16.mxu0 %v9327_v23  ;;  %5726 = vmatprep.mubr.bf16.mxu0 %v11748_v41  ;;  %v9394_v23 = vld [vmem:[%s12984_s1 + $0xdd8] ss:$40 sps:$4 sm:$0xff]   ;;  %v9399_v12 = vld [vmem:[%s12984_s1 + $0x1824] ss:$40 sps:$4 sm:$0xff]  }
 0x206   :  { %5885 = vmatprep.mubr.bf16.mxu1 %v11264_v63  ;;  %v9342_v63 = vld [vmem:[%s12984_s1 + $0xb0c] ss:$40 sps:$4 sm:$0xff]  }
 0x207   :  { %5899 = vmatpush1.bf16.msra.mxu1 %v9328_v20  ;;  %v9400_v20 = vld [vmem:[%s12984_s1 + $0xe28] ss:$40 sps:$4 sm:$0xff]  }
 0x208   :  { %5740 = vmatpush1.bf16.msra.mxu0 %v9325_v15  ;;  %5900 = vmatprep.subr.bf16.mxu1 %v9336_v36  ;;  %v9397_v15 = vld [vmem:[%s12984_s1 + $0x1820] ss:$40 sps:$4 sm:$0xff]   ;;  %v9408_v36 = vld [vmem:[%s12984_s1 + $0xe7c] ss:$40 sps:$4 sm:$0xff]  }
 0x209   :  { %5741 = vmatprep.subr.bf16.mxu0 %v9333_v33  ;;  %v9405_v33 = vld [vmem:[%s12984_s1 + $0x1874] ss:$40 sps:$4 sm:$0xff]  }
 0x20a   :  { %5886 = vmatmul.mubr.bf16.gmra.mrb[20].mxu1 %v11285_v5  ;;  %v9348_v5 = vld [vmem:[%s12984_s1 + $0xb5c] ss:$40 sps:$4 sm:$0xff]  }
 0x20b   :  { %5727 = vmatmul.mubr.bf16.gmra.mrb[12].mxu0 %v11767_v21  ;;  %5901 = vmatpush1.bf16.msra.mxu1 %v9334_v35  ;;  %v9406_v35 = vld [vmem:[%s12984_s1 + $0xe78] ss:$40 sps:$4 sm:$0xff]  }
 0x20c   :  { %5742 = vmatpush1.bf16.msra.mxu0 %v9331_v43  ;;  %5902 = vmatprep.subr.bf16.mxu1 %v9342_v63  ;;  %v9403_v43 = vld [vmem:[%s12984_s1 + $0x1870] ss:$40 sps:$4 sm:$0xff]   ;;  %v9414_v63 = vld [vmem:[%s12984_s1 + $0xecc] ss:$40 sps:$4 sm:$0xff]  }
 0x20d   :  { %5743 = vmatprep.subr.bf16.mxu0 %v9339_v16  ;;  %5769 = vmatprep.mubr.bf16.mxu0 %v11786_v50  ;;  %v9411_v16 = vld [vmem:[%s12984_s1 + $0x18c4] ss:$40 sps:$4 sm:$0xff]  }
 0x20e   :  { %5928 = vmatprep.mubr.bf16.mxu1 %v11303_v13  ;;  %v9354_v13 = vld [vmem:[%s12984_s1 + $0xbac] ss:$40 sps:$4 sm:$0xff]  }
 0x20f   :  { %5903 = vmatpush1.bf16.msra.mxu1 %v9340_v39  ;;  %v9412_v39 = vld [vmem:[%s12984_s1 + $0xec8] ss:$40 sps:$4 sm:$0xff]  }
 0x210   :  { %5744 = vmatpush1.bf16.msra.mxu0 %v9337_v46  ;;  %5904 = vmatprep.subr.bf16.mxu1 %v9348_v5  ;;  %v9409_v46 = vld [vmem:[%s12984_s1 + $0x18c0] ss:$40 sps:$4 sm:$0xff]   ;;  %v9420_v5 = vld [vmem:[%s12984_s1 + $0x24] ss:$40 sps:$4 sm:$0xff]  }
 0x211   :  { %5745 = vmatprep.subr.bf16.mxu0 %v9345_v48  ;;  %v9417_v48 = vld [vmem:[%s12984_s1 + $0xf1c] ss:$40 sps:$4 sm:$0xff]  }
 0x213   :  { %5905 = vmatpush1.bf16.msra.mxu1 %v9346_v52  ;;  %v9418_v52 = vld [vmem:[%s12984_s1 + $0x20] ss:$40 sps:$4 sm:$0xff]  }
 0x214   :  { %5746 = vmatpush1.bf16.msra.mxu0 %v9343_v51  ;;  %5906 = vmatprep.subr.bf16.mxu1 %v9354_v13  ;;  %v9415_v51 = vld [vmem:[%s12984_s1 + $0xf18] ss:$40 sps:$4 sm:$0xff]   ;;  %v9426_v13 = vld [vmem:[%s12984_s1 + $0x74] ss:$40 sps:$4 sm:$0xff]  }
 0x215   :  { %5747 = vmatprep.subr.bf16.mxu0 %v9351_v26  ;;  %v9423_v26 = vld [vmem:[%s12984_s1 + $0xf6c] ss:$40 sps:$4 sm:$0xff]  }
 0x217   :  { %5907 = vmatpush1.bf16.msra.mxu1 %v9352_v54  ;;  %v9421_v54 = vld [vmem:[%s12984_s1 + $0xf68] ss:$40 sps:$4 sm:$0xff]  }
 0x218   :  { %5748 = vmatpush1.bf16.msra.mxu0 %v9349_v53  ;;  %5908 = vmatprep.subr.bf16.mxu1 %v9360_v28  ;;  %v11949_v53 = vld [vmem:[%s12985_s0 + $0x20] ss:$40 sps:$4 sm:$0xff]   ;;  %v9429_v28 = vld [vmem:[%s12984_s1 + $0xfbc] ss:$40 sps:$4 sm:$0xff]  }
 0x219   :  { %5749 = vmatprep.subr.bf16.mxu0 %v9357_v55  ;;  %v9424_v55 = vld [vmem:[%s12984_s1 + $0x70] ss:$40 sps:$4 sm:$0xff]  }
 0x21b   :  { %5909 = vmatpush1.bf16.msra.mxu1 %v9358_v57  ;;  %v9427_v57 = vld [vmem:[%s12984_s1 + $0xfb8] ss:$40 sps:$4 sm:$0xff]  }
 0x21c   :  { %5750 = vmatpush1.bf16.msra.mxu0 %v9355_v56  ;;  %5910 = vmatprep.subr.bf16.mxu1 %v9366_v49  ;;  %v11968_v56 = vld [vmem:[%s12985_s0 + $0x74] ss:$40 sps:$4 sm:$0xff]  }
 0x21d   :  { %5751 = vmatprep.subr.bf16.mxu0 %v9363_v58  ;;  %v9430_v58 = vld [vmem:[%s12984_s1 + $0xc0] ss:$40 sps:$4 sm:$0xff]   ;;  %v9435_v49 = vld [vmem:[%s12984_s1 + $0x100c] ss:$40 sps:$4 sm:$0xff]  }
 0x21f   :  { %5911 = vmatpush1.bf16.msra.mxu1 %v9364_v59  ;;  %v9433_v59 = vld [vmem:[%s12984_s1 + $0x1008] ss:$40 sps:$4 sm:$0xff]  }
 0x220   :  { %5752 = vmatpush1.bf16.msra.mxu0 %v9361_v34  ;;  %5912 = vmatprep.subr.bf16.mxu1 %v9372_v61  ;;  %v9438_v34 = vld [vmem:[%s12984_s1 + $0x114] ss:$40 sps:$4 sm:$0xff]  }
 0x221   :  { %5753 = vmatprep.subr.bf16.mxu0 %v9369_v60  ;;  %v11993_v60 = vld [vmem:[%s12985_s0 + $0x70] ss:$40 sps:$4 sm:$0xff]   ;;  %v9441_v61 = vld [vmem:[%s12984_s1 + $0x105c] ss:$40 sps:$4 sm:$0xff]  }
 0x223   :  { %5913 = vmatpush1.bf16.msra.mxu1 %v9370_v40  ;;  %v9439_v40 = vld [vmem:[%s12984_s1 + $0x1058] ss:$40 sps:$4 sm:$0xff]  }
 0x224   :  { %5754 = vmatpush1.bf16.msra.mxu0 %v9367_v62  ;;  %5914 = vmatprep.subr.bf16.mxu1 %v9378_v37  ;;  %v9444_v62 = vld [vmem:[%s12984_s1 + $0x164] ss:$40 sps:$4 sm:$0xff]   ;;  %v855_v37 = vsub.s32 2, %v11501_v7 }
 0x225   :  { %5755 = vmatprep.subr.bf16.mxu0 %v9375_v0  ;;  %v9860_v0 = vld [vmem:[%s12985_s0 + $0x4] ss:$40 sps:$4 sm:$0xff]  }
 0x227   :  { %5915 = vmatpush1.bf16.msra.mxu1 %v9376_v2  ;;  %v9447_v2 = vld [vmem:[%s12984_s1 + $0x10ac] ss:$40 sps:$4 sm:$0xff]  }
 0x228   :  { %5756 = vmatpush1.bf16.msra.mxu0 %v9373_v1  ;;  %5916 = vmatprep.subr.bf16.mxu1 %v9384_v3  ;;  %v859_v1 = vsub.s32 3, %v11501_v7  ;;  %v9445_v3 = vld [vmem:[%s12984_s1 + $0x10a8] ss:$40 sps:$4 sm:$0xff]  }
 0x229   :  { %5757 = vmatprep.subr.bf16.mxu0 %v9381_v38  ;;  %v856_v38 = vrot.slane %v11521_v44, %v855_v37 }
 0x22b   :  { %5917 = vmatpush1.bf16.msra.mxu1 %v9382_v4  ;;  %v9448_v4 = vld [vmem:[%s12984_s1 + $0x1b0] ss:$40 sps:$4 sm:$0xff]  }
 0x22c   :  { %5758 = vmatpush1.bf16.msra.mxu0 %v9379_v29  ;;  %5918 = vmatprep.subr.bf16.mxu1 %v9390_v9  ;;  %v860_v29 = vrot.slane %v11521_v44, %v859_v1  ;;  %v9456_v9 = vld [vmem:[%s12984_s1 + $0x204] ss:$40 sps:$4 sm:$0xff]  }
 0x22d   :  { %5759 = vmatprep.subr.bf16.mxu0 %v9387_v8  ;;  %v9453_v8 = vld [vmem:[%s12984_s1 + $0x10fc] ss:$40 sps:$4 sm:$0xff]  }
 0x22e   :  { %v9477_v1 = vld [vmem:[%s12984_s1 + $0x123c] ss:$40 sps:$4 sm:$0xff]  }
 0x22f   :  { %5919 = vmatpush1.bf16.msra.mxu1 %v9388_v11  ;;  %v9451_v11 = vld [vmem:[%s12984_s1 + $0x10f8] ss:$40 sps:$4 sm:$0xff]  }
 0x230   :  { %5760 = vmatpush1.bf16.msra.mxu0 %v9385_v10  ;;  %5920 = vmatprep.subr.bf16.mxu1 %v9396_v18 }
 0x231   :  { %5761 = vmatprep.subr.bf16.mxu0 %v9393_v17 }
 0x233   :  { %5921 = vmatpush1.bf16.msra.mxu1 %v9394_v23  ;;  %v9454_v23 = vld [vmem:[%s12984_s1 + $0x200] ss:$40 sps:$4 sm:$0xff]  }
 0x234   :  { %5762 = vmatpush1.bf16.msra.mxu0 %v9391_v6  ;;  %5922 = vmatprep.subr.bf16.mxu1 %v9402_v30 }
 0x235   :  { %5763 = vmatprep.subr.bf16.mxu0 %v9399_v12  ;;  %v9459_v12 = vld [vmem:[%s12984_s1 + $0x114c] ss:$40 sps:$4 sm:$0xff]  }
 0x237   :  { %5923 = vmatpush1.bf16.msra.mxu1 %v9400_v20  ;;  %v9462_v20 = vld [vmem:[%s12984_s1 + $0x254] ss:$40 sps:$4 sm:$0xff]  }
 0x238   :  { %5764 = vmatpush1.bf16.msra.mxu0 %v9397_v15  ;;  %5924 = vmatprep.subr.bf16.mxu1 %v9408_v36  ;;  %v9457_v36 = vld [vmem:[%s12984_s1 + $0x1148] ss:$40 sps:$4 sm:$0xff]  }
 0x239   :  { %5765 = vmatprep.subr.bf16.mxu0 %v9405_v33 }
 0x23b   :  { %5925 = vmatpush1.bf16.msra.mxu1 %v9406_v35 }
 0x23c   :  { %5766 = vmatpush1.bf16.msra.mxu0 %v9403_v43  ;;  %5926 = vmatprep.subr.bf16.mxu1 %v9414_v63 }
 0x23d   :  { %5767 = vmatprep.subr.bf16.mxu0 %v9411_v16 }
 0x23f   :  { %5927 = vmatpush1.bf16.msra.mxu1 %v9412_v39  ;;  %v9465_v39 = vld [vmem:[%s12984_s1 + $0x119c] ss:$40 sps:$4 sm:$0xff]  }
 0x240   :  { %5768 = vmatpush1.bf16.msra.mxu0 %v9409_v46  ;;  %5949 = vmatprep.subr.bf16.mxu1 %v9417_v48  ;;  %v9460_v46 = vld [vmem:[%s12984_s1 + $0x250] ss:$40 sps:$4 sm:$0xff]  }
 0x241   :  { %6055 = vmatprep.subr.bf16.mxu0 %v9420_v5  ;;  %v9468_v5 = vld [vmem:[%s12984_s1 + $0x2a4] ss:$40 sps:$4 sm:$0xff]  }
 0x242   :  { %5929 = vmatmul.mubr.bf16.vlgmr.msra.gmra.mrb[16].mxu1 %v11468_v14  ;;  %v9432_v14 = vld [vmem:[%s12984_s1 + $0xc4] ss:$40 sps:$4 sm:$0xff]  }
 0x243   :  { %5770 = vmatmul.mubr.bf16.vlgmr.msra.gmra.mrb[8].mxu0 %v11949_v53  ;;  %5950 = vmatpush1.bf16.msra.mxu1 %v9415_v51 }
 0x244   :  { %6056 = vmatpush1.bf16.msra.mxu0 %v9418_v52  ;;  %5951 = vmatprep.subr.bf16.mxu1 %v9423_v26  ;;  %v9463_v26 = vld [vmem:[%s12984_s1 + $0x1198] ss:$40 sps:$4 sm:$0xff]  }
 0x245   :  { %6057 = vmatprep.subr.bf16.mxu0 %v9426_v13  ;;  %5779 = vmatprep.mubr.bf16.mxu0 %v11968_v56  ;;  %v9466_v13 = vld [vmem:[%s12984_s1 + $0x2a0] ss:$40 sps:$4 sm:$0xff]  }
 0x246   :  { %5938 = vmatprep.mubr.bf16.mxu1 %v11495_v32  ;;  %v9436_v32 = vld [vmem:[%s12984_s1 + $0x110] ss:$40 sps:$4 sm:$0xff]  }
 0x247   :  { %5952 = vmatpush1.bf16.msra.mxu1 %v9421_v54 }
 0x248   :  { %6058 = vmatpush1.bf16.msra.mxu0 %v9424_v55  ;;  %5953 = vmatprep.subr.bf16.mxu1 %v9429_v28 }
 0x249   :  { %6059 = vmatprep.subr.bf16.mxu0 %v9432_v14 }
 0x24a   :  { %5939 = vmatmul.mubr.bf16.gmra.mrb[20].mxu1 %v11512_v42  ;;  %v9442_v42 = vld [vmem:[%s12984_s1 + $0x160] ss:$40 sps:$4 sm:$0xff]  }
 0x24b   :  { %5780 = vmatmul.mubr.bf16.gmra.mrb[12].mxu0 %v11993_v60  ;;  %5954 = vmatpush1.bf16.msra.mxu1 %v9427_v57  ;;  %v9471_v57 = vld [vmem:[%s12984_s1 + $0x11ec] ss:$40 sps:$4 sm:$0xff]  }
 0x24c   :  { %6060 = vmatpush1.bf16.msra.mxu0 %v9430_v58  ;;  %5955 = vmatprep.subr.bf16.mxu1 %v9435_v49  ;;  %v9474_v58 = vld [vmem:[%s12984_s1 + $0x2f4] ss:$40 sps:$4 sm:$0xff]  }
 0x24d   :  { %6061 = vmatprep.subr.bf16.mxu0 %v9438_v34  ;;  %5981 = vmatprep.mubr.bf16.mxu1 %v11540_v19  ;;  %v9450_v19 = vld [vmem:[%s12984_s1 + $0x1b4] ss:$40 sps:$4 sm:$0xff]  }
 0x24e   :  { %6087 = vmatprep.mubr.bf16.mxu0 %v9860_v0 }
 0x24f   :  { %5956 = vmatpush1.bf16.msra.mxu1 %v9433_v59 }
 0x250   :  { %6062 = vmatpush1.bf16.msra.mxu0 %v9436_v32  ;;  %5957 = vmatprep.subr.bf16.mxu1 %v9441_v61  ;;  %v9469_v32 = vld [vmem:[%s12984_s1 + $0x11e8] ss:$40 sps:$4 sm:$0xff]  }
 0x251   :  { %6063 = vmatprep.subr.bf16.mxu0 %v9444_v62  ;;  %v9472_v61 = vld [vmem:[%s12984_s1 + $0x2f0] ss:$40 sps:$4 sm:$0xff]  }
 0x253   :  { %5958 = vmatpush1.bf16.msra.mxu1 %v9439_v40 }
 0x254   :  { %6064 = vmatpush1.bf16.msra.mxu0 %v9442_v42  ;;  %5959 = vmatprep.subr.bf16.mxu1 %v9447_v2  ;;  %v9480_v2 = vld [vmem:[%s12984_s1 + $0x344] ss:$40 sps:$4 sm:$0xff]  }
 0x255   :  { %6065 = vmatprep.subr.bf16.mxu0 %v9450_v19  ;;  %v5506_v10 = vpop.f32.mrb[8].mxu1 }
 0x256   :  { %v8337_v44 = vadd.f32 %v5506_v10, %v856_v38  ;;  %v5508_v17 = vpop.f32.mrb[9].mxu1  ;;  %v9489_v10 = vld [vmem:[%s12984_s1 + $0x12dc] ss:$40 sps:$4 sm:$0xff]  }
 0x257   :  { %v8338_v18 = vadd.f32 %v5508_v17, %v860_v29  ;;  %v5510_v6 = vpop.f32.mrb[10].mxu1  ;;  %5960 = vmatpush1.bf16.msra.mxu1 %v9445_v3  ;;  %v9478_v3 = vld [vmem:[%s12984_s1 + $0x340] ss:$40 sps:$4 sm:$0xff]  }
 0x258   :  { %6066 = vmatpush1.bf16.msra.mxu0 %v9448_v4  ;;  %v8339_v30 = vadd.f32 %v5510_v6, %v856_v38  ;;  %v5512_v15 = vpop.f32.mrb[11].mxu1  ;;  %5961 = vmatprep.subr.bf16.mxu1 %v9453_v8  ;;  %v6322_v43 = vmax.f32 %v8337_v44, 0.0  ;;  %v9486_v4 = vld [vmem:[%s12984_s1 + $0x394] ss:$40 sps:$4 sm:$0xff]   ;;  %v9481_v8 = vld [vmem:[%s12984_s1 + $0x1288] ss:$40 sps:$4 sm:$0xff]  }
 0x259   :  { %6067 = vmatprep.subr.bf16.mxu0 %v9456_v9  ;;  %v8340_v33 = vadd.f32 %v5512_v15, %v860_v29  ;;  %v6323_v16 = vmax.f32 %v8338_v18, 0.0  ;;  %v9484_v9 = vld [vmem:[%s12984_s1 + $0x390] ss:$40 sps:$4 sm:$0xff]   ;;  %v9490_v17 = vld [vmem:[%s12984_s1 + $0x3e0] ss:$40 sps:$4 sm:$0xff]  }
 0x25a   :  { %v6332_v35 = vmax.f32 %v8339_v30, 0.0  ;;  %v9487_v44 = vld [vmem:[%s12984_s1 + $0x12d8] ss:$40 sps:$4 sm:$0xff]   ;;  %v9495_v18 = vld [vmem:[%s12984_s1 + $0x132c] ss:$40 sps:$4 sm:$0xff]  }
 0x25b   :  { %v6333_v63 = vmax.f32 %v8340_v33, 0.0  ;;  %5962 = vmatpush1.bf16.msra.mxu1 %v9451_v11  ;;  %v9492_v11 = vld [vmem:[%s12984_s1 + $0x3e4] ss:$40 sps:$4 sm:$0xff]   ;;  %v9498_v6 = vld [vmem:[%s12984_s1 + $0x434] ss:$40 sps:$4 sm:$0xff]  }
 0x25c   :  { %6068 = vmatpush1.bf16.msra.mxu0 %v9454_v23  ;;  %v12056_v48 = vpack.c.bf16 %v6332_v35, %v6322_v43  ;;  %5963 = vmatprep.subr.bf16.mxu1 %v9459_v12  ;;  %v9493_v23 = vld [vmem:[%s12984_s1 + $0x1328] ss:$40 sps:$4 sm:$0xff]   ;;  %v9501_v30 = vld [vmem:[%s12984_s1 + $0x137c] ss:$40 sps:$4 sm:$0xff]  }
 0x25d   :  { %6069 = vmatprep.subr.bf16.mxu0 %v9462_v20  ;;  %v12061_v51 = vpack.c.bf16 %v6333_v63, %v6323_v16  ;;  %v5516_v52 = vpop.f32.mrb[12].mxu1  ;;  %v9496_v12 = vld [vmem:[%s12984_s1 + $0x430] ss:$40 sps:$4 sm:$0xff]   ;;  %v9504_v15 = vld [vmem:[%s12984_s1 + $0x484] ss:$40 sps:$4 sm:$0xff]  }
 0x25e   :  { %v8341_v54 = vadd.f32 %v5516_v52, %v856_v38  ;;  %v5518_v55 = vpop.f32.mrb[13].mxu1  ;;  %v9499_v20 = vld [vmem:[%s12984_s1 + $0x1378] ss:$40 sps:$4 sm:$0xff]   ;;  %v9510_v43 = vld [vmem:[%s12984_s1 + $0x4d4] ss:$40 sps:$4 sm:$0xff]  }
 0x25f   :  { %v8342_v28 = vadd.f32 %v5518_v55, %v860_v29  ;;  %v5520_v14 = vpop.f32.mrb[14].mxu1  ;;  %5964 = vmatpush1.bf16.msra.mxu1 %v9457_v36  ;;  %v9502_v33 = vld [vmem:[%s12984_s1 + $0x480] ss:$40 sps:$4 sm:$0xff]   ;;  %v9507_v36 = vld [vmem:[%s12984_s1 + $0x13cc] ss:$40 sps:$4 sm:$0xff]  }
 0x260   :  { %6070 = vmatpush1.bf16.msra.mxu0 %v9460_v46  ;;  %v8343_v49 = vadd.f32 %v5520_v14, %v856_v38  ;;  %v5522_v34 = vpop.f32.mrb[15].mxu1  ;;  %5965 = vmatprep.subr.bf16.mxu1 %v9465_v39  ;;  %v6342_v62 = vmax.f32 %v8341_v54, 0.0  ;;  %v9475_v38 = vld [vmem:[%s12984_s1 + $0x1238] ss:$40 sps:$4 sm:$0xff]   ;;  %v9505_v35 = vld [vmem:[%s12984_s1 + $0x13c8] ss:$40 sps:$4 sm:$0xff]  }
 0x261   :  { %6071 = vmatprep.subr.bf16.mxu0 %v9468_v5  ;;  %v8344_v59 = vadd.f32 %v5522_v34, %v860_v29  ;;  %v6343_v42 = vmax.f32 %v8342_v28, 0.0  ;;  %v9483_v29 = vld [vmem:[%s12984_s1 + $0x128c] ss:$40 sps:$4 sm:$0xff]   ;;  %v9508_v16 = vld [vmem:[%s12984_s1 + $0x4d0] ss:$40 sps:$4 sm:$0xff]  }
 0x262   :  { %v6352_v40 = vmax.f32 %v8343_v49, 0.0  ;;  %v9513_v63 = vld [vmem:[%s12984_s1 + $0x141c] ss:$40 sps:$4 sm:$0xff]   ;;  %v9511_v39 = vld [vmem:[%s12984_s1 + $0x1418] ss:$40 sps:$4 sm:$0xff]  }
 0x263   :  { %v6353_v0 = vmax.f32 %v8344_v59, 0.0  ;;  %5966 = vmatpush1.bf16.msra.mxu1 %v9463_v26  ;;  %v9516_v46 = vld [vmem:[%s12984_s1 + $0x524] ss:$40 sps:$4 sm:$0xff]   ;;  %v9514_v5 = vld [vmem:[%s12984_s1 + $0x520] ss:$40 sps:$4 sm:$0xff]  }
 0x264   :  { %6072 = vmatpush1.bf16.msra.mxu0 %v9466_v13  ;;  %v12081_v37 = vpack.c.bf16 %v6352_v40, %v6342_v62  ;;  %5967 = vmatprep.subr.bf16.mxu1 %v9471_v57  ;;  %v9519_v52 = vld [vmem:[%s12984_s1 + $0x146c] ss:$40 sps:$4 sm:$0xff]   ;;  %v9517_v13 = vld [vmem:[%s12984_s1 + $0x1468] ss:$40 sps:$4 sm:$0xff]   ;;  %v9525_v28 = vld [vmem:[%s12984_s1 + $0x14bc] ss:$40 sps:$4 sm:$0xff]  }
 0x265   :  { %6073 = vmatprep.subr.bf16.mxu0 %v9474_v58  ;;  %v12089_v19 = vpack.c.bf16 %v6353_v0, %v6343_v42  ;;  %v9522_v26 = vld [vmem:[%s12984_s1 + $0x574] ss:$40 sps:$4 sm:$0xff]   ;;  %v9861_v54 = vld [vmem:[%s12985_s0] ss:$40 sps:$4 sm:$0xff]   ;;  %v9520_v55 = vld [vmem:[%s12984_s1 + $0x570] ss:$40 sps:$4 sm:$0xff]  }
 0x266   :  { %v9523_v14 = vld [vmem:[%s12984_s1 + $0x14b8] ss:$40 sps:$4 sm:$0xff]   ;;  %v9862_v57 = vld [vmem:[%s12985_s0 + $0x54] ss:$40 sps:$4 sm:$0xff]   ;;  %v9529_v34 = vld [vmem:[%s12984_s1 + $0x1508] ss:$40 sps:$4 sm:$0xff]  }
 0x267   :  { %5968 = vmatpush1.bf16.msra.mxu1 %v9469_v32  ;;  %v9526_v58 = vld [vmem:[%s12984_s1 + $0x5c0] ss:$40 sps:$4 sm:$0xff]   ;;  %v9531_v49 = vld [vmem:[%s12984_s1 + $0x150c] ss:$40 sps:$4 sm:$0xff]   ;;  %v9532_v59 = vld [vmem:[%s12984_s1 + $0x610] ss:$40 sps:$4 sm:$0xff]  }
 0x268   :  { %6074 = vmatpush1.bf16.msra.mxu0 %v9472_v61  ;;  %5969 = vmatprep.subr.bf16.mxu1 %v9477_v1  ;;  %v9863_v32 = vld [vmem:[%s12985_s0 + $0x50] ss:$40 sps:$4 sm:$0xff]   ;;  %v9537_v61 = vld [vmem:[%s12984_s1 + $0x155c] ss:$40 sps:$4 sm:$0xff]   ;;  %v9864_v40 = vld [vmem:[%s12985_s0 + $0xc] ss:$40 sps:$4 sm:$0xff]  }
 0x269   :  { %6075 = vmatprep.subr.bf16.mxu0 %v9480_v2  ;;  %v9540_v62 = vld [vmem:[%s12984_s1 + $0x664] ss:$40 sps:$4 sm:$0xff]   ;;  %v9538_v42 = vld [vmem:[%s12984_s1 + $0x660] ss:$40 sps:$4 sm:$0xff]   ;;  %v9544_v2 = vld [vmem:[%s12984_s1 + $0x6b0] ss:$40 sps:$4 sm:$0xff]  }
 0x26a   :  { %v9543_v0 = vld [vmem:[%s12984_s1 + $0x15ac] ss:$40 sps:$4 sm:$0xff]   ;;  %v9541_v1 = vld [vmem:[%s12984_s1 + $0x15a8] ss:$40 sps:$4 sm:$0xff]  }
 0x26b   :  { %5970 = vmatpush1.bf16.msra.mxu1 %v9475_v38  ;;  %v9549_v38 = vld [vmem:[%s12984_s1 + $0x15fc] ss:$40 sps:$4 sm:$0xff]  }
 0x26c   :  { %6076 = vmatpush1.bf16.msra.mxu0 %v9478_v3  ;;  %5971 = vmatprep.subr.bf16.mxu1 %v9483_v29  ;;  %v9552_v3 = vld [vmem:[%s12984_s1 + $0x704] ss:$40 sps:$4 sm:$0xff]   ;;  %v9547_v29 = vld [vmem:[%s12984_s1 + $0x15f8] ss:$40 sps:$4 sm:$0xff]  }
 0x26d   :  { %6077 = vmatprep.subr.bf16.mxu0 %v9486_v4  ;;  %v9550_v4 = vld [vmem:[%s12984_s1 + $0x700] ss:$40 sps:$4 sm:$0xff]  }
 0x26f   :  { %5972 = vmatpush1.bf16.msra.mxu1 %v9481_v8  ;;  %v9555_v8 = vld [vmem:[%s12984_s1 + $0x164c] ss:$40 sps:$4 sm:$0xff]  }
 0x270   :  { %6078 = vmatpush1.bf16.msra.mxu0 %v9484_v9  ;;  %5973 = vmatprep.subr.bf16.mxu1 %v9489_v10  ;;  %v9558_v9 = vld [vmem:[%s12984_s1 + $0x754] ss:$40 sps:$4 sm:$0xff]   ;;  %v9553_v10 = vld [vmem:[%s12984_s1 + $0x1648] ss:$40 sps:$4 sm:$0xff]  }
 0x271   :  { %6079 = vmatprep.subr.bf16.mxu0 %v9492_v11  ;;  %v9556_v11 = vld [vmem:[%s12984_s1 + $0x750] ss:$40 sps:$4 sm:$0xff]  }
 0x273   :  { %5974 = vmatpush1.bf16.msra.mxu1 %v9487_v44  ;;  %v9561_v44 = vld [vmem:[%s12984_s1 + $0x169c] ss:$40 sps:$4 sm:$0xff]  }
 0x274   :  { %6080 = vmatpush1.bf16.msra.mxu0 %v9490_v17  ;;  %5975 = vmatprep.subr.bf16.mxu1 %v9495_v18  ;;  %v9564_v17 = vld [vmem:[%s12984_s1 + $0x7a4] ss:$40 sps:$4 sm:$0xff]   ;;  %v9559_v18 = vld [vmem:[%s12984_s1 + $0x1698] ss:$40 sps:$4 sm:$0xff]  }
 0x275   :  { %6081 = vmatprep.subr.bf16.mxu0 %v9498_v6  ;;  %v9562_v6 = vld [vmem:[%s12984_s1 + $0x7a0] ss:$40 sps:$4 sm:$0xff]  }
 0x277   :  { %5976 = vmatpush1.bf16.msra.mxu1 %v9493_v23  ;;  %v9567_v23 = vld [vmem:[%s12984_s1 + $0x16ec] ss:$40 sps:$4 sm:$0xff]  }
 0x278   :  { %6082 = vmatpush1.bf16.msra.mxu0 %v9496_v12  ;;  %5977 = vmatprep.subr.bf16.mxu1 %v9501_v30  ;;  %v9570_v12 = vld [vmem:[%s12984_s1 + $0x7f4] ss:$40 sps:$4 sm:$0xff]   ;;  %v9565_v30 = vld [vmem:[%s12984_s1 + $0x16e8] ss:$40 sps:$4 sm:$0xff]  }
 0x279   :  { %6083 = vmatprep.subr.bf16.mxu0 %v9504_v15  ;;  %v9568_v15 = vld [vmem:[%s12984_s1 + $0x7f0] ss:$40 sps:$4 sm:$0xff]  }
 0x27b   :  { %5978 = vmatpush1.bf16.msra.mxu1 %v9499_v20  ;;  %v9573_v20 = vld [vmem:[%s12984_s1 + $0x173c] ss:$40 sps:$4 sm:$0xff]  }
 0x27c   :  { %6084 = vmatpush1.bf16.msra.mxu0 %v9502_v33  ;;  %5979 = vmatprep.subr.bf16.mxu1 %v9507_v36  ;;  %v9576_v33 = vld [vmem:[%s12984_s1 + $0x844] ss:$40 sps:$4 sm:$0xff]   ;;  %v9571_v36 = vld [vmem:[%s12984_s1 + $0x1738] ss:$40 sps:$4 sm:$0xff]  }
 0x27d   :  { %6085 = vmatprep.subr.bf16.mxu0 %v9510_v43  ;;  %v9574_v43 = vld [vmem:[%s12984_s1 + $0x840] ss:$40 sps:$4 sm:$0xff]  }
 0x27f   :  { %5980 = vmatpush1.bf16.msra.mxu1 %v9505_v35  ;;  %v9579_v35 = vld [vmem:[%s12984_s1 + $0x178c] ss:$40 sps:$4 sm:$0xff]  }
 0x280   :  { %6086 = vmatpush1.bf16.msra.mxu0 %v9508_v16  ;;  %6002 = vmatprep.subr.bf16.mxu1 %v9513_v63  ;;  %v9582_v16 = vld [vmem:[%s12984_s1 + $0x894] ss:$40 sps:$4 sm:$0xff]   ;;  %v9577_v63 = vld [vmem:[%s12984_s1 + $0x1788] ss:$40 sps:$4 sm:$0xff]  }
 0x281   :  { %6108 = vmatprep.subr.bf16.mxu0 %v9516_v46  ;;  %v9580_v46 = vld [vmem:[%s12984_s1 + $0x890] ss:$40 sps:$4 sm:$0xff]  }
 0x282   :  { %5982 = vmatmul.mubr.bf16.vlgmr.msra.gmra.mrb[16].mxu1 %v11727_v27  ;;  %v9528_v27 = vld [vmem:[%s12984_s1 + $0x5c4] ss:$40 sps:$4 sm:$0xff]  }
 0x283   :  { %6088 = vmatmul.mubr.bf16.vlgmr.msra.gmra.mrb[16].mxu0 %v9861_v54  ;;  %6003 = vmatpush1.bf16.msra.mxu1 %v9511_v39  ;;  %v9585_v39 = vld [vmem:[%s12984_s1 + $0x17dc] ss:$40 sps:$4 sm:$0xff]  }
 0x284   :  { %6109 = vmatpush1.bf16.msra.mxu0 %v9514_v5  ;;  %6004 = vmatprep.subr.bf16.mxu1 %v9519_v52  ;;  %v9588_v5 = vld [vmem:[%s12984_s1 + $0x8e4] ss:$40 sps:$4 sm:$0xff]   ;;  %v9583_v52 = vld [vmem:[%s12984_s1 + $0x17d8] ss:$40 sps:$4 sm:$0xff]   ;;  %v9594_v54 = vld [vmem:[%s12984_s1 + $0x934] ss:$40 sps:$4 sm:$0xff]  }
 0x285   :  { %6110 = vmatprep.subr.bf16.mxu0 %v9522_v26  ;;  %5991 = vmatprep.mubr.bf16.mxu1 %v11748_v41  ;;  %v9534_v41 = vld [vmem:[%s12984_s1 + $0x614] ss:$40 sps:$4 sm:$0xff]   ;;  %v9586_v26 = vld [vmem:[%s12984_s1 + $0x8e0] ss:$40 sps:$4 sm:$0xff]  }
 0x286   :  { %6097 = vmatprep.mubr.bf16.mxu0 %v9862_v57  ;;  %v9595_v57 = vld [vmem:[%s12984_s1 + $0x1878] ss:$40 sps:$4 sm:$0xff]  }
 0x287   :  { %6005 = vmatpush1.bf16.msra.mxu1 %v9517_v13  ;;  %v9591_v13 = vld [vmem:[%s12984_s1 + $0x182c] ss:$40 sps:$4 sm:$0xff]  }
 0x288   :  { %6111 = vmatpush1.bf16.msra.mxu0 %v9520_v55  ;;  %6006 = vmatprep.subr.bf16.mxu1 %v9525_v28  ;;  %v9589_v55 = vld [vmem:[%s12984_s1 + $0x1828] ss:$40 sps:$4 sm:$0xff]  }
 0x289   :  { %6112 = vmatprep.subr.bf16.mxu0 %v9528_v27  ;;  %v9592_v28 = vld [vmem:[%s12984_s1 + $0x930] ss:$40 sps:$4 sm:$0xff]   ;;  %v9597_v27 = vld [vmem:[%s12984_s1 + $0x187c] ss:$40 sps:$4 sm:$0xff]  }
 0x28a   :  { %5992 = vmatmul.mubr.bf16.gmra.mrb[20].mxu1 %v11767_v21  ;;  %v9535_v21 = vld [vmem:[%s12984_s1 + $0x1558] ss:$40 sps:$4 sm:$0xff]  }
 0x28b   :  { %6098 = vmatmul.mubr.bf16.gmra.mrb[20].mxu0 %v9863_v32  ;;  %6007 = vmatpush1.bf16.msra.mxu1 %v9523_v14  ;;  %v9600_v14 = vld [vmem:[%s12984_s1 + $0x984] ss:$40 sps:$4 sm:$0xff]  }
 0x28c   :  { %6113 = vmatpush1.bf16.msra.mxu0 %v9526_v58  ;;  %6008 = vmatprep.subr.bf16.mxu1 %v9531_v49  ;;  %v9598_v58 = vld [vmem:[%s12984_s1 + $0x980] ss:$40 sps:$4 sm:$0xff]   ;;  %v9603_v49 = vld [vmem:[%s12984_s1 + $0x18cc] ss:$40 sps:$4 sm:$0xff]  }
 0x28d   :  { %6114 = vmatprep.subr.bf16.mxu0 %v9534_v41  ;;  %6034 = vmatprep.mubr.bf16.mxu1 %v11786_v50  ;;  %v9546_v50 = vld [vmem:[%s12984_s1 + $0x6b4] ss:$40 sps:$4 sm:$0xff]   ;;  %v9609_v32 = vld [vmem:[%s12984_s1 + $0xa24] ss:$40 sps:$4 sm:$0xff]  }
 0x28e   :  { %6140 = vmatprep.mubr.bf16.mxu0 %v9864_v40  ;;  %v9606_v41 = vld [vmem:[%s12984_s1 + $0x9d4] ss:$40 sps:$4 sm:$0xff]  }
 0x28f   :  { %6009 = vmatpush1.bf16.msra.mxu1 %v9529_v34  ;;  %v9601_v34 = vld [vmem:[%s12984_s1 + $0x18c8] ss:$40 sps:$4 sm:$0xff]   ;;  %v9614_v40 = vld [vmem:[%s12984_s1 + $0xa74] ss:$40 sps:$4 sm:$0xff]  }
 0x290   :  { %6115 = vmatpush1.bf16.msra.mxu0 %v9532_v59  ;;  %6010 = vmatprep.subr.bf16.mxu1 %v9537_v61  ;;  %v9604_v59 = vld [vmem:[%s12984_s1 + $0x9d0] ss:$40 sps:$4 sm:$0xff]   ;;  %v9610_v61 = vld [vmem:[%s12987_s3 + $0x40] sm:$0xff]  }
 0x291   :  { %6116 = vmatprep.subr.bf16.mxu0 %v9540_v62  ;;  %v9607_v62 = vld [vmem:[%s12984_s1 + $0xa20] ss:$40 sps:$4 sm:$0xff]  }
 0x293   :  { %6011 = vmatpush1.bf16.msra.mxu1 %v9535_v21  ;;  %v9611_v21 = vld [vmem:[%s12987_s3] sm:$0xff]  }
 0x294   :  { %6117 = vmatpush1.bf16.msra.mxu0 %v9538_v42  ;;  %6012 = vmatprep.subr.bf16.mxu1 %v9543_v0  ;;  %v9615_v42 = vld [vmem:[%s12987_s3 + $0x48] sm:$0xff]  }
 0x295   :  { %6118 = vmatprep.subr.bf16.mxu0 %v9546_v50  ;;  %v9865_v0 = vld [vmem:[%s12985_s0 + $0x8] ss:$40 sps:$4 sm:$0xff]  }
 0x296   :  { %v9612_v50 = vld [vmem:[%s12984_s1 + $0xa70] ss:$40 sps:$4 sm:$0xff]  }
 0x297   :  { %6013 = vmatpush1.bf16.msra.mxu1 %v9541_v1  ;;  %v9616_v1 = vld [vmem:[%s12987_s3 + $0x8] sm:$0xff]  }
 0x298   :  { %6119 = vmatpush1.bf16.msra.mxu0 %v9544_v2  ;;  %6014 = vmatprep.subr.bf16.mxu1 %v9549_v38  ;;  %v9620_v2 = vld [vmem:[%s12987_s3 + $0x50] sm:$0xff]   ;;  %v9866_v38 = vld [vmem:[%s12985_s0 + $0x5c] ss:$40 sps:$4 sm:$0xff]  }
 0x299   :  { %6120 = vmatprep.subr.bf16.mxu0 %v9552_v3  ;;  %v9617_v3 = vld [vmem:[%s12984_s1 + $0xac0] ss:$40 sps:$4 sm:$0xff]  }
 0x29b   :  { %6015 = vmatpush1.bf16.msra.mxu1 %v9547_v29  ;;  %v9621_v29 = vld [vmem:[%s12987_s3 + $0x10] sm:$0xff]  }
 0x29c   :  { %6121 = vmatpush1.bf16.msra.mxu0 %v9550_v4  ;;  %6016 = vmatprep.subr.bf16.mxu1 %v9555_v8  ;;  %v9625_v4 = vld [vmem:[%s12987_s3 + $0x58] sm:$0xff]  }
 0x29d   :  { %6122 = vmatprep.subr.bf16.mxu0 %v9558_v9  ;;  %v9867_v8 = vld [vmem:[%s12985_s0 + $0x58] ss:$40 sps:$4 sm:$0xff]  }
 0x29e   :  { %v9622_v9 = vld [vmem:[%s12984_s1 + $0xb10] ss:$40 sps:$4 sm:$0xff]  }
 0x29f   :  { %6017 = vmatpush1.bf16.msra.mxu1 %v9553_v10  ;;  %v9626_v10 = vld [vmem:[%s12987_s3 + $0x18] sm:$0xff]  }
 0x2a0   :  { %6123 = vmatpush1.bf16.msra.mxu0 %v9556_v11  ;;  %6018 = vmatprep.subr.bf16.mxu1 %v9561_v44  ;;  %v9630_v11 = vld [vmem:[%s12987_s3 + $0x60] sm:$0xff]   ;;  %v9868_v44 = vld [vmem:[%s12985_s0 + $0x14] ss:$40 sps:$4 sm:$0xff]  }
 0x2a1   :  { %6124 = vmatprep.subr.bf16.mxu0 %v9564_v17  ;;  %v9631_v17 = vld [vmem:[%s12987_s3 + $0x20] sm:$0xff]  }
 0x2a3   :  { %6019 = vmatpush1.bf16.msra.mxu1 %v9559_v18  ;;  %v9634_v18 = vld [vmem:[%s12984_s1 + $0xbb4] ss:$40 sps:$4 sm:$0xff]  }
 0x2a4   :  { %6125 = vmatpush1.bf16.msra.mxu0 %v9562_v6  ;;  %6020 = vmatprep.subr.bf16.mxu1 %v9567_v23  ;;  %v9635_v6 = vld [vmem:[%s12987_s3 + $0x68] sm:$0xff]   ;;  %v9632_v23 = vld [vmem:[%s12984_s1 + $0xbb0] ss:$40 sps:$4 sm:$0xff]  }
 0x2a5   :  { %6126 = vmatprep.subr.bf16.mxu0 %v9570_v12  ;;  %v9636_v12 = vld [vmem:[%s12987_s3 + $0x28] sm:$0xff]  }
 0x2a7   :  { %6021 = vmatpush1.bf16.msra.mxu1 %v9565_v30  ;;  %v9639_v30 = vld [vmem:[%s12984_s1 + $0xc04] ss:$40 sps:$4 sm:$0xff]  }
 0x2a8   :  { %6127 = vmatpush1.bf16.msra.mxu0 %v9568_v15  ;;  %6022 = vmatprep.subr.bf16.mxu1 %v9573_v20  ;;  %v9640_v15 = vld [vmem:[%s12987_s3 + $0x70] sm:$0xff]   ;;  %v9637_v20 = vld [vmem:[%s12984_s1 + $0xc00] ss:$40 sps:$4 sm:$0xff]  }
 0x2a9   :  { %6128 = vmatprep.subr.bf16.mxu0 %v9576_v33  ;;  %v9641_v33 = vld [vmem:[%s12987_s3 + $0x30] sm:$0xff]  }
 0x2ab   :  { %6023 = vmatpush1.bf16.msra.mxu1 %v9571_v36  ;;  %v9644_v36 = vld [vmem:[%s12984_s1 + $0xc54] ss:$40 sps:$4 sm:$0xff]  }
 0x2ac   :  { %6129 = vmatpush1.bf16.msra.mxu0 %v9574_v43  ;;  %6024 = vmatprep.subr.bf16.mxu1 %v9579_v35  ;;  %v9645_v43 = vld [vmem:[%s12987_s3 + $0x78] sm:$0xff]  }
 0x2ad   :  { %6130 = vmatprep.subr.bf16.mxu0 %v9582_v16  ;;  %v9642_v35 = vld [vmem:[%s12984_s1 + $0xc50] ss:$40 sps:$4 sm:$0xff]  }
 0x2ae   :  { %v9646_v16 = vld [vmem:[%s12987_s3 + $0x38] sm:$0xff]  }
 0x2af   :  { %6025 = vmatpush1.bf16.msra.mxu1 %v9577_v63  ;;  %v9649_v63 = vld [vmem:[%s12984_s1 + $0xca4] ss:$40 sps:$4 sm:$0xff]  }
 0x2b0   :  { %6131 = vmatpush1.bf16.msra.mxu0 %v9580_v46  ;;  %6026 = vmatprep.subr.bf16.mxu1 %v9585_v39  ;;  %v9650_v46 = vld [vmem:[%s12987_s3 + $0xc0] sm:$0xff]  }
 0x2b1   :  { %6132 = vmatprep.subr.bf16.mxu0 %v9588_v5  ;;  %v9647_v39 = vld [vmem:[%s12984_s1 + $0xca0] ss:$40 sps:$4 sm:$0xff]  }
 0x2b2   :  { %v9651_v5 = vld [vmem:[%s12987_s3 + $0x80] sm:$0xff]  }
 0x2b3   :  { %6027 = vmatpush1.bf16.msra.mxu1 %v9583_v52  ;;  %v9654_v52 = vld [vmem:[%s12984_s1 + $0xcf4] ss:$40 sps:$4 sm:$0xff]  }
 0x2b4   :  { %6133 = vmatpush1.bf16.msra.mxu0 %v9586_v26  ;;  %6028 = vmatprep.subr.bf16.mxu1 %v9591_v13  ;;  %v9655_v26 = vld [vmem:[%s12987_s3 + $0xc8] sm:$0xff]   ;;  %v9652_v13 = vld [vmem:[%s12984_s1 + $0xcf0] ss:$40 sps:$4 sm:$0xff]  }
 0x2b5   :  { %6134 = vmatprep.subr.bf16.mxu0 %v9594_v54  ;;  %v9656_v54 = vld [vmem:[%s12987_s3 + $0x88] sm:$0xff]  }
 0x2b7   :  { %6029 = vmatpush1.bf16.msra.mxu1 %v9589_v55  ;;  %v9659_v55 = vld [vmem:[%s12984_s1 + $0xd44] ss:$40 sps:$4 sm:$0xff]  }
 0x2b8   :  { %6135 = vmatpush1.bf16.msra.mxu0 %v9592_v28  ;;  %6030 = vmatprep.subr.bf16.mxu1 %v9597_v27  ;;  %v9661_v28 = vld [vmem:[%s12987_s3 + $0x90] sm:$0xff]  }
 0x2b9   :  { %6136 = vmatprep.subr.bf16.mxu0 %v9600_v14  ;;  %v9664_v27 = vld [vmem:[%s12984_s1 + $0xd94] ss:$40 sps:$4 sm:$0xff]  }
 0x2ba   :  { %v9665_v14 = vld [vmem:[%s12987_s3 + $0xd8] sm:$0xff]  }
 0x2bb   :  { %6031 = vmatpush1.bf16.msra.mxu1 %v9595_v57  ;;  %v9662_v57 = vld [vmem:[%s12984_s1 + $0xd90] ss:$40 sps:$4 sm:$0xff]  }
 0x2bc   :  { %6137 = vmatpush1.bf16.msra.mxu0 %v9598_v58  ;;  %6032 = vmatprep.subr.bf16.mxu1 %v9603_v49  ;;  %v9666_v58 = vld [vmem:[%s12987_s3 + $0x98] sm:$0xff]   ;;  %v9669_v49 = vld [vmem:[%s12984_s1 + $0xde4] ss:$40 sps:$4 sm:$0xff]  }
 0x2bd   :  { %6138 = vmatprep.subr.bf16.mxu0 %v9606_v41  ;;  %v9671_v41 = vld [vmem:[%s12987_s3 + $0xa0] sm:$0xff]  }
 0x2bf   :  { %6033 = vmatpush1.bf16.msra.mxu1 %v9601_v34  ;;  %v9674_v34 = vld [vmem:[%s12984_s1 + $0xe34] ss:$40 sps:$4 sm:$0xff]  }
 0x2c0   :  { %6139 = vmatpush1.bf16.msra.mxu0 %v9604_v59  ;;  %8181 = vmatprep.subr.bf16.mxu1 %v9610_v61  ;;  %v9675_v59 = vld [vmem:[%s12987_s3 + $0xe8] sm:$0xff]  }
 0x2c1   :  { %6161 = vmatprep.subr.bf16.mxu0 %v9609_v32  ;;  %v9672_v32 = vld [vmem:[%s12984_s1 + $0xe30] ss:$40 sps:$4 sm:$0xff]   ;;  %v9676_v61 = vld [vmem:[%s12987_s3 + $0xa8] sm:$0xff]  }
 0x2c2   :  { %6035 = vmatmul.mubr.bf16.vlgmr.msra.gmra.mrb[16].mxu1 %v11949_v53  ;;  %v9619_v53 = vld [vmem:[%s12984_s1 + $0xac4] ss:$40 sps:$4 sm:$0xff]  }
 0x2c3   :  { %6141 = vmatmul.mubr.bf16.vlgmr.msra.gmra.mrb[16].mxu0 %v9865_v0  ;;  %8182 = vmatpush3.bf16.msra.mxu1 %v9611_v21  ;;  %v9680_v21 = vld [vmem:[%s12987_s3 + $0xf0] sm:$0xff]  }
 0x2c4   :  { %6162 = vmatpush1.bf16.msra.mxu0 %v9607_v62  ;;  %8183 = vmatprep.subr.bf16.mxu1 %v9615_v42  ;;  %v9679_v62 = vld [vmem:[%s12984_s1 + $0xe84] ss:$40 sps:$4 sm:$0xff]   ;;  %v9681_v42 = vld [vmem:[%s12987_s3 + $0xb0] sm:$0xff]  }
 0x2c5   :  { %6163 = vmatprep.subr.bf16.mxu0 %v9614_v40  ;;  %6044 = vmatprep.mubr.bf16.mxu1 %v11968_v56  ;;  %v9624_v56 = vld [vmem:[%s12984_s1 + $0xb14] ss:$40 sps:$4 sm:$0xff]   ;;  %v9677_v40 = vld [vmem:[%s12984_s1 + $0xe80] ss:$40 sps:$4 sm:$0xff]  }
 0x2c6   :  { %6150 = vmatprep.mubr.bf16.mxu0 %v9866_v38  ;;  %v9684_v0 = vld [vmem:[%s12984_s1 + $0xed4] ss:$40 sps:$4 sm:$0xff]   ;;  %v9690_v38 = vld [vmem:[%s12987_s3 + $0x140] sm:$0xff]  }
 0x2c7   :  { %8184 = vmatpush3.bf16.msra.mxu1 %v9616_v1  ;;  %v9682_v1 = vld [vmem:[%s12984_s1 + $0xed0] ss:$40 sps:$4 sm:$0xff]  }
 0x2c8   :  { %6164 = vmatpush1.bf16.msra.mxu0 %v9612_v50  ;;  %8185 = vmatprep.subr.bf16.mxu1 %v9620_v2  ;;  %v9685_v50 = vld [vmem:[%s12987_s3 + $0xf8] sm:$0xff]   ;;  %v9689_v2 = vld [vmem:[%s12984_s1 + $0xf24] ss:$40 sps:$4 sm:$0xff]  }
 0x2c9   :  { %6165 = vmatprep.subr.bf16.mxu0 %v9619_v53  ;;  %v9686_v53 = vld [vmem:[%s12987_s3 + $0xb8] sm:$0xff]  }
 0x2ca   :  { %6045 = vmatmul.mubr.bf16.gmra.mrb[20].mxu1 %v11993_v60  ;;  %v9629_v60 = vld [vmem:[%s12984_s1 + $0xb64] ss:$40 sps:$4 sm:$0xff]  }
 0x2cb   :  { %6151 = vmatmul.mubr.bf16.gmra.mrb[20].mxu0 %v9867_v8  ;;  %8186 = vmatpush3.bf16.msra.mxu1 %v9621_v29  ;;  %v9691_v29 = vld [vmem:[%s12987_s3 + $0x100] sm:$0xff]   ;;  %v9869_v8 = vld [vmem:[%s12985_s0 + $0x10] ss:$40 sps:$4 sm:$0xff]  }
 0x2cc   :  { %6166 = vmatpush1.bf16.msra.mxu0 %v9617_v3  ;;  %7059 = vmatprep.mubr.bf16.mxu1 %v11609_v24  ;;  %v9627_v24 = vld [vmem:[%s12984_s1 + $0xb60] ss:$40 sps:$4 sm:$0xff]  }
 0x2cd   :  { %6167 = vmatprep.subr.bf16.mxu0 %v9624_v56  ;;  %8187 = vmatprep.subr.bf16.mxu1 %v9625_v4  ;;  %v9687_v3 = vld [vmem:[%s12984_s1 + $0xf20] ss:$40 sps:$4 sm:$0xff]   ;;  %v9694_v56 = vld [vmem:[%s12984_s1 + $0xf74] ss:$40 sps:$4 sm:$0xff]  }
 0x2ce   :  { %6193 = vmatprep.mubr.bf16.mxu0 %v9868_v44  ;;  %v9695_v4 = vld [vmem:[%s12987_s3 + $0x148] sm:$0xff]   ;;  %v9701_v44 = vld [vmem:[%s12987_s3 + $0x110] sm:$0xff]  }
 0x2cf   :  { %8188 = vmatpush3.bf16.msra.mxu1 %v9626_v10  ;;  %v9696_v10 = vld [vmem:[%s12987_s3 + $0x108] sm:$0xff]  }
 0x2d0   :  { %6168 = vmatpush1.bf16.msra.mxu0 %v9622_v9  ;;  %8189 = vmatprep.subr.bf16.mxu1 %v9630_v11  ;;  %v9692_v9 = vld [vmem:[%s12984_s1 + $0xf70] ss:$40 sps:$4 sm:$0xff]   ;;  %v9870_v11 = vld [vmem:[%s12985_s0 + $0x64] ss:$40 sps:$4 sm:$0xff]  }
 0x2d1   :  { %6169 = vmatprep.subr.bf16.mxu0 %v9629_v60  ;;  %v9699_v60 = vld [vmem:[%s12984_s1 + $0xfc4] ss:$40 sps:$4 sm:$0xff]  }
 0x2d3   :  { %8190 = vmatpush3.bf16.msra.mxu1 %v9631_v17  ;;  %v9705_v17 = vld [vmem:[%s12987_s3 + $0x158] sm:$0xff]  }
 0x2d4   :  { %6170 = vmatpush1.bf16.msra.mxu0 %v9627_v24  ;;  %8191 = vmatprep.subr.bf16.mxu1 %v9635_v6  ;;  %v9704_v24 = vld [vmem:[%s12984_s1 + $0x1014] ss:$40 sps:$4 sm:$0xff]   ;;  %v9702_v6 = vld [vmem:[%s12984_s1 + $0x1010] ss:$40 sps:$4 sm:$0xff]  }
 0x2d5   :  { %6171 = vmatprep.subr.bf16.mxu0 %v9634_v18  ;;  %v9871_v18 = vld [vmem:[%s12985_s0 + $0x60] ss:$40 sps:$4 sm:$0xff]  }
 0x2d7   :  { %8192 = vmatpush3.bf16.msra.mxu1 %v9636_v12  ;;  %v9709_v12 = vld [vmem:[%s12984_s1 + $0x1064] ss:$40 sps:$4 sm:$0xff]  }
 0x2d8   :  { %6172 = vmatpush1.bf16.msra.mxu0 %v9632_v23  ;;  %8193 = vmatprep.subr.bf16.mxu1 %v9640_v15  ;;  %v9706_v23 = vld [vmem:[%s12987_s3 + $0x118] sm:$0xff]   ;;  %v863_v15 = vsub.s32 4, %v11501_v7 }
 0x2d9   :  { %6173 = vmatprep.subr.bf16.mxu0 %v9639_v30  ;;  %v9872_v30 = vld [vmem:[%s12985_s0 + $0x1c] ss:$40 sps:$4 sm:$0xff]  }
 0x2db   :  { %8194 = vmatpush3.bf16.msra.mxu1 %v9641_v33  ;;  %v867_v33 = vsub.s32 5, %v11501_v7 }
 0x2dc   :  { %6174 = vmatpush1.bf16.msra.mxu0 %v9637_v20  ;;  %8195 = vmatprep.subr.bf16.mxu1 %v9645_v43  ;;  %v9707_v20 = vld [vmem:[%s12984_s1 + $0x1060] ss:$40 sps:$4 sm:$0xff]   ;;  %v9714_v43 = vld [vmem:[%s12984_s1 + $0x10b4] ss:$40 sps:$4 sm:$0xff]  }
 0x2dd   :  { %6175 = vmatprep.subr.bf16.mxu0 %v9644_v36  ;;  %v9711_v36 = vld [vmem:[%s12987_s3 + $0x120] sm:$0xff]  }
 0x2df   :  { %8196 = vmatpush3.bf16.msra.mxu1 %v9646_v16  ;;  %v12663_v16 = vld [vmem:[%s12986_s2] sm:$0xff] }
 0x2e0   :  { %6176 = vmatpush1.bf16.msra.mxu0 %v9642_v35  ;;  %8209 = vmatprep.subr.bf16.mxu1 %v9650_v46  ;;  %v9715_v35 = vld [vmem:[%s12987_s3 + $0x168] sm:$0xff]   ;;  %v868_v46 = vrot.slane %v12663_v16, %v867_v33  ;;  %v9806_v33 = vld [vmem:[%s12987_s3 + $0x198] sm:$0xff]  }
 0x2e1   :  { %6177 = vmatprep.subr.bf16.mxu0 %v9649_v63  ;;  %v864_v63 = vrot.slane %v12663_v16, %v863_v15  ;;  %v9736_v15 = vld [vmem:[%s12984_s1 + $0x1290] ss:$40 sps:$4 sm:$0xff]  }
 0x2e2   :  { %7060 = vmatmul.mubr.bf16.vlgmr.msra.gmra.mrb[24].mxu1 %v11600_v22  ;;  %v9660_v22 = vld [vmem:[%s12987_s3 + $0xd0] sm:$0xff]  }
 0x2e3   :  { %7067 = vmatprep.mubr.bf16.mxu1 %v11638_v31  ;;  %8210 = vmatpush3.bf16.msra.mxu1 %v9651_v5  ;;  %v9657_v31 = vld [vmem:[%s12984_s1 + $0xd40] ss:$40 sps:$4 sm:$0xff]  }
 0x2e4   :  { %6178 = vmatpush1.bf16.msra.mxu0 %v9647_v39  ;;  %8211 = vmatprep.subr.bf16.mxu1 %v9655_v26  ;;  %v9712_v39 = vld [vmem:[%s12984_s1 + $0x10b0] ss:$40 sps:$4 sm:$0xff]   ;;  %v9716_v5 = vld [vmem:[%s12987_s3 + $0x128] sm:$0xff]  }
 0x2e5   :  { %6179 = vmatprep.subr.bf16.mxu0 %v9654_v52  ;;  %v9719_v52 = vld [vmem:[%s12984_s1 + $0x1104] ss:$40 sps:$4 sm:$0xff]  }
 0x2e7   :  { %8212 = vmatpush3.bf16.msra.mxu1 %v9656_v54 }
 0x2e8   :  { %6180 = vmatpush1.bf16.msra.mxu0 %v9652_v13  ;;  %8213 = vmatprep.subr.bf16.mxu1 %v9660_v22  ;;  %v9720_v13 = vld [vmem:[%s12987_s3 + $0x170] sm:$0xff]  }
 0x2e9   :  { %6181 = vmatprep.subr.bf16.mxu0 %v9659_v55 }
 0x2ea   :  { %7068 = vmatmul.mubr.bf16.gmra.mrb[28].mxu1 %v11630_v25  ;;  %v9670_v25 = vld [vmem:[%s12987_s3 + $0xe0] sm:$0xff]  }
 0x2eb   :  { %7108 = vmatprep.mubr.bf16.mxu1 %v12061_v51  ;;  %8214 = vmatpush3.bf16.msra.mxu1 %v9661_v28  ;;  %v9667_v51 = vld [vmem:[%s12984_s1 + $0xde0] ss:$40 sps:$4 sm:$0xff]  }
 0x2ec   :  { %6182 = vmatpush1.bf16.msra.mxu0 %v9657_v31  ;;  %8215 = vmatprep.subr.bf16.mxu1 %v9665_v14  ;;  %v9717_v28 = vld [vmem:[%s12984_s1 + $0x1100] ss:$40 sps:$4 sm:$0xff]  }
 0x2ed   :  { %6183 = vmatprep.subr.bf16.mxu0 %v9664_v27 }
 0x2ef   :  { %8216 = vmatpush3.bf16.msra.mxu1 %v9666_v58  ;;  %v9724_v58 = vld [vmem:[%s12984_s1 + $0x1154] ss:$40 sps:$4 sm:$0xff]  }
 0x2f0   :  { %6184 = vmatpush1.bf16.msra.mxu0 %v9662_v57  ;;  %8217 = vmatprep.subr.bf16.mxu1 %v9670_v25  ;;  %v9721_v57 = vld [vmem:[%s12987_s3 + $0x130] sm:$0xff]   ;;  %v9725_v25 = vld [vmem:[%s12987_s3 + $0x178] sm:$0xff]  }
 0x2f1   :  { %6185 = vmatprep.subr.bf16.mxu0 %v9669_v49 }
 0x2f3   :  { %8218 = vmatpush3.bf16.msra.mxu1 %v9671_v41 }
 0x2f4   :  { %6186 = vmatpush1.bf16.msra.mxu0 %v9667_v51  ;;  %8219 = vmatprep.subr.bf16.mxu1 %v9675_v59 }
 0x2f5   :  { %6187 = vmatprep.subr.bf16.mxu0 %v9674_v34 }
 0x2f7   :  { %8220 = vmatpush3.bf16.msra.mxu1 %v9676_v61 }
 0x2f8   :  { %6188 = vmatpush1.bf16.msra.mxu0 %v9672_v32  ;;  %8221 = vmatprep.subr.bf16.mxu1 %v9680_v21  ;;  %v9722_v32 = vld [vmem:[%s12984_s1 + $0x1150] ss:$40 sps:$4 sm:$0xff]   ;;  %v9729_v21 = vld [vmem:[%s12984_s1 + $0x11a4] ss:$40 sps:$4 sm:$0xff]  }
 0x2f9   :  { %6189 = vmatprep.subr.bf16.mxu0 %v9679_v62  ;;  %v9726_v62 = vld [vmem:[%s12987_s3 + $0x138] sm:$0xff]  }
 0x2fb   :  { %8222 = vmatpush3.bf16.msra.mxu1 %v9681_v42 }
 0x2fc   :  { %6190 = vmatpush1.bf16.msra.mxu0 %v9677_v40  ;;  %8223 = vmatprep.subr.bf16.mxu1 %v9685_v50 }
 0x2fd   :  { %6191 = vmatprep.subr.bf16.mxu0 %v9684_v0  ;;  %v9799_v0 = vld [vmem:[%s12987_s3 + $0x1c0] sm:$0xff]  }
 0x2ff   :  { %8224 = vmatpush3.bf16.msra.mxu1 %v9686_v53 }
 0x300   :  { %6192 = vmatpush1.bf16.msra.mxu0 %v9682_v1  ;;  %8237 = vmatprep.subr.bf16.mxu1 %v9690_v38  ;;  %v9727_v38 = vld [vmem:[%s12984_s1 + $0x11a0] ss:$40 sps:$4 sm:$0xff]  }
 0x301   :  { %6214 = vmatprep.subr.bf16.mxu0 %v9689_v2 }
 0x302   :  { %7109 = vmatmul.mubr.bf16.vlgmr.msra.gmra.mrb[32].mxu1 %v12056_v48  ;;  %v9700_v48 = vld [vmem:[%s12987_s3 + $0x150] sm:$0xff]  }
 0x303   :  { %6194 = vmatmul.mubr.bf16.vlgmr.msra.gmra.mrb[16].mxu0 %v9869_v8  ;;  %7116 = vmatprep.mubr.bf16.mxu1 %v12089_v19  ;;  %v9697_v19 = vld [vmem:[%s12984_s1 + $0xfc0] ss:$40 sps:$4 sm:$0xff]  }
 0x304   :  { %6215 = vmatpush1.bf16.msra.mxu0 %v9687_v3  ;;  %8238 = vmatpush3.bf16.msra.mxu1 %v9691_v29 }
 0x305   :  { %6216 = vmatprep.subr.bf16.mxu0 %v9694_v56  ;;  %8239 = vmatprep.subr.bf16.mxu1 %v9695_v4  ;;  %v9732_v56 = vld [vmem:[%s12984_s1 + $0x11f4] ss:$40 sps:$4 sm:$0xff]   ;;  %v9800_v4 = vld [vmem:[%s12987_s3 + $0x180] sm:$0xff]  }
 0x306   :  { %6203 = vmatprep.mubr.bf16.mxu0 %v9870_v11 }
 0x308   :  { %6217 = vmatpush1.bf16.msra.mxu0 %v9692_v9  ;;  %8240 = vmatpush3.bf16.msra.mxu1 %v9696_v10  ;;  %v9801_v9 = vld [vmem:[%s12987_s3 + $0x1c8] sm:$0xff]  }
 0x309   :  { %6218 = vmatprep.subr.bf16.mxu0 %v9699_v60  ;;  %8241 = vmatprep.subr.bf16.mxu1 %v9700_v48 }
 0x30a   :  { %7117 = vmatmul.mubr.bf16.gmra.mrb[36].mxu1 %v12081_v37  ;;  %v9710_v37 = vld [vmem:[%s12987_s3 + $0x160] sm:$0xff]  }
 0x30b   :  { %6204 = vmatmul.mubr.bf16.gmra.mrb[20].mxu0 %v9871_v18 }
 0x30c   :  { %6219 = vmatpush1.bf16.msra.mxu0 %v9697_v19  ;;  %8242 = vmatpush3.bf16.msra.mxu1 %v9701_v44  ;;  %v9730_v19 = vld [vmem:[%s12984_s1 + $0x11f0] ss:$40 sps:$4 sm:$0xff]  }
 0x30d   :  { %6220 = vmatprep.subr.bf16.mxu0 %v9704_v24  ;;  %8243 = vmatprep.subr.bf16.mxu1 %v9705_v17  ;;  %v9735_v24 = vld [vmem:[%s12984_s1 + $0x1244] ss:$40 sps:$4 sm:$0xff]  }
 0x30e   :  { %6246 = vmatprep.mubr.bf16.mxu0 %v9872_v30  ;;  %v9802_v17 = vld [vmem:[%s12987_s3 + $0x188] sm:$0xff]   ;;  %v9805_v30 = vld [vmem:[%s12987_s3 + $0x1d8] sm:$0xff]  }
 0x310   :  { %6221 = vmatpush1.bf16.msra.mxu0 %v9702_v6  ;;  %8244 = vmatpush3.bf16.msra.mxu1 %v9706_v23  ;;  %v9803_v6 = vld [vmem:[%s12987_s3 + $0x1d0] sm:$0xff]   ;;  %v9733_v23 = vld [vmem:[%s12984_s1 + $0x1240] ss:$40 sps:$4 sm:$0xff]  }
 0x311   :  { %6222 = vmatprep.subr.bf16.mxu0 %v9709_v12  ;;  %8245 = vmatprep.subr.bf16.mxu1 %v9710_v37  ;;  %v9738_v12 = vld [vmem:[%s12984_s1 + $0x1294] ss:$40 sps:$4 sm:$0xff]  }
 0x312   :  { %v9804_v37 = vld [vmem:[%s12987_s3 + $0x190] sm:$0xff]  }
 0x314   :  { %6223 = vmatpush1.bf16.msra.mxu0 %v9707_v20  ;;  %8246 = vmatpush3.bf16.msra.mxu1 %v9711_v36  ;;  %v9741_v20 = vld [vmem:[%s12984_s1 + $0x12e4] ss:$40 sps:$4 sm:$0xff]  }
 0x315   :  { %6224 = vmatprep.subr.bf16.mxu0 %v9714_v43  ;;  %8247 = vmatprep.subr.bf16.mxu1 %v9715_v35  ;;  %v9807_v36 = vld [vmem:[%s12987_s3 + $0x1e0] sm:$0xff]   ;;  %v9744_v35 = vld [vmem:[%s12984_s1 + $0x1334] ss:$40 sps:$4 sm:$0xff]  }
 0x316   :  { %v5771_v26 = vpop.f32.mrb[8].mxu0  ;;  %v9739_v43 = vld [vmem:[%s12984_s1 + $0x12e0] ss:$40 sps:$4 sm:$0xff]  }
 0x317   :  { %v8345_v54 = vadd.f32 %v5771_v26, %v864_v63  ;;  %v5773_v55 = vpop.f32.mrb[9].mxu0  ;;  %v9811_v26 = vld [vmem:[%s12987_s3 + $0x1f0] sm:$0xff]  }
 0x318   :  { %v8346_v22 = vadd.f32 %v5773_v55, %v868_v46  ;;  %v5775_v31 = vpop.f32.mrb[10].mxu0  ;;  %6225 = vmatpush1.bf16.msra.mxu0 %v9712_v39  ;;  %8248 = vmatpush3.bf16.msra.mxu1 %v9716_v5  ;;  %v9742_v39 = vld [vmem:[%s12984_s1 + $0x1330] ss:$40 sps:$4 sm:$0xff]   ;;  %v9747_v5 = vld [vmem:[%s12984_s1 + $0x1384] ss:$40 sps:$4 sm:$0xff]  }
 0x319   :  { %v8347_v27 = vadd.f32 %v5775_v31, %v864_v63  ;;  %v5777_v14 = vpop.f32.mrb[11].mxu0  ;;  %6226 = vmatprep.subr.bf16.mxu0 %v9719_v52  ;;  %8249 = vmatprep.subr.bf16.mxu1 %v9720_v13  ;;  %v6324_v51 = vmax.f32 %v8345_v54, 0.0  ;;  %v9810_v52 = vld [vmem:[%s12987_s3 + $0x1a8] sm:$0xff]   ;;  %v9750_v54 = vld [vmem:[%s12984_s1 + $0x13d4] ss:$40 sps:$4 sm:$0xff]  }
 0x31a   :  { %v8348_v49 = vadd.f32 %v5777_v14, %v868_v46  ;;  %v6325_v34 = vmax.f32 %v8346_v22, 0.0  ;;  %v9745_v13 = vld [vmem:[%s12984_s1 + $0x1380] ss:$40 sps:$4 sm:$0xff]   ;;  %v9812_v55 = vld [vmem:[%s12987_s3 + $0x1b0] sm:$0xff]   ;;  %v9813_v22 = vld [vmem:[%s12987_s3 + $0x1f8] sm:$0xff]  }
 0x31b   :  { %v6334_v41 = vmax.f32 %v8347_v27, 0.0  ;;  %v9748_v31 = vld [vmem:[%s12984_s1 + $0x13d0] ss:$40 sps:$4 sm:$0xff]   ;;  %v9751_v14 = vld [vmem:[%s12984_s1 + $0x1420] ss:$40 sps:$4 sm:$0xff]  }
 0x31c   :  { %v6335_v59 = vmax.f32 %v8348_v49, 0.0  ;;  %6227 = vmatpush1.bf16.msra.mxu0 %v9717_v28  ;;  %8250 = vmatpush3.bf16.msra.mxu1 %v9721_v57  ;;  %v9753_v28 = vld [vmem:[%s12984_s1 + $0x1424] ss:$40 sps:$4 sm:$0xff]   ;;  %v9814_v27 = vld [vmem:[%s12987_s3 + $0x1b8] sm:$0xff]  }
 0x31d   :  { %v6364_v61 = vpack.c.bf16 %v6334_v41, %v6324_v51  ;;  %6228 = vmatprep.subr.bf16.mxu0 %v9724_v58  ;;  %8251 = vmatprep.subr.bf16.mxu1 %v9725_v25  ;;  %v9756_v57 = vld [vmem:[%s12984_s1 + $0x1474] ss:$40 sps:$4 sm:$0xff]   ;;  %v9874_v58 = vld [vmem:[%s12985_s0 + $0x18] ss:$40 sps:$4 sm:$0xff]   ;;  %v9759_v51 = vld [vmem:[%s12984_s1 + $0x14c4] ss:$40 sps:$4 sm:$0xff]  }
 0x31e   :  { %v6365_v40 = vpack.c.bf16 %v6335_v59, %v6325_v34  ;;  %v5781_v42 = vpop.f32.mrb[12].mxu0  ;;  %v9754_v49 = vld [vmem:[%s12984_s1 + $0x1470] ss:$40 sps:$4 sm:$0xff]   ;;  %v9875_v25 = vld [vmem:[%s12985_s0 + $0x6c] ss:$40 sps:$4 sm:$0xff]  }
 0x31f   :  { %v8349_v50 = vadd.f32 %v5781_v42, %v864_v63  ;;  %v5783_v1 = vpop.f32.mrb[13].mxu0  ;;  %v9757_v41 = vld [vmem:[%s12984_s1 + $0x14c0] ss:$40 sps:$4 sm:$0xff]   ;;  %v9762_v34 = vld [vmem:[%s12984_s1 + $0x1514] ss:$40 sps:$4 sm:$0xff]  }
 0x320   :  { %v8350_v53 = vadd.f32 %v5783_v1, %v868_v46  ;;  %v5785_v2 = vpop.f32.mrb[14].mxu0  ;;  %6229 = vmatpush1.bf16.msra.mxu0 %v9722_v32  ;;  %7157 = vmatprep.mubr.bf16.mxu1 %v6365_v40  ;;  %v9876_v59 = vld [vmem:[%s12985_s0 + $0x68] ss:$40 sps:$4 sm:$0xff]   ;;  %v9768_v40 = vld [vmem:[%s12984_s1 + $0x15b4] ss:$40 sps:$4 sm:$0xff]  }
 0x321   :  { %v8351_v3 = vadd.f32 %v5785_v2, %v864_v63  ;;  %8252 = vmatpush3.bf16.msra.mxu1 %v9726_v62  ;;  %v5787_v29 = vpop.f32.mrb[15].mxu0  ;;  %6230 = vmatprep.subr.bf16.mxu0 %v9729_v21  ;;  %v6344_v10 = vmax.f32 %v8349_v50, 0.0  ;;  %v9808_v63 = vld [vmem:[%s12987_s3 + $0x1a0] sm:$0xff]   ;;  %v9760_v32 = vld [vmem:[%s12984_s1 + $0x1510] ss:$40 sps:$4 sm:$0xff]  }
 0x322   :  { %v8352_v8 = vadd.f32 %v5787_v29, %v868_v46  ;;  %8265 = vmatprep.subr.bf16.mxu1 %v9799_v0  ;;  %v6345_v48 = vmax.f32 %v8350_v53, 0.0  ;;  %v9809_v46 = vld [vmem:[%s12987_s3 + $0x1e8] sm:$0xff]   ;;  %v9766_v42 = vld [vmem:[%s12984_s1 + $0x15b0] ss:$40 sps:$4 sm:$0xff]   ;;  %v9774_v1 = vld [vmem:[%s12984_s1 + $0x1654] ss:$40 sps:$4 sm:$0xff]  }
 0x323   :  { %v6354_v60 = vmax.f32 %v8351_v3, 0.0  ;;  %v9765_v62 = vld [vmem:[%s12984_s1 + $0x1564] ss:$40 sps:$4 sm:$0xff]   ;;  %v9763_v21 = vld [vmem:[%s12984_s1 + $0x1560] ss:$40 sps:$4 sm:$0xff]  }
 0x324   :  { %v6355_v11 = vmax.f32 %v8352_v8, 0.0  ;;  %7158 = vmatmul.mubr.bf16.vlgmr.msra.gmra.mrb[40].mxu1 %v6364_v61  ;;  %6231 = vmatpush1.bf16.msra.mxu0 %v9727_v38  ;;  %v9877_v61 = vld [vmem:[%s12985_s0 + $0x24] ss:$40 sps:$4 sm:$0xff]   ;;  %v9769_v50 = vld [vmem:[%s12984_s1 + $0x1600] ss:$40 sps:$4 sm:$0xff]  }
 0x325   :  { %v6374_v44 = vpack.c.bf16 %v6354_v60, %v6344_v10  ;;  %6232 = vmatprep.subr.bf16.mxu0 %v9732_v56  ;;  %8266 = vmatpush3.bf16.msra.mxu1 %v9800_v4  ;;  %v9771_v0 = vld [vmem:[%s12984_s1 + $0x1604] ss:$40 sps:$4 sm:$0xff]   ;;  %v9772_v53 = vld [vmem:[%s12984_s1 + $0x1650] ss:$40 sps:$4 sm:$0xff]   ;;  %v9775_v38 = vld [vmem:[%s12984_s1 + $0x16a0] ss:$40 sps:$4 sm:$0xff]  }
 0x326   :  { %v6375_v18 = vpack.c.bf16 %v6355_v11, %v6345_v48  ;;  %8267 = vmatprep.subr.bf16.mxu1 %v9801_v9  ;;  %v9777_v2 = vld [vmem:[%s12984_s1 + $0x16a4] ss:$40 sps:$4 sm:$0xff]   ;;  %v9780_v3 = vld [vmem:[%s12984_s1 + $0x16f4] ss:$40 sps:$4 sm:$0xff]   ;;  %v9778_v29 = vld [vmem:[%s12984_s1 + $0x16f0] ss:$40 sps:$4 sm:$0xff]  }
 0x327   :  { %v9783_v56 = vld [vmem:[%s12984_s1 + $0x1744] ss:$40 sps:$4 sm:$0xff]   ;;  %v9781_v4 = vld [vmem:[%s12984_s1 + $0x1740] ss:$40 sps:$4 sm:$0xff]   ;;  %v9786_v8 = vld [vmem:[%s12984_s1 + $0x1794] ss:$40 sps:$4 sm:$0xff]  }
 0x328   :  { %6233 = vmatpush1.bf16.msra.mxu0 %v9730_v19  ;;  %7165 = vmatprep.mubr.bf16.mxu1 %v6375_v18  ;;  %v9784_v9 = vld [vmem:[%s12984_s1 + $0x1790] ss:$40 sps:$4 sm:$0xff]   ;;  %v9789_v10 = vld [vmem:[%s12984_s1 + $0x17e4] ss:$40 sps:$4 sm:$0xff]   ;;  %v9787_v60 = vld [vmem:[%s12984_s1 + $0x17e0] ss:$40 sps:$4 sm:$0xff]  }
 0x329   :  { %6234 = vmatprep.subr.bf16.mxu0 %v9735_v24  ;;  %8268 = vmatpush3.bf16.msra.mxu1 %v9802_v17  ;;  %v9792_v48 = vld [vmem:[%s12984_s1 + $0x1834] ss:$40 sps:$4 sm:$0xff]   ;;  %v9790_v11 = vld [vmem:[%s12984_s1 + $0x1830] ss:$40 sps:$4 sm:$0xff]   ;;  %v9795_v19 = vld [vmem:[%s12984_s1 + $0x1884] ss:$40 sps:$4 sm:$0xff]  }
 0x32a   :  { %8269 = vmatprep.subr.bf16.mxu1 %v9803_v6  ;;  %v9798_v24 = vld [vmem:[%s12984_s1 + $0x18d4] ss:$40 sps:$4 sm:$0xff]   ;;  %v9796_v17 = vld [vmem:[%s12984_s1 + $0x18d0] ss:$40 sps:$4 sm:$0xff]   ;;  %v9878_v18 = vld [vmem:[%s12985_s0 + $0x20] ss:$40 sps:$4 sm:$0xff]  }
 0x32b   :  { %v9879_v6 = vld [vmem:[%s12985_s0 + $0x74] ss:$40 sps:$4 sm:$0xff]  }
 0x32c   :  { %7166 = vmatmul.mubr.bf16.gmra.mrb[44].mxu1 %v6374_v44  ;;  %6235 = vmatpush1.bf16.msra.mxu0 %v9733_v23  ;;  %v9793_v44 = vld [vmem:[%s12984_s1 + $0x1880] ss:$40 sps:$4 sm:$0xff]  }
 0x32d   :  { %6236 = vmatprep.subr.bf16.mxu0 %v9738_v12  ;;  %8270 = vmatpush3.bf16.msra.mxu1 %v9804_v37  ;;  %v9815_v23 = vld [vmem:[%s12987_s3 + $0x240] sm:$0xff]   ;;  %v9880_v12 = vld [vmem:[%s12985_s0 + $0x70] ss:$40 sps:$4 sm:$0xff]   ;;  %v871_v37 = vsub.s32 6, %v11501_v7 }
 0x32e   :  { %8271 = vmatprep.subr.bf16.mxu1 %v9805_v30  ;;  %v875_v30 = vsub.s32 7, %v11501_v7 }
 0x330   :  { %6237 = vmatpush1.bf16.msra.mxu0 %v9736_v15  ;;  %v872_v15 = vrot.slane %v12663_v16, %v871_v37 }
 0x331   :  { %6238 = vmatprep.subr.bf16.mxu0 %v9741_v20  ;;  %8272 = vmatpush3.bf16.msra.mxu1 %v9806_v33  ;;  %v876_v20 = vrot.slane %v12663_v16, %v875_v30  ;;  %v9828_v30 = vld [vmem:[%s12987_s3 + $0x230] sm:$0xff]  }
 0x332   :  { %8273 = vmatprep.subr.bf16.mxu1 %v9807_v36 }
 0x334   :  { %6239 = vmatpush1.bf16.msra.mxu0 %v9739_v43 }
 0x335   :  { %6240 = vmatprep.subr.bf16.mxu0 %v9744_v35  ;;  %8274 = vmatpush3.bf16.msra.mxu1 %v9808_v63 }
 0x336   :  { %8275 = vmatprep.subr.bf16.mxu1 %v9809_v46 }
 0x338   :  { %6241 = vmatpush1.bf16.msra.mxu0 %v9742_v39 }
 0x339   :  { %6242 = vmatprep.subr.bf16.mxu0 %v9747_v5  ;;  %8276 = vmatpush3.bf16.msra.mxu1 %v9810_v52 }
 0x33a   :  { %8277 = vmatprep.subr.bf16.mxu1 %v9811_v26 }
 0x33c   :  { %6243 = vmatpush1.bf16.msra.mxu0 %v9745_v13 }
 0x33d   :  { %6244 = vmatprep.subr.bf16.mxu0 %v9750_v54  ;;  %8278 = vmatpush3.bf16.msra.mxu1 %v9812_v55 }
 0x33e   :  { %8279 = vmatprep.subr.bf16.mxu1 %v9813_v22 }
 0x340   :  { %6245 = vmatpush1.bf16.msra.mxu0 %v9748_v31 }
 0x341   :  { %6267 = vmatprep.subr.bf16.mxu0 %v9753_v28  ;;  %8280 = vmatpush3.bf16.msra.mxu1 %v9814_v27  ;;  %v9816_v28 = vld [vmem:[%s12987_s3 + $0x200] sm:$0xff]  }
 0x342   :  { %8293 = vmatprep.subr.bf16.mxu1 %v9815_v23 }
 0x343   :  { %6247 = vmatmul.mubr.bf16.vlgmr.msra.gmra.mrb[16].mxu0 %v9874_v58 }
 0x344   :  { %6268 = vmatpush1.bf16.msra.mxu0 %v9751_v14  ;;  %6256 = vmatprep.mubr.bf16.mxu0 %v9875_v25  ;;  %v9817_v14 = vld [vmem:[%s12987_s3 + $0x248] sm:$0xff]  }
 0x345   :  { %6269 = vmatprep.subr.bf16.mxu0 %v9756_v57 }
 0x348   :  { %6270 = vmatpush1.bf16.msra.mxu0 %v9754_v49 }
 0x349   :  { %6271 = vmatprep.subr.bf16.mxu0 %v9759_v51 }
 0x34b   :  { %6257 = vmatmul.mubr.bf16.gmra.mrb[20].mxu0 %v9876_v59 }
 0x34c   :  { %6272 = vmatpush1.bf16.msra.mxu0 %v9757_v41  ;;  %6299 = vmatprep.mubr.bf16.mxu0 %v9877_v61  ;;  %v9818_v41 = vld [vmem:[%s12987_s3 + $0x208] sm:$0xff]  }
 0x34d   :  { %6273 = vmatprep.subr.bf16.mxu0 %v9762_v34 }
 0x350   :  { %6274 = vmatpush1.bf16.msra.mxu0 %v9760_v32  ;;  %v9819_v32 = vld [vmem:[%s12987_s3 + $0x250] sm:$0xff]  }
 0x351   :  { %6275 = vmatprep.subr.bf16.mxu0 %v9765_v62 }
 0x354   :  { %6276 = vmatpush1.bf16.msra.mxu0 %v9763_v21 }
 0x355   :  { %6277 = vmatprep.subr.bf16.mxu0 %v9768_v40 }
 0x358   :  { %6278 = vmatpush1.bf16.msra.mxu0 %v9766_v42  ;;  %v9820_v42 = vld [vmem:[%s12987_s3 + $0x210] sm:$0xff]  }
 0x359   :  { %6279 = vmatprep.subr.bf16.mxu0 %v9771_v0  ;;  %v9821_v0 = vld [vmem:[%s12987_s3 + $0x258] sm:$0xff]  }
 0x35c   :  { %6280 = vmatpush1.bf16.msra.mxu0 %v9769_v50  ;;  %v9822_v50 = vld [vmem:[%s12987_s3 + $0x218] sm:$0xff]  }
 0x35d   :  { %6281 = vmatprep.subr.bf16.mxu0 %v9774_v1  ;;  %v9823_v1 = vld [vmem:[%s12987_s3 + $0x260] sm:$0xff]  }
 0x360   :  { %6282 = vmatpush1.bf16.msra.mxu0 %v9772_v53  ;;  %v9824_v53 = vld [vmem:[%s12987_s3 + $0x220] sm:$0xff]  }
 0x361   :  { %6283 = vmatprep.subr.bf16.mxu0 %v9777_v2  ;;  %v9825_v2 = vld [vmem:[%s12987_s3 + $0x268] sm:$0xff]  }
 0x364   :  { %6284 = vmatpush1.bf16.msra.mxu0 %v9775_v38 }
 0x365   :  { %6285 = vmatprep.subr.bf16.mxu0 %v9780_v3 }
 0x368   :  { %6286 = vmatpush1.bf16.msra.mxu0 %v9778_v29 }
 0x369   :  { %6287 = vmatprep.subr.bf16.mxu0 %v9783_v56 }
 0x36c   :  { %6288 = vmatpush1.bf16.msra.mxu0 %v9781_v4 }
 0x36d   :  { %6289 = vmatprep.subr.bf16.mxu0 %v9786_v8 }
 0x370   :  { %6290 = vmatpush1.bf16.msra.mxu0 %v9784_v9 }
 0x371   :  { %6291 = vmatprep.subr.bf16.mxu0 %v9789_v10 }
 0x374   :  { %6292 = vmatpush1.bf16.msra.mxu0 %v9787_v60 }
 0x375   :  { %6293 = vmatprep.subr.bf16.mxu0 %v9792_v48 }
 0x378   :  { %6294 = vmatpush1.bf16.msra.mxu0 %v9790_v11 }
 0x379   :  { %6295 = vmatprep.subr.bf16.mxu0 %v9795_v19 }
 0x37c   :  { %6296 = vmatpush1.bf16.msra.mxu0 %v9793_v44  ;;  %v9826_v44 = vld [vmem:[%s12987_s3 + $0x228] sm:$0xff]  }
 0x37d   :  { %6297 = vmatprep.subr.bf16.mxu0 %v9798_v24  ;;  %v8100_v24 = vld [vmem:[%s12988_s4] ss:$0 sm:$0xff] }
 0x380   :  { %6298 = vmatpush1.bf16.msra.mxu0 %v9796_v17 }
 0x383   :  { %6300 = vmatmul.mubr.bf16.vlgmr.msra.gmra.mrb[16].mxu0 %v9878_v18 }
 0x384   :  { %6309 = vmatprep.mubr.bf16.mxu0 %v9879_v6  ;;  %v9827_v6 = vld [vmem:[%s12987_s3 + $0x270] sm:$0xff]  }
 0x38b   :  { %6310 = vmatmul.mubr.bf16.gmra.mrb[20].mxu0 %v9880_v12 }
 0x395   :  { %v6036_v33 = vpop.f32.mrb[16].mxu1 }
 0x396   :  { %v8353_v36 = vadd.f32 %v6036_v33, %v872_v15  ;;  %v6038_v43 = vpop.f32.mrb[17].mxu1 }
 0x397   :  { %v8354_v35 = vadd.f32 %v6038_v43, %v876_v20  ;;  %v6040_v63 = vpop.f32.mrb[18].mxu1  ;;  %v9829_v43 = vld [vmem:[%s12987_s3 + $0x278] sm:$0xff]  }
 0x398   :  { %v8355_v46 = vadd.f32 %v6040_v63, %v872_v15  ;;  %v6042_v39 = vpop.f32.mrb[19].mxu1  ;;  %v6326_v52 = vmax.f32 %v8353_v36, 0.0  ;;  %v9830_v63 = vld [vmem:[%s12987_s3 + $0x238] sm:$0xff]  }
 0x399   :  { %v8356_v5 = vadd.f32 %v6042_v39, %v876_v20  ;;  %v6327_v13 = vmax.f32 %v8354_v35, 0.0 }
 0x39a   :  { %v6336_v26 = vmax.f32 %v8355_v46, 0.0 }
 0x39b   :  { %v6337_v54 = vmax.f32 %v8356_v5, 0.0 }
 0x39c   :  { %v6366_v55 = vpack.c.bf16 %v6336_v26, %v6326_v52 }
 0x39d   :  { %v6367_v22 = vpack.c.bf16 %v6337_v54, %v6327_v13  ;;  %v6046_v31 = vpop.f32.mrb[20].mxu1 }
 0x39e   :  { %v8357_v16 = vadd.f32 %v6046_v31, %v872_v15  ;;  %v6048_v27 = vpop.f32.mrb[21].mxu1 }
 0x39f   :  { %v8358_v57 = vadd.f32 %v6048_v27, %v876_v20  ;;  %v6050_v58 = vpop.f32.mrb[22].mxu1  ;;  %7206 = vmatprep.mubr.bf16.mxu1 %v6367_v22 }
 0x3a0   :  { %v8359_v49 = vadd.f32 %v6050_v58, %v872_v15  ;;  %v6052_v25 = vpop.f32.mrb[23].mxu1  ;;  %7207 = vmatmul.mubr.bf16.vlgmr.msra.gmra.mrb[48].mxu1 %v6366_v55  ;;  %v6346_v34 = vmax.f32 %v8357_v16, 0.0 }
 0x3a1   :  { %v8360_v51 = vadd.f32 %v6052_v25, %v876_v20  ;;  %8294 = vmatpush3.bf16.msra.mxu1 %v9816_v28  ;;  %v6347_v61 = vmax.f32 %v8358_v57, 0.0 }
 0x3a2   :  { %v6356_v59 = vmax.f32 %v8359_v49, 0.0  ;;  %8295 = vmatprep.subr.bf16.mxu1 %v9817_v14 }
 0x3a3   :  { %v6357_v62 = vmax.f32 %v8360_v51, 0.0 }
 0x3a4   :  { %v6376_v21 = vpack.c.bf16 %v6356_v59, %v6346_v34 }
 0x3a5   :  { %v6377_v40 = vpack.c.bf16 %v6357_v62, %v6347_v61  ;;  %8296 = vmatpush3.bf16.msra.mxu1 %v9818_v41 }
 0x3a6   :  { %8297 = vmatprep.subr.bf16.mxu1 %v9819_v32 }
 0x3a7   :  { %7214 = vmatprep.mubr.bf16.mxu1 %v6377_v40  ;;  %v842_v40 = vld [vmem:[%s12986_s2 + $0x8] sm:$0x3] }
 0x3a8   :  { %7215 = vmatmul.mubr.bf16.gmra.mrb[52].mxu1 %v6376_v21 }
 0x3a9   :  { %8298 = vmatpush3.bf16.msra.mxu1 %v9820_v42  ;;  %v880_v42 = vrot.slane %v842_v40, %v847_v45 }
 0x3aa   :  { %8299 = vmatprep.subr.bf16.mxu1 %v9821_v0  ;;  %v884_v0 = vrot.slane %v842_v40, %v851_v47 }
 0x3ad   :  { %8300 = vmatpush3.bf16.msra.mxu1 %v9822_v50 }
 0x3ae   :  { %8301 = vmatprep.subr.bf16.mxu1 %v9823_v1 }
 0x3b1   :  { %8302 = vmatpush3.bf16.msra.mxu1 %v9824_v53 }
 0x3b2   :  { %8303 = vmatprep.subr.bf16.mxu1 %v9825_v2 }
 0x3b5   :  { %v8197_v38 = vpop.f32.mrb[24].mxu1  ;;  %8304 = vmatpush3.bf16.msra.mxu1 %v9826_v44 }
 0x3b6   :  { %v8198_v3 = vpop.f32.mrb[25].mxu1  ;;  %8305 = vmatprep.subr.bf16.mxu1 %v9827_v6 }
 0x3b7   :  { %v8199_v29 = vadd.f32 %v8198_v3, %v8197_v38  ;;  %v8200_v56 = vpop.f32.mrb[26].mxu1 }
 0x3b8   :  { %v8201_v4 = vpop.f32.mrb[27].mxu1 }
 0x3b9   :  { %v8202_v8 = vadd.f32 %v8201_v4, %v8200_v56  ;;  %v7062_v23 = vadd.f32 %v8199_v29, %v8100_v24  ;;  %8306 = vmatpush3.bf16.msra.mxu1 %v9828_v30 }
 0x3ba   :  { %8307 = vmatprep.subr.bf16.mxu1 %v9829_v43 }
 0x3bb   :  { %v7065_v20 = vadd.f32 %v8202_v8, %v8100_v24 }
 0x3bd   :  { %v8203_v9 = vpop.f32.mrb[28].mxu1  ;;  %8308 = vmatpush3.bf16.msra.mxu1 %v9830_v63 }
 0x3be   :  { %v8204_v10 = vpop.f32.mrb[29].mxu1 }
 0x3bf   :  { %v8205_v60 = vadd.f32 %v8204_v10, %v8203_v9  ;;  %v8206_v48 = vpop.f32.mrb[30].mxu1 }
 0x3c0   :  { %v8207_v11 = vpop.f32.mrb[31].mxu1 }
 0x3c1   :  { %v8208_v19 = vadd.f32 %v8207_v11, %v8206_v48  ;;  %v7070_v5 = vadd.f32 %v8205_v60, %v8100_v24 }
 0x3c3   :  { %v7073_v54 = vadd.f32 %v8208_v19, %v8100_v24 }
 0x3d5   :  { %v8225_v17 = vpop.f32.mrb[32].mxu1 }
 0x3d6   :  { %v8226_v18 = vpop.f32.mrb[33].mxu1 }
 0x3d7   :  { %v8227_v12 = vadd.f32 %v8226_v18, %v8225_v17  ;;  %v8228_v37 = vpop.f32.mrb[34].mxu1 }
 0x3d8   :  { %v8229_v15 = vpop.f32.mrb[35].mxu1 }
 0x3d9   :  { %v7111_v33 = vadd.f32 %v8227_v12, %v7062_v23  ;;  %v8230_v36 = vadd.f32 %v8229_v15, %v8228_v37 }
 0x3db   :  { %v7114_v35 = vadd.f32 %v8230_v36, %v7065_v20 }
 0x3dd   :  { %v8231_v46 = vpop.f32.mrb[36].mxu1 }
 0x3de   :  { %v8232_v39 = vpop.f32.mrb[37].mxu1 }
 0x3df   :  { %v8233_v52 = vadd.f32 %v8232_v39, %v8231_v46  ;;  %v8234_v26 = vpop.f32.mrb[38].mxu1 }
 0x3e0   :  { %v8235_v13 = vpop.f32.mrb[39].mxu1 }
 0x3e1   :  { %v7119_v55 = vadd.f32 %v8233_v52, %v7070_v5  ;;  %v8236_v22 = vadd.f32 %v8235_v13, %v8234_v26 }
 0x3e3   :  { %v7122_v31 = vadd.f32 %v8236_v22, %v7073_v54 }
 0x3f7   :  { %v8253_v28 = vpop.f32.mrb[40].mxu1 }
 0x3f8   :  { %v8254_v16 = vpop.f32.mrb[41].mxu1 }
 0x3f9   :  { %v8255_v27 = vadd.f32 %v8254_v16, %v8253_v28  ;;  %v8256_v14 = vpop.f32.mrb[42].mxu1 }
 0x3fa   :  { %v8257_v57 = vpop.f32.mrb[43].mxu1 }
 0x3fb   :  { %v7160_v58 = vadd.f32 %v8255_v27, %v7111_v33  ;;  %v8258_v49 = vadd.f32 %v8257_v57, %v8256_v14 }
 0x3fd   :  { %v7163_v25 = vadd.f32 %v8258_v49, %v7114_v35 }
 0x3ff   :  { %v8259_v51 = vpop.f32.mrb[44].mxu1 }
 0x400   :  { %v8260_v41 = vpop.f32.mrb[45].mxu1 }
 0x401   :  { %v8261_v34 = vadd.f32 %v8260_v41, %v8259_v51  ;;  %v8262_v59 = vpop.f32.mrb[46].mxu1 }
 0x402   :  { %v8263_v32 = vpop.f32.mrb[47].mxu1 }
 0x403   :  { %v7168_v61 = vadd.f32 %v8261_v34, %v7119_v55  ;;  %v8264_v62 = vadd.f32 %v8263_v32, %v8262_v59 }
 0x405   :  { %v7171_v21 = vadd.f32 %v8264_v62, %v7122_v31 }
 0x456   :  { %v6301_v50 = vpop.f32.mrb[16].mxu0 }
 0x457   :  { %v8361_v1 = vadd.f32 %v6301_v50, %v880_v42  ;;  %v6303_v53 = vpop.f32.mrb[17].mxu0 }
 0x458   :  { %v8362_v2 = vadd.f32 %v6303_v53, %v884_v0  ;;  %v6305_v38 = vpop.f32.mrb[18].mxu0 }
 0x459   :  { %v8363_v3 = vadd.f32 %v6305_v38, %v880_v42  ;;  %v6307_v29 = vpop.f32.mrb[19].mxu0  ;;  %v6328_v4 = vmax.f32 %v8361_v1, 0.0 }
 0x45a   :  { %v8364_v56 = vadd.f32 %v6307_v29, %v884_v0  ;;  %v6329_v9 = vmax.f32 %v8362_v2, 0.0 }
 0x45b   :  { %v6338_v8 = vmax.f32 %v8363_v3, 0.0 }
 0x45c   :  { %v6339_v10 = vmax.f32 %v8364_v56, 0.0 }
 0x45d   :  { %v6368_v60 = vpack.c.bf16 %v6338_v8, %v6328_v4 }
 0x45e   :  { %v6369_v48 = vpack.c.bf16 %v6339_v10, %v6329_v9  ;;  %v6311_v11 = vpop.f32.mrb[20].mxu0 }
 0x45f   :  { %v8365_v19 = vadd.f32 %v6311_v11, %v880_v42  ;;  %v6313_v45 = vpop.f32.mrb[21].mxu0 }
 0x460   :  { %v8366_v44 = vadd.f32 %v6313_v45, %v884_v0  ;;  %v6315_v7 = vpop.f32.mrb[22].mxu0  ;;  %7255 = vmatprep.mubr.bf16.mxu1 %v6369_v48 }
 0x461   :  { %v8367_v47 = vadd.f32 %v6315_v7, %v880_v42  ;;  %v6317_v24 = vpop.f32.mrb[23].mxu0  ;;  %7256 = vmatmul.mubr.bf16.vlgmr.msra.gmra.mrb[56].mxu1 %v6368_v60  ;;  %v6348_v18 = vmax.f32 %v8365_v19, 0.0 }
 0x462   :  { %v8368_v17 = vadd.f32 %v6317_v24, %v884_v0  ;;  %v6349_v23 = vmax.f32 %v8366_v44, 0.0 }
 0x463   :  { %v6358_v6 = vmax.f32 %v8367_v47, 0.0 }
 0x464   :  { %v6359_v12 = vmax.f32 %v8368_v17, 0.0 }
 0x465   :  { %v6378_v37 = vpack.c.bf16 %v6358_v6, %v6348_v18 }
 0x466   :  { %v6379_v30 = vpack.c.bf16 %v6359_v12, %v6349_v23 }
 0x468   :  { %7263 = vmatprep.mubr.bf16.mxu1 %v6379_v30 }
 0x469   :  { %7264 = vmatmul.mubr.bf16.gmra.mrb[60].mxu1 %v6378_v37 }
 0x473   :  { %v8281_v15 = vpop.f32.mrb[48].mxu1 }
 0x474   :  { %v8282_v20 = vpop.f32.mrb[49].mxu1 }
 0x475   :  { %v8283_v33 = vadd.f32 %v8282_v20, %v8281_v15  ;;  %v8284_v36 = vpop.f32.mrb[50].mxu1 }
 0x476   :  { %v8285_v43 = vpop.f32.mrb[51].mxu1 }
 0x477   :  { %v7209_v35 = vadd.f32 %v8283_v33, %v7160_v58  ;;  %v8286_v63 = vadd.f32 %v8285_v43, %v8284_v36 }
 0x479   :  { %v7212_v46 = vadd.f32 %v8286_v63, %v7163_v25 }
 0x47b   :  { %v8287_v39 = vpop.f32.mrb[52].mxu1 }
 0x47c   :  { %v8288_v5 = vpop.f32.mrb[53].mxu1 }
 0x47d   :  { %v8289_v52 = vadd.f32 %v8288_v5, %v8287_v39  ;;  %v8290_v26 = vpop.f32.mrb[54].mxu1 }
 0x47e   :  { %v8291_v13 = vpop.f32.mrb[55].mxu1 }
 0x47f   :  { %v7217_v54 = vadd.f32 %v8289_v52, %v7168_v61  ;;  %v8292_v55 = vadd.f32 %v8291_v13, %v8290_v26 }
 0x481   :  { %v7220_v22 = vadd.f32 %v8292_v55, %v7171_v21 }
 0x534   :  { %v8309_v31 = vpop.f32.mrb[56].mxu1 }
 0x535   :  { %v8310_v28 = vpop.f32.mrb[57].mxu1 }
 0x536   :  { %v8311_v16 = vadd.f32 %v8310_v28, %v8309_v31  ;;  %v8312_v27 = vpop.f32.mrb[58].mxu1 }
 0x537   :  { %v8313_v14 = vpop.f32.mrb[59].mxu1 }
 0x538   :  { %v7258_v57 = vadd.f32 %v8311_v16, %v7209_v35  ;;  %v8314_v49 = vadd.f32 %v8313_v14, %v8312_v27 }
 0x53a   :  { %7272 = vst [vmem:[%s12989_s5] sm:$0xff] %v7258_v57  ;;  %v7261_v58 = vadd.f32 %v8314_v49, %v7212_v46 }
 0x53c   :  { %7273 = vst [vmem:[%s12989_s5 + $0x8] sm:$0xff] %v7261_v58  ;;  %v8315_v25 = vpop.f32.mrb[60].mxu1 }
 0x53d   :  { %v8316_v51 = vpop.f32.mrb[61].mxu1 }
 0x53e   :  { %v8317_v41 = vadd.f32 %v8316_v51, %v8315_v25  ;;  %v8318_v34 = vpop.f32.mrb[62].mxu1 }
 0x53f   :  { %v8319_v59 = vpop.f32.mrb[63].mxu1 }
 0x540   :  { %v7266_v32 = vadd.f32 %v8317_v41, %v7217_v54  ;;  %v8320_v61 = vadd.f32 %v8319_v59, %v8318_v34 }
 0x542   :  { %7274 = vst [vmem:[%s12989_s5 + $0x10] sm:$0xff] %v7266_v32  ;;  %v7269_v62 = vadd.f32 %v8320_v61, %v7220_v22 }
 0x544   :  { %7275 = vst [vmem:[%s12989_s5 + $0x18] sm:$0xff] %v7269_v62 }

</bundles_post_ra>
